<compile_context>
chip_gen: v7x
topology: tpu7x:2x2x1
jax: 0.10.0
libtpu: 0.0.40
codegen_flags: <defaults>
</compile_context>

<pallas_src>
import numpy as np

import jax
import jax.numpy as jnp
from jax.experimental import pallas as pl
from jax.experimental.pallas import tpu as pltpu


# --------------------------------------------------------------------------
# Kernel
# --------------------------------------------------------------------------
def _net_kernel(x_ref, m1_ref, b1_ref, m2_ref, b2_ref,
                fc1w_ref, fc1b_ref, fc2w_ref, fc2b_ref, out_ref):
    cdt = m1_ref.dtype                       # matmul operand dtype (bf16 or f32)
    x = x_ref[...].astype(cdt)               # (B, C_in*L), batch on sublanes

    # conv1 (+ max_pool1d(2)) : one GEMM against the stacked [even | odd]
    # Toeplitz, then a VPU max of the two lane-aligned halves, bias, ReLU.
    h1 = jnp.dot(x, m1_ref[...], preferred_element_type=jnp.float32)
    half1 = h1.shape[1] // 2
    p1 = jnp.maximum(jnp.maximum(h1[:, :half1], h1[:, half1:]) + b1_ref[...], 0.0)

    # conv2 (+ max_pool1d(2)), same trick.  The zero padding conv2 needs is
    # already baked into p1's column layout (zero Toeplitz columns, zero bias).
    # TODO(synk): nn.Dropout (conv2_drop) is identity in eval/inference mode.
    h2 = jnp.dot(p1.astype(cdt), m2_ref[...], preferred_element_type=jnp.float32)
    half2 = h2.shape[1] // 2
    feat = jnp.maximum(jnp.maximum(h2[:, :half2], h2[:, half2:]) + b2_ref[...], 0.0)
    # feat columns are already in x.view(-1, 64) (channel-major) order,
    # zero-padded out to 128 lanes (fc1 weight rows 64..127 are zero).

    # fc1 + ReLU.  TODO(synk): F.dropout is identity with training=False.
    a1 = jnp.maximum(
        jnp.dot(feat.astype(cdt), fc1w_ref[...],
                preferred_element_type=jnp.float32) + fc1b_ref[...], 0.0)

    # fc2 -> (B, 6) store.
    out_ref[...] = (jnp.dot(a1.astype(cdt), fc2w_ref[...],
                            preferred_element_type=jnp.float32) + fc2b_ref[...])


# --------------------------------------------------------------------------
# One-time parameter preparation (host-side numpy; cached via make_net_forward)
# --------------------------------------------------------------------------
def _round_up(a, m):
    return -(-a // m) * m


def _conv_pool_matrix_t(w, w_in_cols, pad_skip, w_out_cols, out_off,
                        n_pool, parity, n_rows, n_cols):
    """Transposed Toeplitz M (n_rows, n_cols) such that x_flat @ M applies
    conv1d(w) at positions 2*j + parity (j < n_pool) of the zero-padded input.

    x_flat is channel-major (C_in * w_in_cols); padded position q maps to input
    column q - pad_skip (out-of-range -> baked zero padding, entry dropped).
    Output (co, j) lands at column co*w_out_cols + out_off + j; all other
    columns stay zero (baked zero padding for the next layer / lane alignment).
    """
    w = np.asarray(w, np.float32)
    c_out, c_in, k_sz = w.shape
    co, ci, kk, jj = np.meshgrid(np.arange(c_out), np.arange(c_in),
                                 np.arange(k_sz), np.arange(n_pool),
                                 indexing="ij")
    src = 2 * jj + parity + kk - pad_skip              # input column in channel
    valid = (src >= 0) & (src < w_in_cols)
    rows = (ci * w_in_cols + src)[valid]
    cols = (co * w_out_cols + out_off + jj)[valid]
    vals = np.broadcast_to(w[:, :, :, None], co.shape)[valid]
    keys = rows.astype(np.int64) * n_cols + cols
    assert keys.size == np.unique(keys).size, (
        "conv/pool Toeplitz (row, col) pairs must be unique (no double count)")
    m = np.zeros((n_rows, n_cols), np.float32)
    m[rows, cols] = vals
    return m


def _pool_bias_row(b, w_out_cols, out_off, n_pool, n_cols):
    """(1, n_cols) bias row matching _conv_pool_matrix_t's output columns
    (zero on baked-padding / alignment columns so relu(0 + 0) = 0)."""
    b = np.asarray(b, np.float32)
    v = np.zeros((1, n_cols), np.float32)
    for co in range(b.shape[0]):
        s = co * w_out_cols + out_off
        v[0, s:s + n_pool] = b[co]
    return v


def prepare_net_params(params, seq_len, *, use_bf16=True):
    """Fold conv+pool(+padding) into stacked even/odd Toeplitz matrices and cast
    the MXU operands.  Call once; reuse the result for every forward call."""
    w1, b1, w2, b2, fc1w, fc1b, fc2w, fc2b = [np.asarray(p, np.float32)
                                              for p in params]
    C1, C_in, K1 = w1.shape
    C2, _, K2 = w2.shape
    P = 2
    L = seq_len
    L1 = L + 2 * P - K1 + 1                 # conv1 output length
    Lp1 = L1 // 2                           # after max_pool1d(2)
    W1 = Lp1 + 2 * P                        # per-channel width fed to conv2 (pad baked in)
    L2 = W1 - K2 + 1                        # conv2 output length
    Lp2 = L2 // 2
    R_in = C_in * L
    R1 = C1 * W1                            # 612
    R1p = _round_up(R1, 128)                # 640 -> lane-aligned GEMM half
    R2 = C2 * Lp2                           # 64
    R2p = _round_up(R2, 128)                # 128
    H, f_in = fc1w.shape
    n_out = fc2w.shape[0]
    assert f_in == R2, "fc1 in-features must equal flattened conv2 feature count"

    # Stacked [even | odd] conv+pool Toeplitz matrices (transposed: x @ M).
    m1 = np.concatenate(
        [_conv_pool_matrix_t(w1, L, P, W1, P, Lp1, par, R_in, R1p)
         for par in (0, 1)], axis=1)                       # (R_in, 2*R1p)
    b1r = _pool_bias_row(b1, W1, P, Lp1, R1p)              # (1, R1p)
    m2 = np.concatenate(
        [_conv_pool_matrix_t(w2, W1, 0, Lp2, 0, Lp2, par, R1p, R2p)
         for par in (0, 1)], axis=1)                       # (R1p, 2*R2p)
    b2r = _pool_bias_row(b2, Lp2, 0, Lp2, R2p)             # (1, R2p)

    fc1w_t = np.zeros((R2p, H), np.float32)
    fc1w_t[:R2, :] = fc1w.T                                # zero rows for pad lanes
    fc2w_t = np.ascontiguousarray(fc2w.T)                  # (H, n_out)

    cdt = jnp.bfloat16 if use_bf16 else jnp.float32
    return dict(
        m1=jnp.asarray(m1, dtype=cdt), b1=jnp.asarray(b1r, dtype=jnp.float32),
        m2=jnp.asarray(m2, dtype=cdt), b2=jnp.asarray(b2r, dtype=jnp.float32),
        fc1w=jnp.asarray(fc1w_t, dtype=cdt),
        fc1b=jnp.asarray(fc1b.reshape(1, H), dtype=jnp.float32),
        fc2w=jnp.asarray(fc2w_t, dtype=cdt),
        fc2b=jnp.asarray(fc2b.reshape(1, n_out), dtype=jnp.float32),
        seq_len=int(L), n_out=int(n_out))


# --------------------------------------------------------------------------
# Forward
# --------------------------------------------------------------------------
def net_forward_prepared(x, prep, *, batch_tile=512):
    """x: (N, 9, L) float32 (NCL).  Returns (N, 6) float32."""
    N, C_in, L = x.shape
    assert L == prep["seq_len"], "input length does not match prepared params"
    R_in = C_in * L
    n_out = prep["n_out"]
    m1, b1r, m2, b2r = prep["m1"], prep["b1"], prep["m2"], prep["b2"]
    fc1w, fc1b, fc2w, fc2b = prep["fc1w"], prep["fc1b"], prep["fc2w"], prep["fc2b"]
    assert m1.shape[0] == R_in

    # Batch tile = sublane (M) extent of every GEMM.  Shrink for small batches
    # (multiple of 8 for the f32 sublane tile).  On v7x pick batch_tile so that
    # N / batch_tile >= 2 tiles and both TensorCores get work.
    B = min(batch_tile, max(8, _round_up(N, 8)))
    n_pad = _round_up(N, B)

    # Natural layout: (N, C*L) is a free reshape; no length pad, no transpose,
    # no host-side dtype cast (bf16 cast happens in-kernel).
    xf = x.reshape(N, R_in).astype(jnp.float32)
    if n_pad != N:
        xf = jnp.pad(xf, ((0, n_pad - N), (0, 0)))

    grid_spec = pltpu.PrefetchScalarGridSpec(
        num_scalar_prefetch=0,
        grid=(n_pad // B,),
        in_specs=[
            pl.BlockSpec((B, R_in), lambda i: (i, 0)),       # activation tile
            pl.BlockSpec(m1.shape, lambda i: (0, 0)),        # conv1+pool [even|odd]
            pl.BlockSpec(b1r.shape, lambda i: (0, 0)),       # conv1 bias row
            pl.BlockSpec(m2.shape, lambda i: (0, 0)),        # conv2+pool [even|odd]
            pl.BlockSpec(b2r.shape, lambda i: (0, 0)),       # conv2 bias row
            pl.BlockSpec(fc1w.shape, lambda i: (0, 0)),      # fc1 weight (padded rows)
            pl.BlockSpec(fc1b.shape, lambda i: (0, 0)),      # fc1 bias row
            pl.BlockSpec(fc2w.shape, lambda i: (0, 0)),      # fc2 weight
            pl.BlockSpec(fc2b.shape, lambda i: (0, 0)),      # fc2 bias row
        ],
        out_specs=pl.BlockSpec((B, n_out), lambda i: (i, 0)),
    )

    out = pl.pallas_call(
        _net_kernel,
        out_shape=jax.ShapeDtypeStruct((n_pad, n_out), jnp.float32),
        grid_spec=grid_spec,
        compiler_params=pltpu.CompilerParams(
            dimension_semantics=("parallel",),
            vmem_limit_bytes=48 * 1024 * 1024),   # fits v7x 64 MiB/TC; ample on v5e/v6e
    )(xf, m1, b1r, m2, b2r, fc1w, fc1b, fc2w, fc2b)

    return out[:N]


def make_net_forward(params, *, seq_len=128, batch_tile=512, use_bf16=True):
    """Build the folded/casted parameters once and return a jitted forward fn.
    Note: with use_bf16=True operands are rounded to bf16 (f32 accumulation);
    validate the tolerance against real trained weights."""
    prep = prepare_net_params(params, seq_len, use_bf16=use_bf16)

    @jax.jit
    def forward(x):
        return net_forward_prepared(x, prep, batch_tile=batch_tile)

    return forward


# --------------------------------------------------------------------------
# Pure-JAX reference (inference mode: dropouts are identity)
# --------------------------------------------------------------------------
def net_forward_reference(x, params):
    w1, b1, w2, b2, fc1w, fc1b, fc2w, fc2b = params

    def conv1d(h, w, b, pad):
        y = jax.lax.conv_general_dilated(
            h, w, window_strides=(1,), padding=[(pad, pad)],
            dimension_numbers=("NCH", "OIH", "NCH"))
        return y + b[None, :, None]

    def maxpool2(h):
        lo = h.shape[-1] // 2
        return jnp.max(h[..., :2 * lo].reshape(h.shape[0], h.shape[1], lo, 2),
                       axis=-1)

    h = jax.nn.relu(maxpool2(conv1d(x, w1, b1, 2)))
    h = jax.nn.relu(maxpool2(conv1d(h, w2, b2, 2)))
    h = h.reshape(-1, 64)
    h = jax.nn.relu(h @ fc1w.T + fc1b)
    return h @ fc2w.T + fc2b


if __name__ == "__main__":
    key = jax.random.PRNGKey(0)
    ks = jax.random.split(key, 9)

    # Input length 128 -> conv1: 129 -> pool: 64 -> conv2: 65 -> pool: 32,
    # so 2 channels * 32 = 64 features, matching x.view(-1, 64).
    N, C_in, L = 4, 9, 128
    x = jax.random.normal(ks[0], (N, C_in, L), dtype=jnp.float32)

    # Deterministic synthetic parameters (PyTorch shape conventions).
    w1 = 0.1 * jax.random.normal(ks[1], (9, 9, 4), dtype=jnp.float32)
    b1 = 0.1 * jax.random.normal(ks[2], (9,), dtype=jnp.float32)
    w2 = 0.1 * jax.random.normal(ks[3], (2, 9, 4), dtype=jnp.float32)
    b2 = 0.1 * jax.random.normal(ks[4], (2,), dtype=jnp.float32)
    fc1w = 0.1 * jax.random.normal(ks[5], (256, 64), dtype=jnp.float32)
    fc1b = 0.1 * jax.random.normal(ks[6], (256,), dtype=jnp.float32)
    fc2w = 0.1 * jax.random.normal(ks[7], (6, 256), dtype=jnp.float32)
    fc2b = 0.1 * jax.random.normal(ks[8], (6,), dtype=jnp.float32)
    params = (w1, b1, w2, b2, fc1w, fc1b, fc2w, fc2b)

    forward = make_net_forward(params, seq_len=L)       # prep + jit happen once
    out = jax.block_until_ready(forward(x))
    assert out.shape == (N, 6) and out.dtype == jnp.float32

    ref = jax.block_until_ready(net_forward_reference(x, params))
    if not jnp.allclose(out, ref, rtol=2e-2, atol=2e-2):
        raise AssertionError(
            f"Pallas kernel mismatch vs reference: max abs err "
            f"{float(jnp.max(jnp.abs(out - ref)))}")

    print("KERNEL_OK")
</pallas_src>

<mosaic_0001>
module attributes {stable_mosaic.version = 11 : i64} {
  func.func @_net_kernel(%arg0: i32, %arg1: memref<8x1152xf32, #tpu.memory_space<vmem>>, %arg2: memref<1152x1280xbf16, #tpu.memory_space<vmem>>, %arg3: memref<1x640xf32, #tpu.memory_space<vmem>>, %arg4: memref<640x256xbf16, #tpu.memory_space<vmem>>, %arg5: memref<1x128xf32, #tpu.memory_space<vmem>>, %arg6: memref<128x256xbf16, #tpu.memory_space<vmem>>, %arg7: memref<1x256xf32, #tpu.memory_space<vmem>>, %arg8: memref<256x6xbf16, #tpu.memory_space<vmem>>, %arg9: memref<1x6xf32, #tpu.memory_space<vmem>>, %arg10: memref<8x6xf32, #tpu.memory_space<vmem>>) attributes {dimension_semantics = [#tpu.dimension_semantics<parallel>], iteration_bounds = array<i64: 1>, scalar_prefetch = 0 : i64, scratch_operands = 0 : i64, tpu.core_type = #tpu.core_type<tc>, window_params = [{transform_indices = @transform_0, window_bounds = array<i64: 8, 1152>}, {pipeline_mode = #tpu.pipeline_mode<synchronous>, transform_indices = @transform_1, window_bounds = array<i64: 1152, 1280>}, {pipeline_mode = #tpu.pipeline_mode<synchronous>, transform_indices = @transform_2, window_bounds = array<i64: 1, 640>}, {pipeline_mode = #tpu.pipeline_mode<synchronous>, transform_indices = @transform_3, window_bounds = array<i64: 640, 256>}, {pipeline_mode = #tpu.pipeline_mode<synchronous>, transform_indices = @transform_4, window_bounds = array<i64: 1, 128>}, {pipeline_mode = #tpu.pipeline_mode<synchronous>, transform_indices = @transform_5, window_bounds = array<i64: 128, 256>}, {pipeline_mode = #tpu.pipeline_mode<synchronous>, transform_indices = @transform_6, window_bounds = array<i64: 1, 256>}, {pipeline_mode = #tpu.pipeline_mode<synchronous>, transform_indices = @transform_7, window_bounds = array<i64: 256, 6>}, {pipeline_mode = #tpu.pipeline_mode<synchronous>, transform_indices = @transform_8, window_bounds = array<i64: 1, 6>}, {transform_indices = @transform_9, window_bounds = array<i64: 8, 6>}]} {
    %c0 = arith.constant 0 : index
    %c0_0 = arith.constant 0 : index
    %0 = vector.load %arg1[%c0, %c0_0] : memref<8x1152xf32, #tpu.memory_space<vmem>>, vector<8x1152xf32>
    %1 = arith.truncf %0 : vector<8x1152xf32> to vector<8x1152xbf16>
    %c0_1 = arith.constant 0 : index
    %c0_2 = arith.constant 0 : index
    %2 = vector.load %arg2[%c0_1, %c0_2] : memref<1152x1280xbf16, #tpu.memory_space<vmem>>, vector<1152x1280xbf16>
    %cst = arith.constant dense<0.000000e+00> : vector<8x1280xf32>
    %3 = tpu.matmul %1, %2, %cst {dimension_numbers = #tpu.dot_dimension_numbers<[1], [0], [0], [1], [0, 0, 1, 1], [], []>} : vector<8x1152xbf16>, vector<1152x1280xbf16>, vector<8x1280xf32> -> vector<8x1280xf32>
    %4 = vector.extract_strided_slice %3 {offsets = [0, 0], sizes = [8, 640], strides = [1, 1]} : vector<8x1280xf32> to vector<8x640xf32>
    %5 = vector.extract_strided_slice %3 {offsets = [0, 640], sizes = [8, 640], strides = [1, 1]} : vector<8x1280xf32> to vector<8x640xf32>
    %6 = arith.maximumf %4, %5 : vector<8x640xf32>
    %c0_3 = arith.constant 0 : index
    %c0_4 = arith.constant 0 : index
    %7 = vector.load %arg3[%c0_3, %c0_4] : memref<1x640xf32, #tpu.memory_space<vmem>>, vector<1x640xf32>
    %8 = vector.broadcast %7 : vector<1x640xf32> to vector<8x640xf32>
    %9 = arith.addf %6, %8 : vector<8x640xf32>
    %cst_5 = arith.constant 0.000000e+00 : f32
    %10 = vector.broadcast %cst_5 : f32 to vector<8x640xf32>
    %11 = arith.maximumf %9, %10 : vector<8x640xf32>
    %12 = arith.truncf %11 : vector<8x640xf32> to vector<8x640xbf16>
    %c0_6 = arith.constant 0 : index
    %c0_7 = arith.constant 0 : index
    %13 = vector.load %arg4[%c0_6, %c0_7] : memref<640x256xbf16, #tpu.memory_space<vmem>>, vector<640x256xbf16>
    %cst_8 = arith.constant dense<0.000000e+00> : vector<8x256xf32>
    %14 = tpu.matmul %12, %13, %cst_8 {dimension_numbers = #tpu.dot_dimension_numbers<[1], [0], [0], [1], [0, 0, 1, 1], [], []>} : vector<8x640xbf16>, vector<640x256xbf16>, vector<8x256xf32> -> vector<8x256xf32>
    %15 = vector.extract_strided_slice %14 {offsets = [0, 0], sizes = [8, 128], strides = [1, 1]} : vector<8x256xf32> to vector<8x128xf32>
    %16 = vector.extract_strided_slice %14 {offsets = [0, 128], sizes = [8, 128], strides = [1, 1]} : vector<8x256xf32> to vector<8x128xf32>
    %17 = arith.maximumf %15, %16 : vector<8x128xf32>
    %c0_9 = arith.constant 0 : index
    %c0_10 = arith.constant 0 : index
    %18 = vector.load %arg5[%c0_9, %c0_10] : memref<1x128xf32, #tpu.memory_space<vmem>>, vector<1x128xf32>
    %19 = vector.broadcast %18 : vector<1x128xf32> to vector<8x128xf32>
    %20 = arith.addf %17, %19 : vector<8x128xf32>
    %cst_11 = arith.constant 0.000000e+00 : f32
    %21 = vector.broadcast %cst_11 : f32 to vector<8x128xf32>
    %22 = arith.maximumf %20, %21 : vector<8x128xf32>
    %23 = arith.truncf %22 : vector<8x128xf32> to vector<8x128xbf16>
    %c0_12 = arith.constant 0 : index
    %c0_13 = arith.constant 0 : index
    %24 = vector.load %arg6[%c0_12, %c0_13] : memref<128x256xbf16, #tpu.memory_space<vmem>>, vector<128x256xbf16>
    %cst_14 = arith.constant dense<0.000000e+00> : vector<8x256xf32>
    %25 = tpu.matmul %23, %24, %cst_14 {dimension_numbers = #tpu.dot_dimension_numbers<[1], [0], [0], [1], [0, 0, 1, 1], [], []>} : vector<8x128xbf16>, vector<128x256xbf16>, vector<8x256xf32> -> vector<8x256xf32>
    %c0_15 = arith.constant 0 : index
    %c0_16 = arith.constant 0 : index
    %26 = vector.load %arg7[%c0_15, %c0_16] : memref<1x256xf32, #tpu.memory_space<vmem>>, vector<1x256xf32>
    %27 = vector.broadcast %26 : vector<1x256xf32> to vector<8x256xf32>
    %28 = arith.addf %25, %27 : vector<8x256xf32>
    %cst_17 = arith.constant 0.000000e+00 : f32
    %29 = vector.broadcast %cst_17 : f32 to vector<8x256xf32>
    %30 = arith.maximumf %28, %29 : vector<8x256xf32>
    %31 = arith.truncf %30 : vector<8x256xf32> to vector<8x256xbf16>
    %c0_18 = arith.constant 0 : index
    %c0_19 = arith.constant 0 : index
    %32 = vector.load %arg8[%c0_18, %c0_19] : memref<256x6xbf16, #tpu.memory_space<vmem>>, vector<256x6xbf16>
    %cst_20 = arith.constant dense<0.000000e+00> : vector<8x6xf32>
    %33 = tpu.matmul %31, %32, %cst_20 {dimension_numbers = #tpu.dot_dimension_numbers<[1], [0], [0], [1], [0, 0, 1, 1], [], []>} : vector<8x256xbf16>, vector<256x6xbf16>, vector<8x6xf32> -> vector<8x6xf32>
    %c0_21 = arith.constant 0 : index
    %c0_22 = arith.constant 0 : index
    %34 = vector.load %arg9[%c0_21, %c0_22] : memref<1x6xf32, #tpu.memory_space<vmem>>, vector<1x6xf32>
    %35 = vector.broadcast %34 : vector<1x6xf32> to vector<8x6xf32>
    %36 = arith.addf %33, %35 : vector<8x6xf32>
    %c0_23 = arith.constant 0 : index
    %c0_24 = arith.constant 0 : index
    %37 = vector.load %arg10[%c0_23, %c0_24] : memref<8x6xf32, #tpu.memory_space<vmem>>, vector<8x6xf32>
    tpu.vector_store %arg10[%c0_23, %c0_24], %36 {strides = array<i32>} : memref<8x6xf32, #tpu.memory_space<vmem>>, vector<8x6xf32>,
    return
  }
  func.func @transform_0(%arg0: i32) -> (i32, i32) {
    %c0_i32 = arith.constant 0 : i32
    %c0_i32_0 = arith.constant 0 : i32
    return %arg0, %c0_i32 : i32, i32
  }
  func.func @transform_1(%arg0: i32) -> (i32, i32) {
    %c0_i32 = arith.constant 0 : i32
    %c0_i32_0 = arith.constant 0 : i32
    %c0_i32_1 = arith.constant 0 : i32
    return %c0_i32, %c0_i32_0 : i32, i32
  }
  func.func @transform_2(%arg0: i32) -> (i32, i32) {
    %c0_i32 = arith.constant 0 : i32
    %c0_i32_0 = arith.constant 0 : i32
    %c0_i32_1 = arith.constant 0 : i32
    return %c0_i32, %c0_i32_0 : i32, i32
  }
  func.func @transform_3(%arg0: i32) -> (i32, i32) {
    %c0_i32 = arith.constant 0 : i32
    %c0_i32_0 = arith.constant 0 : i32
    %c0_i32_1 = arith.constant 0 : i32
    return %c0_i32, %c0_i32_0 : i32, i32
  }
  func.func @transform_4(%arg0: i32) -> (i32, i32) {
    %c0_i32 = arith.constant 0 : i32
    %c0_i32_0 = arith.constant 0 : i32
    %c0_i32_1 = arith.constant 0 : i32
    return %c0_i32, %c0_i32_0 : i32, i32
  }
  func.func @transform_5(%arg0: i32) -> (i32, i32) {
    %c0_i32 = arith.constant 0 : i32
    %c0_i32_0 = arith.constant 0 : i32
    %c0_i32_1 = arith.constant 0 : i32
    return %c0_i32, %c0_i32_0 : i32, i32
  }
  func.func @transform_6(%arg0: i32) -> (i32, i32) {
    %c0_i32 = arith.constant 0 : i32
    %c0_i32_0 = arith.constant 0 : i32
    %c0_i32_1 = arith.constant 0 : i32
    return %c0_i32, %c0_i32_0 : i32, i32
  }
  func.func @transform_7(%arg0: i32) -> (i32, i32) {
    %c0_i32 = arith.constant 0 : i32
    %c0_i32_0 = arith.constant 0 : i32
    %c0_i32_1 = arith.constant 0 : i32
    return %c0_i32, %c0_i32_0 : i32, i32
  }
  func.func @transform_8(%arg0: i32) -> (i32, i32) {
    %c0_i32 = arith.constant 0 : i32
    %c0_i32_0 = arith.constant 0 : i32
    %c0_i32_1 = arith.constant 0 : i32
    return %c0_i32, %c0_i32_0 : i32, i32
  }
  func.func @transform_9(%arg0: i32) -> (i32, i32) {
    %c0_i32 = arith.constant 0 : i32
    %c0_i32_0 = arith.constant 0 : i32
    return %arg0, %c0_i32 : i32, i32
  }
}

</mosaic_0001>

<bundles_post_ra>
// kernel: forward.1
= control target key start
LH: loop header
LB: loop body
LE: loop exit
PB: predicated region body
PF: predicated region fallthrough
CT: control target
= control target key end

     0   :  { %v8574_v1 = vmov 0   ;;  %vm6385_vm0 = vcmask 48128   ;;  %s11288_s1 = inlined_call_operand.vmem [shape: bf16[1152,1280], index: 1, kind: input, shape index: {}]   ;;  %s11289_s0 = inlined_call_operand.vmem [shape: f32[8,1152], index: 0, kind: input, shape index: {}]   ;;  %s11290_s3 = inlined_call_operand.vmem [shape: bf16[640,256], index: 3, kind: input, shape index: {}]   ;;  %s11291_s2 = inlined_call_operand.vmem [shape: f32[1,640], index: 2, kind: input, shape index: {}]   ;;  %s11292_s5 = inlined_call_operand.vmem [shape: bf16[128,256], index: 5, kind: input, shape index: {}]   ;;  %s11293_s7 = inlined_call_operand.vmem [shape: bf16[256,6], index: 7, kind: input, shape index: {}]   ;;  %s11294_s4 = inlined_call_operand.vmem [shape: f32[1,128], index: 4, kind: input, shape index: {}]   ;;  %s11295_s6 = inlined_call_operand.vmem [shape: f32[1,256], index: 6, kind: input, shape index: {}]   ;;  %s11296_s8 = inlined_call_operand.vmem [shape: f32[1,6], index: 8, kind: input, shape index: {}]   ;;  %s11297_s9 = inlined_call_operand.vmem [shape: f32[8,6], index: 9, kind: output, shape index: {}]  }
   0x1   :  { %v7334_v0 = vld [vmem:[%s11288_s1 + $0x4] ss:$40 sps:$4 sm:$0xff]   ;;  %4567 = vmatprep.mubr.bf16.mxu1 %v8574_v1  ;;  %v7338_v3 = vld [vmem:[%s11288_s1] ss:$40 sps:$4 sm:$0xff]   ;;  %v7340_v5 = vld [vmem:[%s11288_s1 + $0x54] ss:$40 sps:$4 sm:$0xff]  }
   0x2   :  { %v7336_v2 = vld [vmem:[%s11288_s1 + $0x1404] ss:$40 sps:$4 sm:$0xff]   ;;  %4371 = vmatprep.subr.bf16.mxu0 %v7334_v0  ;;  %v7339_v4 = vld [vmem:[%s11288_s1 + $0x1400] ss:$40 sps:$4 sm:$0xff]   ;;  %v7342_v6 = vld [vmem:[%s11288_s1 + $0x1454] ss:$40 sps:$4 sm:$0xff]  }
   0x3   :  { %4535 = vmatprep.subr.bf16.mxu1 %v7336_v2  ;;  %4372 = vmatpush1.bf16.msra.mxu0 %v7338_v3  ;;  %v7344_v7 = vld [vmem:[%s11288_s1 + $0x50] ss:$40 sps:$4 sm:$0xff]   ;;  %v7346_v9 = vld [vmem:[%s11288_s1 + $0xa4] ss:$40 sps:$4 sm:$0xff]   ;;  %v7350_v11 = vld [vmem:[%s11288_s1 + $0xa0] ss:$40 sps:$4 sm:$0xff]  }
   0x4   :  { %4536 = vmatpush1.bf16.msra.mxu1 %v7339_v4  ;;  %4373 = vmatprep.subr.bf16.mxu0 %v7340_v5  ;;  %v7345_v8 = vld [vmem:[%s11288_s1 + $0x1450] ss:$40 sps:$4 sm:$0xff]   ;;  %v7348_v10 = vld [vmem:[%s11288_s1 + $0x14a4] ss:$40 sps:$4 sm:$0xff]   ;;  %v7351_v12 = vld [vmem:[%s11288_s1 + $0x14a0] ss:$40 sps:$4 sm:$0xff]  }
   0x5   :  { %4537 = vmatprep.subr.bf16.mxu1 %v7342_v6  ;;  %v7352_v13 = vld [vmem:[%s11288_s1 + $0xf4] ss:$40 sps:$4 sm:$0xff]   ;;  %v7356_v15 = vld [vmem:[%s11288_s1 + $0xf0] ss:$40 sps:$4 sm:$0xff]   ;;  %v7358_v17 = vld [vmem:[%s11288_s1 + $0x144] ss:$40 sps:$4 sm:$0xff]  }
   0x6   :  { %v7354_v14 = vld [vmem:[%s11288_s1 + $0x14f4] ss:$40 sps:$4 sm:$0xff]   ;;  %v7357_v16 = vld [vmem:[%s11288_s1 + $0x14f0] ss:$40 sps:$4 sm:$0xff]   ;;  %v7360_v18 = vld [vmem:[%s11288_s1 + $0x1544] ss:$40 sps:$4 sm:$0xff]  }
   0x7   :  { %4374 = vmatpush1.bf16.msra.mxu0 %v7344_v7  ;;  %v7362_v19 = vld [vmem:[%s11288_s1 + $0x140] ss:$40 sps:$4 sm:$0xff]   ;;  %v7364_v21 = vld [vmem:[%s11288_s1 + $0x194] ss:$40 sps:$4 sm:$0xff]   ;;  %v7368_v23 = vld [vmem:[%s11288_s1 + $0x190] ss:$40 sps:$4 sm:$0xff]  }
   0x8   :  { %4538 = vmatpush1.bf16.msra.mxu1 %v7345_v8  ;;  %4375 = vmatprep.subr.bf16.mxu0 %v7346_v9  ;;  %v7363_v20 = vld [vmem:[%s11288_s1 + $0x1540] ss:$40 sps:$4 sm:$0xff]   ;;  %v7366_v22 = vld [vmem:[%s11288_s1 + $0x1594] ss:$40 sps:$4 sm:$0xff]   ;;  %v7369_v24 = vld [vmem:[%s11288_s1 + $0x1590] ss:$40 sps:$4 sm:$0xff]  }
   0x9   :  { %4539 = vmatprep.subr.bf16.mxu1 %v7348_v10  ;;  %v7370_v25 = vld [vmem:[%s11288_s1 + $0x1e4] ss:$40 sps:$4 sm:$0xff]   ;;  %v7374_v27 = vld [vmem:[%s11288_s1 + $0x1e0] ss:$40 sps:$4 sm:$0xff]   ;;  %v7376_v29 = vld [vmem:[%s11288_s1 + $0x234] ss:$40 sps:$4 sm:$0xff]  }
   0xa   :  { %v7372_v26 = vld [vmem:[%s11288_s1 + $0x15e4] ss:$40 sps:$4 sm:$0xff]   ;;  %v7375_v28 = vld [vmem:[%s11288_s1 + $0x15e0] ss:$40 sps:$4 sm:$0xff]   ;;  %v7378_v30 = vld [vmem:[%s11288_s1 + $0x1634] ss:$40 sps:$4 sm:$0xff]  }
   0xb   :  { %4376 = vmatpush1.bf16.msra.mxu0 %v7350_v11  ;;  %v7380_v31 = vld [vmem:[%s11288_s1 + $0x230] ss:$40 sps:$4 sm:$0xff]   ;;  %v41_v33 = vld [vmem:[%s11289_s0 + $0x40] sm:$0xff]  ;;  %v7386_v35 = vld [vmem:[%s11288_s1 + $0xc] ss:$40 sps:$4 sm:$0xff]  }
   0xc   :  { %4540 = vmatpush1.bf16.msra.mxu1 %v7351_v12  ;;  %4377 = vmatprep.subr.bf16.mxu0 %v7352_v13  ;;  %v7381_v32 = vld [vmem:[%s11288_s1 + $0x1630] ss:$40 sps:$4 sm:$0xff]   ;;  %v7382_v34 = vld [vmem:[%s11288_s1 + $0x284] ss:$40 sps:$4 sm:$0xff]   ;;  %v7387_v37 = vld [vmem:[%s11288_s1 + $0x280] ss:$40 sps:$4 sm:$0xff]   ;;  %v8737_v38 = vpack.c.bf16 %v41_v33, %v41_v33 }
   0xd   :  { %4541 = vmatprep.subr.bf16.mxu1 %v7354_v14  ;;  %v7384_v36 = vld [vmem:[%s11288_s1 + $0x8] ss:$40 sps:$4 sm:$0xff]   ;;  %v7388_v39 = vld [vmem:[%s11288_s1 + $0x2d4] ss:$40 sps:$4 sm:$0xff]   ;;  %v7390_v41 = vld [vmem:[%s11288_s1 + $0x58] ss:$40 sps:$4 sm:$0xff]  }
   0xe   :  { %v7392_v40 = vld [vmem:[%s11288_s1 + $0x5c] ss:$40 sps:$4 sm:$0xff]   ;;  %v7393_v42 = vld [vmem:[%s11288_s1 + $0x2d0] ss:$40 sps:$4 sm:$0xff]   ;;  %v7398_v44 = vld [vmem:[%s11288_s1 + $0xac] ss:$40 sps:$4 sm:$0xff]  }
   0xf   :  { %4378 = vmatpush1.bf16.msra.mxu0 %v7356_v15  ;;  %v7394_v43 = vld [vmem:[%s11288_s1 + $0x324] ss:$40 sps:$4 sm:$0xff]   ;;  %v7396_v45 = vld [vmem:[%s11288_s1 + $0xa8] ss:$40 sps:$4 sm:$0xff]   ;;  %v7400_v47 = vld [vmem:[%s11288_s1 + $0x374] ss:$40 sps:$4 sm:$0xff]  }
  0x10   :  { %4542 = vmatpush1.bf16.msra.mxu1 %v7357_v16  ;;  %4379 = vmatprep.subr.bf16.mxu0 %v7358_v17  ;;  %v7399_v46 = vld [vmem:[%s11288_s1 + $0x320] ss:$40 sps:$4 sm:$0xff]   ;;  %v7404_v48 = vld [vmem:[%s11288_s1 + $0xfc] ss:$40 sps:$4 sm:$0xff]   ;;  %v7405_v51 = vld [vmem:[%s11288_s1 + $0x370] ss:$40 sps:$4 sm:$0xff]  }
  0x11   :  { %4543 = vmatprep.subr.bf16.mxu1 %v7360_v18  ;;  %v34_v49 = vld [vmem:[%s11289_s0 + $0x8] sm:$0xff]  ;;  %v7402_v50 = vld [vmem:[%s11288_s1 + $0xf8] ss:$40 sps:$4 sm:$0xff]   ;;  %v7412_v57 = vld [vmem:[%s11288_s1 + $0x414] ss:$40 sps:$4 sm:$0xff]  }
  0x12   :  { %v8779_v52 = vpack.c.bf16 %v34_v49, %v34_v49  ;;  %v7406_v53 = vld [vmem:[%s11288_s1 + $0x3c4] ss:$40 sps:$4 sm:$0xff]   ;;  %v7408_v55 = vld [vmem:[%s11288_s1 + $0x148] ss:$40 sps:$4 sm:$0xff]   ;;  %v7414_v59 = vld [vmem:[%s11288_s1 + $0x198] ss:$40 sps:$4 sm:$0xff]  }
  0x13   :  { %4380 = vmatpush1.bf16.msra.mxu0 %v7362_v19  ;;  %v7410_v54 = vld [vmem:[%s11288_s1 + $0x14c] ss:$40 sps:$4 sm:$0xff]   ;;  %v7411_v56 = vld [vmem:[%s11288_s1 + $0x3c0] ss:$40 sps:$4 sm:$0xff]   ;;  %v7416_v58 = vld [vmem:[%s11288_s1 + $0x19c] ss:$40 sps:$4 sm:$0xff]  }
  0x14   :  { %4544 = vmatpush1.bf16.msra.mxu1 %v7363_v20  ;;  %4381 = vmatprep.subr.bf16.mxu0 %v7364_v21  ;;  %v7417_v60 = vld [vmem:[%s11288_s1 + $0x410] ss:$40 sps:$4 sm:$0xff]   ;;  %v7418_v61 = vld [vmem:[%s11288_s1 + $0x464] ss:$40 sps:$4 sm:$0xff]   ;;  %v7423_v0 = vld [vmem:[%s11288_s1 + $0x460] ss:$40 sps:$4 sm:$0xff]  }
  0x15   :  { %4545 = vmatprep.subr.bf16.mxu1 %v7366_v22  ;;  %4403 = vmatprep.mubr.bf16.mxu0 %v8779_v52  ;;  %v7422_v62 = vld [vmem:[%s11288_s1 + $0x1ec] ss:$40 sps:$4 sm:$0xff]   ;;  %v7420_v63 = vld [vmem:[%s11288_s1 + $0x1e8] ss:$40 sps:$4 sm:$0xff]   ;;  %v7428_v3 = vld [vmem:[%s11288_s1 + $0x23c] ss:$40 sps:$4 sm:$0xff]  }
  0x16   :  { %v7424_v2 = vld [vmem:[%s11288_s1 + $0x4b4] ss:$40 sps:$4 sm:$0xff]   ;;  %v7426_v4 = vld [vmem:[%s11288_s1 + $0x238] ss:$40 sps:$4 sm:$0xff]   ;;  %v7432_v6 = vld [vmem:[%s11288_s1 + $0x504] ss:$40 sps:$4 sm:$0xff]  }
  0x17   :  { %4382 = vmatpush1.bf16.msra.mxu0 %v7368_v23  ;;  %v7429_v5 = vld [vmem:[%s11288_s1 + $0x4b0] ss:$40 sps:$4 sm:$0xff]   ;;  %v33_v7 = vld [vmem:[%s11289_s0] sm:$0xff]  ;;  %v7435_v8 = vld [vmem:[%s11288_s1 + $0x28c] ss:$40 sps:$4 sm:$0xff]  }
  0x18   :  { %4546 = vmatpush1.bf16.msra.mxu1 %v7369_v24  ;;  %4383 = vmatprep.subr.bf16.mxu0 %v7370_v25  ;;  %v7430_v9 = vld [vmem:[%s11288_s1 + $0x500] ss:$40 sps:$4 sm:$0xff]   ;;  %v8843_v10 = vpack.c.bf16 %v33_v7, %v33_v7  ;;  %v7438_v12 = vld [vmem:[%s11288_s1 + $0x554] ss:$40 sps:$4 sm:$0xff]   ;;  %v7436_v14 = vld [vmem:[%s11288_s1 + $0x550] ss:$40 sps:$4 sm:$0xff]  }
  0x19   :  { %4547 = vmatprep.subr.bf16.mxu1 %v7372_v26  ;;  %v7433_v11 = vld [vmem:[%s11288_s1 + $0x288] ss:$40 sps:$4 sm:$0xff]   ;;  %v7441_v13 = vld [vmem:[%s11288_s1 + $0x2dc] ss:$40 sps:$4 sm:$0xff]   ;;  %v7439_v15 = vld [vmem:[%s11288_s1 + $0x2d8] ss:$40 sps:$4 sm:$0xff]  }
  0x1a   :  { %v7444_v16 = vld [vmem:[%s11288_s1 + $0x5a4] ss:$40 sps:$4 sm:$0xff]   ;;  %v7442_v18 = vld [vmem:[%s11288_s1 + $0x5a0] ss:$40 sps:$4 sm:$0xff]   ;;  %v7450_v20 = vld [vmem:[%s11288_s1 + $0x5f4] ss:$40 sps:$4 sm:$0xff]  }
  0x1b   :  { %4384 = vmatpush1.bf16.msra.mxu0 %v7374_v27  ;;  %v7447_v17 = vld [vmem:[%s11288_s1 + $0x32c] ss:$40 sps:$4 sm:$0xff]   ;;  %v7445_v19 = vld [vmem:[%s11288_s1 + $0x328] ss:$40 sps:$4 sm:$0xff]   ;;  %v7453_v21 = vld [vmem:[%s11288_s1 + $0x37c] ss:$40 sps:$4 sm:$0xff]  }
  0x1c   :  { %4548 = vmatpush1.bf16.msra.mxu1 %v7375_v28  ;;  %4385 = vmatprep.subr.bf16.mxu0 %v7376_v29  ;;  %v7448_v22 = vld [vmem:[%s11288_s1 + $0x5f0] ss:$40 sps:$4 sm:$0xff]   ;;  %v7456_v24 = vld [vmem:[%s11288_s1 + $0x644] ss:$40 sps:$4 sm:$0xff]   ;;  %v7454_v26 = vld [vmem:[%s11288_s1 + $0x640] ss:$40 sps:$4 sm:$0xff]  }
  0x1d   :  { %4549 = vmatprep.subr.bf16.mxu1 %v7378_v30  ;;  %v7451_v23 = vld [vmem:[%s11288_s1 + $0x378] ss:$40 sps:$4 sm:$0xff]   ;;  %v7459_v25 = vld [vmem:[%s11288_s1 + $0x3cc] ss:$40 sps:$4 sm:$0xff]   ;;  %v7457_v27 = vld [vmem:[%s11288_s1 + $0x3c8] ss:$40 sps:$4 sm:$0xff]  }
  0x1e   :  { %v7462_v28 = vld [vmem:[%s11288_s1 + $0x694] ss:$40 sps:$4 sm:$0xff]   ;;  %v7460_v30 = vld [vmem:[%s11288_s1 + $0x690] ss:$40 sps:$4 sm:$0xff]   ;;  %v7514_v7 = vld [vmem:[%s11288_s1 + $0x960] ss:$40 sps:$4 sm:$0xff]  }
  0x1f   :  { %4386 = vmatpush1.bf16.msra.mxu0 %v7380_v31  ;;  %v7465_v29 = vld [vmem:[%s11288_s1 + $0x41c] ss:$40 sps:$4 sm:$0xff]   ;;  %v7463_v31 = vld [vmem:[%s11288_s1 + $0x418] ss:$40 sps:$4 sm:$0xff]   ;;  %v7471_v33 = vld [vmem:[%s11288_s1 + $0x46c] ss:$40 sps:$4 sm:$0xff]  }
  0x20   :  { %4550 = vmatpush1.bf16.msra.mxu1 %v7381_v32  ;;  %4387 = vmatprep.subr.bf16.mxu0 %v7382_v34  ;;  %v7468_v32 = vld [vmem:[%s11288_s1 + $0x6e4] ss:$40 sps:$4 sm:$0xff]   ;;  %v36_v34 = vld [vmem:[%s11289_s0 + $0x18] sm:$0xff] }
  0x21   :  { %4576 = vmatprep.subr.bf16.mxu1 %v7386_v35  ;;  %v7466_v35 = vld [vmem:[%s11288_s1 + $0x6e0] ss:$40 sps:$4 sm:$0xff]   ;;  %v7484_v49 = vld [vmem:[%s11288_s1 + $0x7d0] ss:$40 sps:$4 sm:$0xff]  }
  0x23   :  { %4568 = vmatmul.mubr.bf16.vlgmr.msra.gmra.mrb[0].mxu1 %v8737_v38  ;;  %4388 = vmatpush1.bf16.msra.mxu0 %v7387_v37  ;;  %v7469_v37 = vld [vmem:[%s11288_s1 + $0x468] ss:$40 sps:$4 sm:$0xff]  }
  0x24   :  { %4577 = vmatpush1.bf16.msra.mxu1 %v7384_v36  ;;  %4389 = vmatprep.subr.bf16.mxu0 %v7388_v39  ;;  %v8921_v36 = vpack.c.bf16 %v36_v34, %v36_v34  ;;  %v7474_v39 = vld [vmem:[%s11288_s1 + $0x734] ss:$40 sps:$4 sm:$0xff]   ;;  %v7552_v34 = vld [vmem:[%s11288_s1 + $0xb44] ss:$40 sps:$4 sm:$0xff]  }
  0x25   :  { %4578 = vmatprep.subr.bf16.mxu1 %v7392_v40  ;;  %4608 = vmatprep.mubr.bf16.mxu1 %v8779_v52  ;;  %v7477_v40 = vld [vmem:[%s11288_s1 + $0x4bc] ss:$40 sps:$4 sm:$0xff]  }
  0x27   :  { %4390 = vmatpush1.bf16.msra.mxu0 %v7393_v42  ;;  %v7475_v42 = vld [vmem:[%s11288_s1 + $0x4b8] ss:$40 sps:$4 sm:$0xff]  }
  0x28   :  { %4579 = vmatpush1.bf16.msra.mxu1 %v7390_v41  ;;  %4391 = vmatprep.subr.bf16.mxu0 %v7394_v43  ;;  %v7472_v41 = vld [vmem:[%s11288_s1 + $0x730] ss:$40 sps:$4 sm:$0xff]   ;;  %v7480_v43 = vld [vmem:[%s11288_s1 + $0x784] ss:$40 sps:$4 sm:$0xff]  }
  0x29   :  { %4580 = vmatprep.subr.bf16.mxu1 %v7398_v44  ;;  %v7483_v44 = vld [vmem:[%s11288_s1 + $0x50c] ss:$40 sps:$4 sm:$0xff]  }
  0x2b   :  { %4392 = vmatpush1.bf16.msra.mxu0 %v7399_v46  ;;  %v7481_v46 = vld [vmem:[%s11288_s1 + $0x508] ss:$40 sps:$4 sm:$0xff]  }
  0x2c   :  { %4581 = vmatpush1.bf16.msra.mxu1 %v7396_v45  ;;  %4393 = vmatprep.subr.bf16.mxu0 %v7400_v47  ;;  %v7478_v45 = vld [vmem:[%s11288_s1 + $0x780] ss:$40 sps:$4 sm:$0xff]   ;;  %v7486_v47 = vld [vmem:[%s11288_s1 + $0x7d4] ss:$40 sps:$4 sm:$0xff]  }
  0x2d   :  { %4582 = vmatprep.subr.bf16.mxu1 %v7404_v48  ;;  %v7489_v48 = vld [vmem:[%s11288_s1 + $0x55c] ss:$40 sps:$4 sm:$0xff]  }
  0x2f   :  { %4394 = vmatpush1.bf16.msra.mxu0 %v7405_v51  ;;  %v7492_v51 = vld [vmem:[%s11288_s1 + $0x824] ss:$40 sps:$4 sm:$0xff]  }
  0x30   :  { %4583 = vmatpush1.bf16.msra.mxu1 %v7402_v50  ;;  %4395 = vmatprep.subr.bf16.mxu0 %v7406_v53  ;;  %v7487_v50 = vld [vmem:[%s11288_s1 + $0x558] ss:$40 sps:$4 sm:$0xff]   ;;  %v7495_v53 = vld [vmem:[%s11288_s1 + $0x5ac] ss:$40 sps:$4 sm:$0xff]  }
  0x31   :  { %4584 = vmatprep.subr.bf16.mxu1 %v7410_v54  ;;  %v7490_v54 = vld [vmem:[%s11288_s1 + $0x820] ss:$40 sps:$4 sm:$0xff]  }
  0x33   :  { %4396 = vmatpush1.bf16.msra.mxu0 %v7411_v56  ;;  %v7498_v56 = vld [vmem:[%s11288_s1 + $0x874] ss:$40 sps:$4 sm:$0xff]  }
  0x34   :  { %4585 = vmatpush1.bf16.msra.mxu1 %v7408_v55  ;;  %4397 = vmatprep.subr.bf16.mxu0 %v7412_v57  ;;  %v7493_v55 = vld [vmem:[%s11288_s1 + $0x5a8] ss:$40 sps:$4 sm:$0xff]   ;;  %v7501_v57 = vld [vmem:[%s11288_s1 + $0x5fc] ss:$40 sps:$4 sm:$0xff]  }
  0x35   :  { %4586 = vmatprep.subr.bf16.mxu1 %v7416_v58  ;;  %v7496_v58 = vld [vmem:[%s11288_s1 + $0x870] ss:$40 sps:$4 sm:$0xff]  }
  0x37   :  { %4398 = vmatpush1.bf16.msra.mxu0 %v7417_v60  ;;  %v7504_v60 = vld [vmem:[%s11288_s1 + $0x8c4] ss:$40 sps:$4 sm:$0xff]  }
  0x38   :  { %4587 = vmatpush1.bf16.msra.mxu1 %v7414_v59  ;;  %4399 = vmatprep.subr.bf16.mxu0 %v7418_v61  ;;  %v7499_v59 = vld [vmem:[%s11288_s1 + $0x5f8] ss:$40 sps:$4 sm:$0xff]   ;;  %v7507_v61 = vld [vmem:[%s11288_s1 + $0x64c] ss:$40 sps:$4 sm:$0xff]  }
  0x39   :  { %4588 = vmatprep.subr.bf16.mxu1 %v7422_v62  ;;  %v7502_v62 = vld [vmem:[%s11288_s1 + $0x8c0] ss:$40 sps:$4 sm:$0xff]  }
  0x3b   :  { %4400 = vmatpush1.bf16.msra.mxu0 %v7423_v0  ;;  %v7510_v0 = vld [vmem:[%s11288_s1 + $0x914] ss:$40 sps:$4 sm:$0xff]  }
  0x3c   :  { %4589 = vmatpush1.bf16.msra.mxu1 %v7420_v63  ;;  %4401 = vmatprep.subr.bf16.mxu0 %v7424_v2  ;;  %v7505_v63 = vld [vmem:[%s11288_s1 + $0x648] ss:$40 sps:$4 sm:$0xff]   ;;  %v7513_v2 = vld [vmem:[%s11288_s1 + $0x69c] ss:$40 sps:$4 sm:$0xff]  }
  0x3d   :  { %4590 = vmatprep.subr.bf16.mxu1 %v7428_v3  ;;  %v7508_v3 = vld [vmem:[%s11288_s1 + $0x910] ss:$40 sps:$4 sm:$0xff]  }
  0x3f   :  { %4402 = vmatpush1.bf16.msra.mxu0 %v7429_v5  ;;  %v7516_v5 = vld [vmem:[%s11288_s1 + $0x964] ss:$40 sps:$4 sm:$0xff]  }
  0x40   :  { %4591 = vmatpush1.bf16.msra.mxu1 %v7426_v4  ;;  %4412 = vmatprep.subr.bf16.mxu0 %v7432_v6  ;;  %v7511_v4 = vld [vmem:[%s11288_s1 + $0x698] ss:$40 sps:$4 sm:$0xff]   ;;  %v7519_v6 = vld [vmem:[%s11288_s1 + $0x6ec] ss:$40 sps:$4 sm:$0xff]  }
  0x41   :  { %4592 = vmatprep.subr.bf16.mxu1 %v7435_v8  ;;  %v7517_v8 = vld [vmem:[%s11288_s1 + $0x6e8] ss:$40 sps:$4 sm:$0xff]  }
  0x42   :  { %4404 = vmatmul.mubr.bf16.vlgmr.msra.gmra.mrb[0].mxu0 %v8843_v10 }
  0x43   :  { %4413 = vmatpush1.bf16.msra.mxu0 %v7430_v9  ;;  %4444 = vmatprep.mubr.bf16.mxu0 %v8921_v36  ;;  %v7522_v9 = vld [vmem:[%s11288_s1 + $0x9b4] ss:$40 sps:$4 sm:$0xff]  }
  0x44   :  { %4593 = vmatpush1.bf16.msra.mxu1 %v7433_v11  ;;  %4414 = vmatprep.subr.bf16.mxu0 %v7438_v12  ;;  %v7525_v11 = vld [vmem:[%s11288_s1 + $0x73c] ss:$40 sps:$4 sm:$0xff]   ;;  %v7520_v12 = vld [vmem:[%s11288_s1 + $0x9b0] ss:$40 sps:$4 sm:$0xff]  }
  0x45   :  { %4594 = vmatprep.subr.bf16.mxu1 %v7441_v13  ;;  %v7523_v13 = vld [vmem:[%s11288_s1 + $0x738] ss:$40 sps:$4 sm:$0xff]  }
  0x47   :  { %4415 = vmatpush1.bf16.msra.mxu0 %v7436_v14  ;;  %v35_v14 = vld [vmem:[%s11289_s0 + $0x10] sm:$0xff] }
  0x48   :  { %4595 = vmatpush1.bf16.msra.mxu1 %v7439_v15  ;;  %4416 = vmatprep.subr.bf16.mxu0 %v7444_v16  ;;  %v7528_v15 = vld [vmem:[%s11288_s1 + $0xa04] ss:$40 sps:$4 sm:$0xff]  }
  0x49   :  { %4596 = vmatprep.subr.bf16.mxu1 %v7447_v17  ;;  %v7531_v16 = vld [vmem:[%s11288_s1 + $0x78c] ss:$40 sps:$4 sm:$0xff]   ;;  %v7526_v17 = vld [vmem:[%s11288_s1 + $0xa00] ss:$40 sps:$4 sm:$0xff]  }
  0x4b   :  { %4417 = vmatpush1.bf16.msra.mxu0 %v7442_v18  ;;  %v9049_v18 = vpack.c.bf16 %v35_v14, %v35_v14  ;;  %v7607_v14 = vld [vmem:[%s11288_s1 + $0xb98] ss:$40 sps:$4 sm:$0xff]  }
  0x4c   :  { %4597 = vmatpush1.bf16.msra.mxu1 %v7445_v19  ;;  %4418 = vmatprep.subr.bf16.mxu0 %v7450_v20  ;;  %v7529_v19 = vld [vmem:[%s11288_s1 + $0x788] ss:$40 sps:$4 sm:$0xff]   ;;  %v7534_v20 = vld [vmem:[%s11288_s1 + $0xa54] ss:$40 sps:$4 sm:$0xff]  }
  0x4d   :  { %4598 = vmatprep.subr.bf16.mxu1 %v7453_v21  ;;  %v7537_v21 = vld [vmem:[%s11288_s1 + $0x7dc] ss:$40 sps:$4 sm:$0xff]  }
  0x4f   :  { %4419 = vmatpush1.bf16.msra.mxu0 %v7448_v22  ;;  %v38_v22 = vld [vmem:[%s11289_s0 + $0x28] sm:$0xff] }
  0x50   :  { %4599 = vmatpush1.bf16.msra.mxu1 %v7451_v23  ;;  %4420 = vmatprep.subr.bf16.mxu0 %v7456_v24  ;;  %v9063_v23 = vpack.c.bf16 %v38_v22, %v38_v22  ;;  %v7532_v24 = vld [vmem:[%s11288_s1 + $0xa50] ss:$40 sps:$4 sm:$0xff]  }
  0x51   :  { %4600 = vmatprep.subr.bf16.mxu1 %v7459_v25  ;;  %v7535_v25 = vld [vmem:[%s11288_s1 + $0x7d8] ss:$40 sps:$4 sm:$0xff]  }
  0x52   :  { %v7616_v22 = vld [vmem:[%s11288_s1 + $0xeb0] ss:$40 sps:$4 sm:$0xff]  }
  0x53   :  { %4421 = vmatpush1.bf16.msra.mxu0 %v7454_v26  ;;  %v7540_v26 = vld [vmem:[%s11288_s1 + $0xaa4] ss:$40 sps:$4 sm:$0xff]  }
  0x54   :  { %4601 = vmatpush1.bf16.msra.mxu1 %v7457_v27  ;;  %4422 = vmatprep.subr.bf16.mxu0 %v7462_v28  ;;  %v7543_v27 = vld [vmem:[%s11288_s1 + $0x82c] ss:$40 sps:$4 sm:$0xff]   ;;  %v7538_v28 = vld [vmem:[%s11288_s1 + $0xaa0] ss:$40 sps:$4 sm:$0xff]  }
  0x55   :  { %4602 = vmatprep.subr.bf16.mxu1 %v7465_v29  ;;  %v7541_v29 = vld [vmem:[%s11288_s1 + $0x828] ss:$40 sps:$4 sm:$0xff]  }
  0x57   :  { %4423 = vmatpush1.bf16.msra.mxu0 %v7460_v30  ;;  %v7546_v30 = vld [vmem:[%s11288_s1 + $0xaf4] ss:$40 sps:$4 sm:$0xff]  }
  0x58   :  { %4603 = vmatpush1.bf16.msra.mxu1 %v7463_v31  ;;  %4424 = vmatprep.subr.bf16.mxu0 %v7468_v32  ;;  %v7549_v31 = vld [vmem:[%s11288_s1 + $0x87c] ss:$40 sps:$4 sm:$0xff]   ;;  %v7544_v32 = vld [vmem:[%s11288_s1 + $0xaf0] ss:$40 sps:$4 sm:$0xff]  }
  0x59   :  { %4604 = vmatprep.subr.bf16.mxu1 %v7471_v33  ;;  %v7547_v33 = vld [vmem:[%s11288_s1 + $0x878] ss:$40 sps:$4 sm:$0xff]  }
  0x5b   :  { %4425 = vmatpush1.bf16.msra.mxu0 %v7466_v35  ;;  %v7555_v35 = vld [vmem:[%s11288_s1 + $0x8cc] ss:$40 sps:$4 sm:$0xff]  }
  0x5c   :  { %4605 = vmatpush1.bf16.msra.mxu1 %v7469_v37  ;;  %4426 = vmatprep.subr.bf16.mxu0 %v7474_v39  ;;  %v7550_v37 = vld [vmem:[%s11288_s1 + $0xb40] ss:$40 sps:$4 sm:$0xff]  }
  0x5d   :  { %4606 = vmatprep.subr.bf16.mxu1 %v7477_v40  ;;  %v7553_v39 = vld [vmem:[%s11288_s1 + $0x8c8] ss:$40 sps:$4 sm:$0xff]   ;;  %v7558_v40 = vld [vmem:[%s11288_s1 + $0xb94] ss:$40 sps:$4 sm:$0xff]  }
  0x5f   :  { %4427 = vmatpush1.bf16.msra.mxu0 %v7472_v41  ;;  %v7561_v41 = vld [vmem:[%s11288_s1 + $0x91c] ss:$40 sps:$4 sm:$0xff]  }
  0x60   :  { %4607 = vmatpush1.bf16.msra.mxu1 %v7475_v42  ;;  %4428 = vmatprep.subr.bf16.mxu0 %v7480_v43  ;;  %v7556_v42 = vld [vmem:[%s11288_s1 + $0xb90] ss:$40 sps:$4 sm:$0xff]  }
  0x61   :  { %4617 = vmatprep.subr.bf16.mxu1 %v7483_v44  ;;  %v7559_v43 = vld [vmem:[%s11288_s1 + $0x918] ss:$40 sps:$4 sm:$0xff]   ;;  %v7564_v44 = vld [vmem:[%s11288_s1 + $0xbe4] ss:$40 sps:$4 sm:$0xff]  }
  0x63   :  { %4609 = vmatmul.mubr.bf16.vlgmr.msra.gmra.mrb[4].mxu1 %v8843_v10  ;;  %4429 = vmatpush1.bf16.msra.mxu0 %v7478_v45  ;;  %v7567_v45 = vld [vmem:[%s11288_s1 + $0x96c] ss:$40 sps:$4 sm:$0xff]  }
  0x64   :  { %4618 = vmatpush1.bf16.msra.mxu1 %v7481_v46  ;;  %4430 = vmatprep.subr.bf16.mxu0 %v7486_v47  ;;  %v7562_v46 = vld [vmem:[%s11288_s1 + $0xbe0] ss:$40 sps:$4 sm:$0xff]  }
  0x65   :  { %4619 = vmatprep.subr.bf16.mxu1 %v7489_v48  ;;  %4649 = vmatprep.mubr.bf16.mxu1 %v8921_v36  ;;  %v7565_v47 = vld [vmem:[%s11288_s1 + $0x968] ss:$40 sps:$4 sm:$0xff]   ;;  %v7570_v48 = vld [vmem:[%s11288_s1 + $0xc34] ss:$40 sps:$4 sm:$0xff]  }
  0x67   :  { %4431 = vmatpush1.bf16.msra.mxu0 %v7484_v49  ;;  %v7573_v49 = vld [vmem:[%s11288_s1 + $0x9bc] ss:$40 sps:$4 sm:$0xff]  }
  0x68   :  { %4620 = vmatpush1.bf16.msra.mxu1 %v7487_v50  ;;  %4432 = vmatprep.subr.bf16.mxu0 %v7492_v51  ;;  %v7568_v50 = vld [vmem:[%s11288_s1 + $0xc30] ss:$40 sps:$4 sm:$0xff]  }
  0x69   :  { %4621 = vmatprep.subr.bf16.mxu1 %v7495_v53  ;;  %v7571_v51 = vld [vmem:[%s11288_s1 + $0x9b8] ss:$40 sps:$4 sm:$0xff]   ;;  %v7576_v53 = vld [vmem:[%s11288_s1 + $0xc84] ss:$40 sps:$4 sm:$0xff]  }
  0x6b   :  { %4433 = vmatpush1.bf16.msra.mxu0 %v7490_v54  ;;  %v7579_v54 = vld [vmem:[%s11288_s1 + $0xa0c] ss:$40 sps:$4 sm:$0xff]  }
  0x6c   :  { %4622 = vmatpush1.bf16.msra.mxu1 %v7493_v55  ;;  %4434 = vmatprep.subr.bf16.mxu0 %v7498_v56  ;;  %v7574_v55 = vld [vmem:[%s11288_s1 + $0xc80] ss:$40 sps:$4 sm:$0xff]  }
  0x6d   :  { %4623 = vmatprep.subr.bf16.mxu1 %v7501_v57  ;;  %v7577_v56 = vld [vmem:[%s11288_s1 + $0xa08] ss:$40 sps:$4 sm:$0xff]   ;;  %v7582_v57 = vld [vmem:[%s11288_s1 + $0xcd4] ss:$40 sps:$4 sm:$0xff]  }
  0x6f   :  { %4435 = vmatpush1.bf16.msra.mxu0 %v7496_v58  ;;  %v7585_v58 = vld [vmem:[%s11288_s1 + $0xa5c] ss:$40 sps:$4 sm:$0xff]  }
  0x70   :  { %4624 = vmatpush1.bf16.msra.mxu1 %v7499_v59  ;;  %4436 = vmatprep.subr.bf16.mxu0 %v7504_v60  ;;  %v7580_v59 = vld [vmem:[%s11288_s1 + $0xcd0] ss:$40 sps:$4 sm:$0xff]  }
  0x71   :  { %4625 = vmatprep.subr.bf16.mxu1 %v7507_v61  ;;  %v7583_v60 = vld [vmem:[%s11288_s1 + $0xa58] ss:$40 sps:$4 sm:$0xff]   ;;  %v7588_v61 = vld [vmem:[%s11288_s1 + $0xd24] ss:$40 sps:$4 sm:$0xff]  }
  0x73   :  { %4437 = vmatpush1.bf16.msra.mxu0 %v7502_v62  ;;  %v7591_v62 = vld [vmem:[%s11288_s1 + $0xaac] ss:$40 sps:$4 sm:$0xff]  }
  0x74   :  { %4626 = vmatpush1.bf16.msra.mxu1 %v7505_v63  ;;  %4438 = vmatprep.subr.bf16.mxu0 %v7510_v0  ;;  %v7586_v63 = vld [vmem:[%s11288_s1 + $0xd20] ss:$40 sps:$4 sm:$0xff]  }
  0x75   :  { %4627 = vmatprep.subr.bf16.mxu1 %v7513_v2  ;;  %v7589_v0 = vld [vmem:[%s11288_s1 + $0xaa8] ss:$40 sps:$4 sm:$0xff]   ;;  %v7594_v2 = vld [vmem:[%s11288_s1 + $0xd74] ss:$40 sps:$4 sm:$0xff]  }
  0x77   :  { %4439 = vmatpush1.bf16.msra.mxu0 %v7508_v3  ;;  %v7597_v3 = vld [vmem:[%s11288_s1 + $0xafc] ss:$40 sps:$4 sm:$0xff]  }
  0x78   :  { %4628 = vmatpush1.bf16.msra.mxu1 %v7511_v4  ;;  %4440 = vmatprep.subr.bf16.mxu0 %v7516_v5  ;;  %v7592_v4 = vld [vmem:[%s11288_s1 + $0xd70] ss:$40 sps:$4 sm:$0xff]  }
  0x79   :  { %4629 = vmatprep.subr.bf16.mxu1 %v7519_v6  ;;  %v7595_v5 = vld [vmem:[%s11288_s1 + $0xaf8] ss:$40 sps:$4 sm:$0xff]   ;;  %v7600_v6 = vld [vmem:[%s11288_s1 + $0xdc4] ss:$40 sps:$4 sm:$0xff]  }
  0x7b   :  { %4441 = vmatpush1.bf16.msra.mxu0 %v7514_v7  ;;  %v7603_v7 = vld [vmem:[%s11288_s1 + $0xb4c] ss:$40 sps:$4 sm:$0xff]  }
  0x7c   :  { %4630 = vmatpush1.bf16.msra.mxu1 %v7517_v8  ;;  %4442 = vmatprep.subr.bf16.mxu0 %v7522_v9  ;;  %v7598_v8 = vld [vmem:[%s11288_s1 + $0xdc0] ss:$40 sps:$4 sm:$0xff]  }
  0x7d   :  { %4631 = vmatprep.subr.bf16.mxu1 %v7525_v11  ;;  %v7601_v9 = vld [vmem:[%s11288_s1 + $0xb48] ss:$40 sps:$4 sm:$0xff]   ;;  %v7606_v11 = vld [vmem:[%s11288_s1 + $0xe14] ss:$40 sps:$4 sm:$0xff]  }
  0x7f   :  { %4443 = vmatpush1.bf16.msra.mxu0 %v7520_v12  ;;  %v7609_v12 = vld [vmem:[%s11288_s1 + $0xb9c] ss:$40 sps:$4 sm:$0xff]  }
  0x80   :  { %4632 = vmatpush1.bf16.msra.mxu1 %v7523_v13  ;;  %4453 = vmatprep.subr.bf16.mxu0 %v7528_v15  ;;  %v7604_v13 = vld [vmem:[%s11288_s1 + $0xe10] ss:$40 sps:$4 sm:$0xff]   ;;  %v7612_v15 = vld [vmem:[%s11288_s1 + $0xe64] ss:$40 sps:$4 sm:$0xff]  }
  0x81   :  { %4633 = vmatprep.subr.bf16.mxu1 %v7531_v16  ;;  %v7615_v16 = vld [vmem:[%s11288_s1 + $0xbec] ss:$40 sps:$4 sm:$0xff]  }
  0x82   :  { %4445 = vmatmul.mubr.bf16.vlgmr.msra.gmra.mrb[0].mxu0 %v9049_v18 }
  0x83   :  { %4454 = vmatpush1.bf16.msra.mxu0 %v7526_v17  ;;  %4485 = vmatprep.mubr.bf16.mxu0 %v9063_v23  ;;  %v7610_v17 = vld [vmem:[%s11288_s1 + $0xe60] ss:$40 sps:$4 sm:$0xff]  }
  0x84   :  { %4634 = vmatpush1.bf16.msra.mxu1 %v7529_v19  ;;  %4455 = vmatprep.subr.bf16.mxu0 %v7534_v20  ;;  %v7613_v19 = vld [vmem:[%s11288_s1 + $0xbe8] ss:$40 sps:$4 sm:$0xff]   ;;  %v7618_v20 = vld [vmem:[%s11288_s1 + $0xeb4] ss:$40 sps:$4 sm:$0xff]  }
  0x85   :  { %4635 = vmatprep.subr.bf16.mxu1 %v7537_v21  ;;  %v7621_v21 = vld [vmem:[%s11288_s1 + $0xc3c] ss:$40 sps:$4 sm:$0xff]  }
  0x87   :  { %4456 = vmatpush1.bf16.msra.mxu0 %v7532_v24  ;;  %v7619_v24 = vld [vmem:[%s11288_s1 + $0xc38] ss:$40 sps:$4 sm:$0xff]  }
  0x88   :  { %4636 = vmatpush1.bf16.msra.mxu1 %v7535_v25  ;;  %4457 = vmatprep.subr.bf16.mxu0 %v7540_v26  ;;  %v37_v25 = vld [vmem:[%s11289_s0 + $0x20] sm:$0xff] }
  0x89   :  { %4637 = vmatprep.subr.bf16.mxu1 %v7543_v27  ;;  %v7624_v26 = vld [vmem:[%s11288_s1 + $0xf04] ss:$40 sps:$4 sm:$0xff]  }
  0x8a   :  { %v7627_v27 = vld [vmem:[%s11288_s1 + $0xc8c] ss:$40 sps:$4 sm:$0xff]  }
  0x8b   :  { %4458 = vmatpush1.bf16.msra.mxu0 %v7538_v28  ;;  %v7622_v28 = vld [vmem:[%s11288_s1 + $0xf00] ss:$40 sps:$4 sm:$0xff]  }
  0x8c   :  { %4638 = vmatpush1.bf16.msra.mxu1 %v7541_v29  ;;  %4459 = vmatprep.subr.bf16.mxu0 %v7546_v30  ;;  %v9255_v29 = vpack.c.bf16 %v37_v25, %v37_v25  ;;  %v40_v30 = vld [vmem:[%s11289_s0 + $0x38] sm:$0xff] }
  0x8d   :  { %4639 = vmatprep.subr.bf16.mxu1 %v7549_v31  ;;  %v7625_v31 = vld [vmem:[%s11288_s1 + $0xc88] ss:$40 sps:$4 sm:$0xff]   ;;  %v7705_v25 = vld [vmem:[%s11288_s1 + $0x109c] ss:$40 sps:$4 sm:$0xff]  }
  0x8f   :  { %4460 = vmatpush1.bf16.msra.mxu0 %v7544_v32  ;;  %v7630_v32 = vld [vmem:[%s11288_s1 + $0xf54] ss:$40 sps:$4 sm:$0xff]  }
  0x90   :  { %4640 = vmatpush1.bf16.msra.mxu1 %v7547_v33  ;;  %4461 = vmatprep.subr.bf16.mxu0 %v7552_v34  ;;  %v7633_v33 = vld [vmem:[%s11288_s1 + $0xcdc] ss:$40 sps:$4 sm:$0xff]   ;;  %v9269_v34 = vpack.c.bf16 %v40_v30, %v40_v30  ;;  %v7711_v30 = vld [vmem:[%s11288_s1 + $0x10ec] ss:$40 sps:$4 sm:$0xff]  }
  0x91   :  { %4641 = vmatprep.subr.bf16.mxu1 %v7555_v35  ;;  %v7628_v35 = vld [vmem:[%s11288_s1 + $0xf50] ss:$40 sps:$4 sm:$0xff]  }
  0x93   :  { %4462 = vmatpush1.bf16.msra.mxu0 %v7550_v37  ;;  %v7631_v37 = vld [vmem:[%s11288_s1 + $0xcd8] ss:$40 sps:$4 sm:$0xff]  }
  0x94   :  { %4642 = vmatpush1.bf16.msra.mxu1 %v7553_v39  ;;  %4463 = vmatprep.subr.bf16.mxu0 %v7558_v40  ;;  %v7636_v39 = vld [vmem:[%s11288_s1 + $0xfa4] ss:$40 sps:$4 sm:$0xff]  }
  0x95   :  { %4643 = vmatprep.subr.bf16.mxu1 %v7561_v41  ;;  %v7639_v40 = vld [vmem:[%s11288_s1 + $0xd2c] ss:$40 sps:$4 sm:$0xff]   ;;  %v7634_v41 = vld [vmem:[%s11288_s1 + $0xfa0] ss:$40 sps:$4 sm:$0xff]  }
  0x97   :  { %4464 = vmatpush1.bf16.msra.mxu0 %v7556_v42  ;;  %v7637_v42 = vld [vmem:[%s11288_s1 + $0xd28] ss:$40 sps:$4 sm:$0xff]  }
  0x98   :  { %4644 = vmatpush1.bf16.msra.mxu1 %v7559_v43  ;;  %4465 = vmatprep.subr.bf16.mxu0 %v7564_v44  ;;  %v7642_v43 = vld [vmem:[%s11288_s1 + $0xff4] ss:$40 sps:$4 sm:$0xff]  }
  0x99   :  { %4645 = vmatprep.subr.bf16.mxu1 %v7567_v45  ;;  %v7645_v44 = vld [vmem:[%s11288_s1 + $0xd7c] ss:$40 sps:$4 sm:$0xff]   ;;  %v7640_v45 = vld [vmem:[%s11288_s1 + $0xff0] ss:$40 sps:$4 sm:$0xff]  }
  0x9b   :  { %4466 = vmatpush1.bf16.msra.mxu0 %v7562_v46  ;;  %v7643_v46 = vld [vmem:[%s11288_s1 + $0xd78] ss:$40 sps:$4 sm:$0xff]  }
  0x9c   :  { %4646 = vmatpush1.bf16.msra.mxu1 %v7565_v47  ;;  %4467 = vmatprep.subr.bf16.mxu0 %v7570_v48  ;;  %v7648_v47 = vld [vmem:[%s11288_s1 + $0x1044] ss:$40 sps:$4 sm:$0xff]  }
  0x9d   :  { %4647 = vmatprep.subr.bf16.mxu1 %v7573_v49  ;;  %v7651_v48 = vld [vmem:[%s11288_s1 + $0xdcc] ss:$40 sps:$4 sm:$0xff]   ;;  %v7646_v49 = vld [vmem:[%s11288_s1 + $0x1040] ss:$40 sps:$4 sm:$0xff]  }
  0x9f   :  { %4468 = vmatpush1.bf16.msra.mxu0 %v7568_v50  ;;  %v7649_v50 = vld [vmem:[%s11288_s1 + $0xdc8] ss:$40 sps:$4 sm:$0xff]  }
  0xa0   :  { %4648 = vmatpush1.bf16.msra.mxu1 %v7571_v51  ;;  %4469 = vmatprep.subr.bf16.mxu0 %v7576_v53  ;;  %v7654_v51 = vld [vmem:[%s11288_s1 + $0x1094] ss:$40 sps:$4 sm:$0xff]  }
  0xa1   :  { %4658 = vmatprep.subr.bf16.mxu1 %v7579_v54  ;;  %v7657_v53 = vld [vmem:[%s11288_s1 + $0xe1c] ss:$40 sps:$4 sm:$0xff]   ;;  %v7652_v54 = vld [vmem:[%s11288_s1 + $0x1090] ss:$40 sps:$4 sm:$0xff]  }
  0xa3   :  { %4650 = vmatmul.mubr.bf16.vlgmr.msra.gmra.mrb[4].mxu1 %v9049_v18  ;;  %4470 = vmatpush1.bf16.msra.mxu0 %v7574_v55  ;;  %v7655_v55 = vld [vmem:[%s11288_s1 + $0xe18] ss:$40 sps:$4 sm:$0xff]  }
  0xa4   :  { %4659 = vmatpush1.bf16.msra.mxu1 %v7577_v56  ;;  %4471 = vmatprep.subr.bf16.mxu0 %v7582_v57  ;;  %v7660_v56 = vld [vmem:[%s11288_s1 + $0x10e4] ss:$40 sps:$4 sm:$0xff]  }
  0xa5   :  { %4660 = vmatprep.subr.bf16.mxu1 %v7585_v58  ;;  %4690 = vmatprep.mubr.bf16.mxu1 %v9063_v23  ;;  %v7663_v57 = vld [vmem:[%s11288_s1 + $0xe6c] ss:$40 sps:$4 sm:$0xff]   ;;  %v7658_v58 = vld [vmem:[%s11288_s1 + $0x10e0] ss:$40 sps:$4 sm:$0xff]  }
  0xa7   :  { %4472 = vmatpush1.bf16.msra.mxu0 %v7580_v59  ;;  %v7661_v59 = vld [vmem:[%s11288_s1 + $0xe68] ss:$40 sps:$4 sm:$0xff]  }
  0xa8   :  { %4661 = vmatpush1.bf16.msra.mxu1 %v7583_v60  ;;  %4473 = vmatprep.subr.bf16.mxu0 %v7588_v61  ;;  %v7666_v60 = vld [vmem:[%s11288_s1 + $0x1134] ss:$40 sps:$4 sm:$0xff]  }
  0xa9   :  { %4662 = vmatprep.subr.bf16.mxu1 %v7591_v62  ;;  %v7669_v61 = vld [vmem:[%s11288_s1 + $0xebc] ss:$40 sps:$4 sm:$0xff]   ;;  %v7664_v62 = vld [vmem:[%s11288_s1 + $0x1130] ss:$40 sps:$4 sm:$0xff]  }
  0xab   :  { %4474 = vmatpush1.bf16.msra.mxu0 %v7586_v63  ;;  %v7667_v63 = vld [vmem:[%s11288_s1 + $0xeb8] ss:$40 sps:$4 sm:$0xff]  }
  0xac   :  { %4663 = vmatpush1.bf16.msra.mxu1 %v7589_v0  ;;  %4475 = vmatprep.subr.bf16.mxu0 %v7594_v2  ;;  %v7672_v0 = vld [vmem:[%s11288_s1 + $0x1184] ss:$40 sps:$4 sm:$0xff]  }
  0xad   :  { %4664 = vmatprep.subr.bf16.mxu1 %v7597_v3  ;;  %v7675_v2 = vld [vmem:[%s11288_s1 + $0xf0c] ss:$40 sps:$4 sm:$0xff]   ;;  %v7670_v3 = vld [vmem:[%s11288_s1 + $0x1180] ss:$40 sps:$4 sm:$0xff]  }
  0xaf   :  { %4476 = vmatpush1.bf16.msra.mxu0 %v7592_v4  ;;  %v7673_v4 = vld [vmem:[%s11288_s1 + $0xf08] ss:$40 sps:$4 sm:$0xff]  }
  0xb0   :  { %4665 = vmatpush1.bf16.msra.mxu1 %v7595_v5  ;;  %4477 = vmatprep.subr.bf16.mxu0 %v7600_v6  ;;  %v7678_v5 = vld [vmem:[%s11288_s1 + $0x11d4] ss:$40 sps:$4 sm:$0xff]  }
  0xb1   :  { %4666 = vmatprep.subr.bf16.mxu1 %v7603_v7  ;;  %v7681_v6 = vld [vmem:[%s11288_s1 + $0xf5c] ss:$40 sps:$4 sm:$0xff]   ;;  %v7676_v7 = vld [vmem:[%s11288_s1 + $0x11d0] ss:$40 sps:$4 sm:$0xff]  }
  0xb3   :  { %4478 = vmatpush1.bf16.msra.mxu0 %v7598_v8  ;;  %v7679_v8 = vld [vmem:[%s11288_s1 + $0xf58] ss:$40 sps:$4 sm:$0xff]  }
  0xb4   :  { %4667 = vmatpush1.bf16.msra.mxu1 %v7601_v9  ;;  %4479 = vmatprep.subr.bf16.mxu0 %v7606_v11  ;;  %v7684_v9 = vld [vmem:[%s11288_s1 + $0x1224] ss:$40 sps:$4 sm:$0xff]  }
  0xb5   :  { %4668 = vmatprep.subr.bf16.mxu1 %v7609_v12  ;;  %v7687_v11 = vld [vmem:[%s11288_s1 + $0xfac] ss:$40 sps:$4 sm:$0xff]   ;;  %v7682_v12 = vld [vmem:[%s11288_s1 + $0x1220] ss:$40 sps:$4 sm:$0xff]  }
  0xb7   :  { %4480 = vmatpush1.bf16.msra.mxu0 %v7604_v13  ;;  %v7685_v13 = vld [vmem:[%s11288_s1 + $0xfa8] ss:$40 sps:$4 sm:$0xff]  }
  0xb8   :  { %4669 = vmatpush1.bf16.msra.mxu1 %v7607_v14  ;;  %4481 = vmatprep.subr.bf16.mxu0 %v7612_v15  ;;  %v7690_v14 = vld [vmem:[%s11288_s1 + $0x1274] ss:$40 sps:$4 sm:$0xff]  }
  0xb9   :  { %4670 = vmatprep.subr.bf16.mxu1 %v7615_v16  ;;  %v7693_v15 = vld [vmem:[%s11288_s1 + $0xffc] ss:$40 sps:$4 sm:$0xff]   ;;  %v7688_v16 = vld [vmem:[%s11288_s1 + $0x1270] ss:$40 sps:$4 sm:$0xff]  }
  0xbb   :  { %4482 = vmatpush1.bf16.msra.mxu0 %v7610_v17  ;;  %v7691_v17 = vld [vmem:[%s11288_s1 + $0xff8] ss:$40 sps:$4 sm:$0xff]  }
  0xbc   :  { %4671 = vmatpush1.bf16.msra.mxu1 %v7613_v19  ;;  %4483 = vmatprep.subr.bf16.mxu0 %v7618_v20  ;;  %v7696_v19 = vld [vmem:[%s11288_s1 + $0x12c4] ss:$40 sps:$4 sm:$0xff]  }
  0xbd   :  { %4672 = vmatprep.subr.bf16.mxu1 %v7621_v21  ;;  %v7699_v20 = vld [vmem:[%s11288_s1 + $0x104c] ss:$40 sps:$4 sm:$0xff]   ;;  %v7694_v21 = vld [vmem:[%s11288_s1 + $0x12c0] ss:$40 sps:$4 sm:$0xff]  }
  0xbf   :  { %4484 = vmatpush1.bf16.msra.mxu0 %v7616_v22  ;;  %v7697_v22 = vld [vmem:[%s11288_s1 + $0x1048] ss:$40 sps:$4 sm:$0xff]  }
  0xc0   :  { %4673 = vmatpush1.bf16.msra.mxu1 %v7619_v24  ;;  %4494 = vmatprep.subr.bf16.mxu0 %v7624_v26  ;;  %v7702_v24 = vld [vmem:[%s11288_s1 + $0x1314] ss:$40 sps:$4 sm:$0xff]   ;;  %v7700_v26 = vld [vmem:[%s11288_s1 + $0x1310] ss:$40 sps:$4 sm:$0xff]  }
  0xc1   :  { %4674 = vmatprep.subr.bf16.mxu1 %v7627_v27  ;;  %v7703_v27 = vld [vmem:[%s11288_s1 + $0x1098] ss:$40 sps:$4 sm:$0xff]  }
  0xc2   :  { %4486 = vmatmul.mubr.bf16.vlgmr.msra.gmra.mrb[0].mxu0 %v9255_v29 }
  0xc3   :  { %4495 = vmatpush1.bf16.msra.mxu0 %v7622_v28  ;;  %4526 = vmatprep.mubr.bf16.mxu0 %v9269_v34  ;;  %v7708_v28 = vld [vmem:[%s11288_s1 + $0x1364] ss:$40 sps:$4 sm:$0xff]  }
  0xc4   :  { %4675 = vmatpush1.bf16.msra.mxu1 %v7625_v31  ;;  %4496 = vmatprep.subr.bf16.mxu0 %v7630_v32  ;;  %v7706_v31 = vld [vmem:[%s11288_s1 + $0x1360] ss:$40 sps:$4 sm:$0xff]  }
  0xc5   :  { %4676 = vmatprep.subr.bf16.mxu1 %v7633_v33  ;;  %v7709_v32 = vld [vmem:[%s11288_s1 + $0x10e8] ss:$40 sps:$4 sm:$0xff]   ;;  %v7714_v33 = vld [vmem:[%s11288_s1 + $0x13b4] ss:$40 sps:$4 sm:$0xff]  }
  0xc7   :  { %4497 = vmatpush1.bf16.msra.mxu0 %v7628_v35  ;;  %v7717_v35 = vld [vmem:[%s11288_s1 + $0x113c] ss:$40 sps:$4 sm:$0xff]  }
  0xc8   :  { %4677 = vmatpush1.bf16.msra.mxu1 %v7631_v37  ;;  %4498 = vmatprep.subr.bf16.mxu0 %v7636_v39  ;;  %v7712_v37 = vld [vmem:[%s11288_s1 + $0x13b0] ss:$40 sps:$4 sm:$0xff]  }
  0xc9   :  { %4678 = vmatprep.subr.bf16.mxu1 %v7639_v40  ;;  %v7715_v39 = vld [vmem:[%s11288_s1 + $0x1138] ss:$40 sps:$4 sm:$0xff]   ;;  %v39_v40 = vld [vmem:[%s11289_s0 + $0x30] sm:$0xff] }
  0xcb   :  { %4499 = vmatpush1.bf16.msra.mxu0 %v7634_v41  ;;  %v7720_v41 = vld [vmem:[%s11288_s1 + $0x118c] ss:$40 sps:$4 sm:$0xff]  }
  0xcc   :  { %4679 = vmatpush1.bf16.msra.mxu1 %v7637_v42  ;;  %4500 = vmatprep.subr.bf16.mxu0 %v7642_v43  ;;  %v7723_v42 = vld [vmem:[%s11288_s1 + $0x14] ss:$40 sps:$4 sm:$0xff]   ;;  %v9458_v43 = vpack.c.bf16 %v39_v40, %v39_v40 }
  0xcd   :  { %4680 = vmatprep.subr.bf16.mxu1 %v7645_v44  ;;  %v7718_v44 = vld [vmem:[%s11288_s1 + $0x1188] ss:$40 sps:$4 sm:$0xff]   ;;  %v7795_v40 = vld [vmem:[%s11288_s1 + $0x3d4] ss:$40 sps:$4 sm:$0xff]  }
  0xcf   :  { %4501 = vmatpush1.bf16.msra.mxu0 %v7640_v45  ;;  %v7721_v45 = vld [vmem:[%s11288_s1 + $0x10] ss:$40 sps:$4 sm:$0xff]  }
  0xd0   :  { %4681 = vmatpush1.bf16.msra.mxu1 %v7643_v46  ;;  %4502 = vmatprep.subr.bf16.mxu0 %v7648_v47  ;;  %v7726_v46 = vld [vmem:[%s11288_s1 + $0x11dc] ss:$40 sps:$4 sm:$0xff]  }
  0xd1   :  { %4682 = vmatprep.subr.bf16.mxu1 %v7651_v48  ;;  %v7729_v47 = vld [vmem:[%s11288_s1 + $0x64] ss:$40 sps:$4 sm:$0xff]   ;;  %v7724_v48 = vld [vmem:[%s11288_s1 + $0x11d8] ss:$40 sps:$4 sm:$0xff]  }
  0xd3   :  { %4503 = vmatpush1.bf16.msra.mxu0 %v7646_v49  ;;  %v7727_v49 = vld [vmem:[%s11288_s1 + $0x60] ss:$40 sps:$4 sm:$0xff]  }
  0xd4   :  { %4683 = vmatpush1.bf16.msra.mxu1 %v7649_v50  ;;  %4504 = vmatprep.subr.bf16.mxu0 %v7654_v51  ;;  %v7732_v50 = vld [vmem:[%s11288_s1 + $0x122c] ss:$40 sps:$4 sm:$0xff]  }
  0xd5   :  { %4684 = vmatprep.subr.bf16.mxu1 %v7657_v53  ;;  %v7735_v51 = vld [vmem:[%s11288_s1 + $0xb4] ss:$40 sps:$4 sm:$0xff]   ;;  %v7730_v53 = vld [vmem:[%s11288_s1 + $0x1228] ss:$40 sps:$4 sm:$0xff]  }
  0xd7   :  { %4505 = vmatpush1.bf16.msra.mxu0 %v7652_v54  ;;  %v7733_v54 = vld [vmem:[%s11288_s1 + $0xb0] ss:$40 sps:$4 sm:$0xff]  }
  0xd8   :  { %4685 = vmatpush1.bf16.msra.mxu1 %v7655_v55  ;;  %4506 = vmatprep.subr.bf16.mxu0 %v7660_v56  ;;  %v7738_v55 = vld [vmem:[%s11288_s1 + $0x127c] ss:$40 sps:$4 sm:$0xff]  }
  0xd9   :  { %4686 = vmatprep.subr.bf16.mxu1 %v7663_v57  ;;  %v7741_v56 = vld [vmem:[%s11288_s1 + $0x104] ss:$40 sps:$4 sm:$0xff]   ;;  %v7736_v57 = vld [vmem:[%s11288_s1 + $0x1278] ss:$40 sps:$4 sm:$0xff]  }
  0xdb   :  { %4507 = vmatpush1.bf16.msra.mxu0 %v7658_v58  ;;  %v7739_v58 = vld [vmem:[%s11288_s1 + $0x100] ss:$40 sps:$4 sm:$0xff]  }
  0xdc   :  { %4687 = vmatpush1.bf16.msra.mxu1 %v7661_v59  ;;  %4508 = vmatprep.subr.bf16.mxu0 %v7666_v60  ;;  %v7744_v59 = vld [vmem:[%s11288_s1 + $0x12cc] ss:$40 sps:$4 sm:$0xff]  }
  0xdd   :  { %4688 = vmatprep.subr.bf16.mxu1 %v7669_v61  ;;  %v7747_v60 = vld [vmem:[%s11288_s1 + $0x154] ss:$40 sps:$4 sm:$0xff]   ;;  %v7742_v61 = vld [vmem:[%s11288_s1 + $0x12c8] ss:$40 sps:$4 sm:$0xff]  }
  0xdf   :  { %4509 = vmatpush1.bf16.msra.mxu0 %v7664_v62  ;;  %v7745_v62 = vld [vmem:[%s11288_s1 + $0x150] ss:$40 sps:$4 sm:$0xff]  }
  0xe0   :  { %4689 = vmatpush1.bf16.msra.mxu1 %v7667_v63  ;;  %4510 = vmatprep.subr.bf16.mxu0 %v7672_v0  ;;  %v7750_v63 = vld [vmem:[%s11288_s1 + $0x131c] ss:$40 sps:$4 sm:$0xff]  }
  0xe1   :  { %4699 = vmatprep.subr.bf16.mxu1 %v7675_v2  ;;  %v7753_v0 = vld [vmem:[%s11288_s1 + $0x1a4] ss:$40 sps:$4 sm:$0xff]  }
  0xe3   :  { %4691 = vmatmul.mubr.bf16.vlgmr.msra.gmra.mrb[4].mxu1 %v9255_v29  ;;  %4511 = vmatpush1.bf16.msra.mxu0 %v7670_v3  ;;  %v7748_v3 = vld [vmem:[%s11288_s1 + $0x1318] ss:$40 sps:$4 sm:$0xff]  }
  0xe4   :  { %4700 = vmatpush1.bf16.msra.mxu1 %v7673_v4  ;;  %4512 = vmatprep.subr.bf16.mxu0 %v7678_v5  ;;  %v7751_v4 = vld [vmem:[%s11288_s1 + $0x1a0] ss:$40 sps:$4 sm:$0xff]  }
  0xe5   :  { %4701 = vmatprep.subr.bf16.mxu1 %v7681_v6  ;;  %4731 = vmatprep.mubr.bf16.mxu1 %v9269_v34  ;;  %v7756_v6 = vld [vmem:[%s11288_s1 + $0x136c] ss:$40 sps:$4 sm:$0xff]  }
  0xe7   :  { %4513 = vmatpush1.bf16.msra.mxu0 %v7676_v7  ;;  %v7759_v7 = vld [vmem:[%s11288_s1 + $0x1f4] ss:$40 sps:$4 sm:$0xff]  }
  0xe8   :  { %4702 = vmatpush1.bf16.msra.mxu1 %v7679_v8  ;;  %4514 = vmatprep.subr.bf16.mxu0 %v7684_v9 }
  0xe9   :  { %4703 = vmatprep.subr.bf16.mxu1 %v7687_v11  ;;  %v7754_v11 = vld [vmem:[%s11288_s1 + $0x1368] ss:$40 sps:$4 sm:$0xff]  }
  0xeb   :  { %4515 = vmatpush1.bf16.msra.mxu0 %v7682_v12  ;;  %v7757_v12 = vld [vmem:[%s11288_s1 + $0x1f0] ss:$40 sps:$4 sm:$0xff]  }
  0xec   :  { %4704 = vmatpush1.bf16.msra.mxu1 %v7685_v13  ;;  %4516 = vmatprep.subr.bf16.mxu0 %v7690_v14  ;;  %v7762_v13 = vld [vmem:[%s11288_s1 + $0x13bc] ss:$40 sps:$4 sm:$0xff]  }
  0xed   :  { %4705 = vmatprep.subr.bf16.mxu1 %v7693_v15  ;;  %v7765_v14 = vld [vmem:[%s11288_s1 + $0x244] ss:$40 sps:$4 sm:$0xff]   ;;  %v7760_v15 = vld [vmem:[%s11288_s1 + $0x13b8] ss:$40 sps:$4 sm:$0xff]  }
  0xef   :  { %4517 = vmatpush1.bf16.msra.mxu0 %v7688_v16  ;;  %v7763_v16 = vld [vmem:[%s11288_s1 + $0x240] ss:$40 sps:$4 sm:$0xff]  }
  0xf0   :  { %4706 = vmatpush1.bf16.msra.mxu1 %v7691_v17  ;;  %4518 = vmatprep.subr.bf16.mxu0 %v7696_v19  ;;  %v7768_v17 = vld [vmem:[%s11288_s1 + $0x140c] ss:$40 sps:$4 sm:$0xff]  }
  0xf1   :  { %4707 = vmatprep.subr.bf16.mxu1 %v7699_v20  ;;  %v7771_v19 = vld [vmem:[%s11288_s1 + $0x294] ss:$40 sps:$4 sm:$0xff]   ;;  %v7766_v20 = vld [vmem:[%s11288_s1 + $0x1408] ss:$40 sps:$4 sm:$0xff]  }
  0xf3   :  { %4519 = vmatpush1.bf16.msra.mxu0 %v7694_v21  ;;  %v7769_v21 = vld [vmem:[%s11288_s1 + $0x290] ss:$40 sps:$4 sm:$0xff]  }
  0xf4   :  { %4708 = vmatpush1.bf16.msra.mxu1 %v7697_v22  ;;  %4520 = vmatprep.subr.bf16.mxu0 %v7702_v24  ;;  %v7774_v22 = vld [vmem:[%s11288_s1 + $0x145c] ss:$40 sps:$4 sm:$0xff]  }
  0xf5   :  { %4709 = vmatprep.subr.bf16.mxu1 %v7705_v25  ;;  %v7777_v24 = vld [vmem:[%s11288_s1 + $0x2e4] ss:$40 sps:$4 sm:$0xff]   ;;  %v7772_v25 = vld [vmem:[%s11288_s1 + $0x1458] ss:$40 sps:$4 sm:$0xff]  }
  0xf6   :  { %v9522_v2 = vpop.f32.mrb[0].mxu1 }
  0xf7   :  { %4521 = vmatpush1.bf16.msra.mxu0 %v7700_v26  ;;  %v9530_v5 = vpop.f32.mrb[1].mxu1  ;;  %v7775_v26 = vld [vmem:[%s11288_s1 + $0x2e0] ss:$40 sps:$4 sm:$0xff]  }
  0xf8   :  { %4710 = vmatpush1.bf16.msra.mxu1 %v7703_v27  ;;  %4522 = vmatprep.subr.bf16.mxu0 %v7708_v28  ;;  %v4573_v8 = vpop.f32.mrb[2].mxu1  ;;  %v7780_v27 = vld [vmem:[%s11288_s1 + $0x14ac] ss:$40 sps:$4 sm:$0xff]  }
  0xf9   :  { %4711 = vmatprep.subr.bf16.mxu1 %v7711_v30  ;;  %v4574_v9 = vpop.f32.mrb[3].mxu1  ;;  %v7783_v28 = vld [vmem:[%s11288_s1 + $0x334] ss:$40 sps:$4 sm:$0xff]   ;;  %v7778_v30 = vld [vmem:[%s11288_s1 + $0x14a8] ss:$40 sps:$4 sm:$0xff]  }
  0xfa   :  { %v7834_v8 = vld [vmem:[%s11288_s1 + $0x604] ss:$40 sps:$4 sm:$0xff]  }
  0xfb   :  { %4523 = vmatpush1.bf16.msra.mxu0 %v7706_v31  ;;  %v7781_v31 = vld [vmem:[%s11288_s1 + $0x330] ss:$40 sps:$4 sm:$0xff]   ;;  %v7837_v9 = vld [vmem:[%s11288_s1 + $0x10c] ss:$40 sps:$4 sm:$0xff]  }
  0xfc   :  { %4712 = vmatpush1.bf16.msra.mxu1 %v7709_v32  ;;  %4524 = vmatprep.subr.bf16.mxu0 %v7714_v33  ;;  %v7786_v32 = vld [vmem:[%s11288_s1 + $0x14fc] ss:$40 sps:$4 sm:$0xff]  }
  0xfd   :  { %4713 = vmatprep.subr.bf16.mxu1 %v7717_v35  ;;  %v7789_v33 = vld [vmem:[%s11288_s1 + $0x384] ss:$40 sps:$4 sm:$0xff]   ;;  %v7784_v35 = vld [vmem:[%s11288_s1 + $0x14f8] ss:$40 sps:$4 sm:$0xff]  }
  0xff   :  { %4525 = vmatpush1.bf16.msra.mxu0 %v7712_v37  ;;  %v7787_v37 = vld [vmem:[%s11288_s1 + $0x380] ss:$40 sps:$4 sm:$0xff]  }
 0x100   :  { %4714 = vmatpush1.bf16.msra.mxu1 %v7715_v39  ;;  %4781 = vmatprep.subr.bf16.mxu0 %v7723_v42  ;;  %v7792_v39 = vld [vmem:[%s11288_s1 + $0x154c] ss:$40 sps:$4 sm:$0xff]   ;;  %v7793_v42 = vld [vmem:[%s11288_s1 + $0x3d0] ss:$40 sps:$4 sm:$0xff]  }
 0x101   :  { %4715 = vmatprep.subr.bf16.mxu1 %v7720_v41  ;;  %v7790_v41 = vld [vmem:[%s11288_s1 + $0x1548] ss:$40 sps:$4 sm:$0xff]  }
 0x102   :  { %4527 = vmatmul.mubr.bf16.vlgmr.msra.gmra.mrb[0].mxu0 %v9458_v43 }
 0x103   :  { %4782 = vmatpush1.bf16.msra.mxu0 %v7721_v45  ;;  %4813 = vmatprep.mubr.bf16.mxu0 %v8779_v52  ;;  %v7801_v45 = vld [vmem:[%s11288_s1 + $0x424] ss:$40 sps:$4 sm:$0xff]  }
 0x104   :  { %4716 = vmatpush1.bf16.msra.mxu1 %v7718_v44  ;;  %4783 = vmatprep.subr.bf16.mxu0 %v7729_v47  ;;  %v7798_v44 = vld [vmem:[%s11288_s1 + $0x159c] ss:$40 sps:$4 sm:$0xff]   ;;  %v7799_v47 = vld [vmem:[%s11288_s1 + $0x420] ss:$40 sps:$4 sm:$0xff]  }
 0x105   :  { %4717 = vmatprep.subr.bf16.mxu1 %v7726_v46  ;;  %v7796_v46 = vld [vmem:[%s11288_s1 + $0x1598] ss:$40 sps:$4 sm:$0xff]  }
 0x107   :  { %4784 = vmatpush1.bf16.msra.mxu0 %v7727_v49  ;;  %v7807_v49 = vld [vmem:[%s11288_s1 + $0x474] ss:$40 sps:$4 sm:$0xff]  }
 0x108   :  { %4718 = vmatpush1.bf16.msra.mxu1 %v7724_v48  ;;  %4785 = vmatprep.subr.bf16.mxu0 %v7735_v51  ;;  %v7804_v48 = vld [vmem:[%s11288_s1 + $0x15ec] ss:$40 sps:$4 sm:$0xff]   ;;  %v7805_v51 = vld [vmem:[%s11288_s1 + $0x470] ss:$40 sps:$4 sm:$0xff]  }
 0x109   :  { %4719 = vmatprep.subr.bf16.mxu1 %v7732_v50  ;;  %v7802_v50 = vld [vmem:[%s11288_s1 + $0x15e8] ss:$40 sps:$4 sm:$0xff]  }
 0x10b   :  { %4786 = vmatpush1.bf16.msra.mxu0 %v7733_v54  ;;  %v7813_v54 = vld [vmem:[%s11288_s1 + $0x4c4] ss:$40 sps:$4 sm:$0xff]  }
 0x10c   :  { %4720 = vmatpush1.bf16.msra.mxu1 %v7730_v53  ;;  %4787 = vmatprep.subr.bf16.mxu0 %v7741_v56  ;;  %v7810_v53 = vld [vmem:[%s11288_s1 + $0x163c] ss:$40 sps:$4 sm:$0xff]   ;;  %v7811_v56 = vld [vmem:[%s11288_s1 + $0x4c0] ss:$40 sps:$4 sm:$0xff]  }
 0x10d   :  { %4721 = vmatprep.subr.bf16.mxu1 %v7738_v55  ;;  %v7808_v55 = vld [vmem:[%s11288_s1 + $0x1638] ss:$40 sps:$4 sm:$0xff]  }
 0x10f   :  { %4788 = vmatpush1.bf16.msra.mxu0 %v7739_v58  ;;  %v7819_v58 = vld [vmem:[%s11288_s1 + $0x1c] ss:$40 sps:$4 sm:$0xff]  }
 0x110   :  { %4722 = vmatpush1.bf16.msra.mxu1 %v7736_v57  ;;  %4789 = vmatprep.subr.bf16.mxu0 %v7747_v60  ;;  %v7816_v57 = vld [vmem:[%s11288_s1 + $0x514] ss:$40 sps:$4 sm:$0xff]   ;;  %v7817_v60 = vld [vmem:[%s11288_s1 + $0x18] ss:$40 sps:$4 sm:$0xff]  }
 0x111   :  { %4723 = vmatprep.subr.bf16.mxu1 %v7744_v59  ;;  %v7814_v59 = vld [vmem:[%s11288_s1 + $0x510] ss:$40 sps:$4 sm:$0xff]  }
 0x113   :  { %4790 = vmatpush1.bf16.msra.mxu0 %v7745_v62  ;;  %v7825_v62 = vld [vmem:[%s11288_s1 + $0x6c] ss:$40 sps:$4 sm:$0xff]  }
 0x114   :  { %4724 = vmatpush1.bf16.msra.mxu1 %v7742_v61  ;;  %4791 = vmatprep.subr.bf16.mxu0 %v7753_v0  ;;  %v7822_v61 = vld [vmem:[%s11288_s1 + $0x564] ss:$40 sps:$4 sm:$0xff]   ;;  %v7823_v0 = vld [vmem:[%s11288_s1 + $0x68] ss:$40 sps:$4 sm:$0xff]  }
 0x115   :  { %4725 = vmatprep.subr.bf16.mxu1 %v7750_v63  ;;  %v7820_v63 = vld [vmem:[%s11288_s1 + $0x560] ss:$40 sps:$4 sm:$0xff]  }
 0x117   :  { %4792 = vmatpush1.bf16.msra.mxu0 %v7751_v4  ;;  %v7831_v4 = vld [vmem:[%s11288_s1 + $0xbc] ss:$40 sps:$4 sm:$0xff]  }
 0x118   :  { %4726 = vmatpush1.bf16.msra.mxu1 %v7748_v3  ;;  %4793 = vmatprep.subr.bf16.mxu0 %v7759_v7  ;;  %v7828_v3 = vld [vmem:[%s11288_s1 + $0x5b4] ss:$40 sps:$4 sm:$0xff]   ;;  %v7829_v7 = vld [vmem:[%s11288_s1 + $0xb8] ss:$40 sps:$4 sm:$0xff]  }
 0x119   :  { %4727 = vmatprep.subr.bf16.mxu1 %v7756_v6  ;;  %v7826_v6 = vld [vmem:[%s11288_s1 + $0x5b0] ss:$40 sps:$4 sm:$0xff]  }
 0x11b   :  { %4794 = vmatpush1.bf16.msra.mxu0 %v7757_v12  ;;  %v7835_v12 = vld [vmem:[%s11288_s1 + $0x108] ss:$40 sps:$4 sm:$0xff]  }
 0x11c   :  { %4728 = vmatpush1.bf16.msra.mxu1 %v7754_v11  ;;  %4795 = vmatprep.subr.bf16.mxu0 %v7765_v14  ;;  %v7832_v11 = vld [vmem:[%s11288_s1 + $0x600] ss:$40 sps:$4 sm:$0xff]   ;;  %v7843_v14 = vld [vmem:[%s11288_s1 + $0x15c] ss:$40 sps:$4 sm:$0xff]  }
 0x11d   :  { %4729 = vmatprep.subr.bf16.mxu1 %v7762_v13  ;;  %v7840_v13 = vld [vmem:[%s11288_s1 + $0x654] ss:$40 sps:$4 sm:$0xff]  }
 0x11f   :  { %4796 = vmatpush1.bf16.msra.mxu0 %v7763_v16  ;;  %v7841_v16 = vld [vmem:[%s11288_s1 + $0x158] ss:$40 sps:$4 sm:$0xff]  }
 0x120   :  { %4730 = vmatpush1.bf16.msra.mxu1 %v7760_v15  ;;  %4797 = vmatprep.subr.bf16.mxu0 %v7771_v19  ;;  %v7838_v15 = vld [vmem:[%s11288_s1 + $0x650] ss:$40 sps:$4 sm:$0xff]   ;;  %v7849_v19 = vld [vmem:[%s11288_s1 + $0x1ac] ss:$40 sps:$4 sm:$0xff]  }
 0x121   :  { %4740 = vmatprep.subr.bf16.mxu1 %v7768_v17  ;;  %v7846_v17 = vld [vmem:[%s11288_s1 + $0x6a4] ss:$40 sps:$4 sm:$0xff]  }
 0x123   :  { %4732 = vmatmul.mubr.bf16.vlgmr.msra.gmra.mrb[4].mxu1 %v9458_v43  ;;  %4798 = vmatpush1.bf16.msra.mxu0 %v7769_v21  ;;  %v7847_v21 = vld [vmem:[%s11288_s1 + $0x1a8] ss:$40 sps:$4 sm:$0xff]  }
 0x124   :  { %4741 = vmatpush1.bf16.msra.mxu1 %v7766_v20  ;;  %4799 = vmatprep.subr.bf16.mxu0 %v7777_v24  ;;  %v7844_v20 = vld [vmem:[%s11288_s1 + $0x6a0] ss:$40 sps:$4 sm:$0xff]   ;;  %v7855_v24 = vld [vmem:[%s11288_s1 + $0x1fc] ss:$40 sps:$4 sm:$0xff]  }
 0x125   :  { %4742 = vmatprep.subr.bf16.mxu1 %v7774_v22  ;;  %4772 = vmatprep.mubr.bf16.mxu1 %v8574_v1  ;;  %v7852_v22 = vld [vmem:[%s11288_s1 + $0x6f4] ss:$40 sps:$4 sm:$0xff]  }
 0x127   :  { %4800 = vmatpush1.bf16.msra.mxu0 %v7775_v26  ;;  %v7853_v26 = vld [vmem:[%s11288_s1 + $0x1f8] ss:$40 sps:$4 sm:$0xff]  }
 0x128   :  { %4743 = vmatpush1.bf16.msra.mxu1 %v7772_v25  ;;  %4801 = vmatprep.subr.bf16.mxu0 %v7783_v28  ;;  %v7850_v25 = vld [vmem:[%s11288_s1 + $0x6f0] ss:$40 sps:$4 sm:$0xff]   ;;  %v7861_v28 = vld [vmem:[%s11288_s1 + $0x24c] ss:$40 sps:$4 sm:$0xff]  }
 0x129   :  { %4744 = vmatprep.subr.bf16.mxu1 %v7780_v27  ;;  %v7858_v27 = vld [vmem:[%s11288_s1 + $0x744] ss:$40 sps:$4 sm:$0xff]  }
 0x12b   :  { %4802 = vmatpush1.bf16.msra.mxu0 %v7781_v31  ;;  %v7859_v31 = vld [vmem:[%s11288_s1 + $0x248] ss:$40 sps:$4 sm:$0xff]  }
 0x12c   :  { %4745 = vmatpush1.bf16.msra.mxu1 %v7778_v30  ;;  %4803 = vmatprep.subr.bf16.mxu0 %v7789_v33  ;;  %v7856_v30 = vld [vmem:[%s11288_s1 + $0x740] ss:$40 sps:$4 sm:$0xff]   ;;  %v7867_v33 = vld [vmem:[%s11288_s1 + $0x29c] ss:$40 sps:$4 sm:$0xff]  }
 0x12d   :  { %4746 = vmatprep.subr.bf16.mxu1 %v7786_v32  ;;  %v7864_v32 = vld [vmem:[%s11288_s1 + $0x794] ss:$40 sps:$4 sm:$0xff]  }
 0x12f   :  { %4804 = vmatpush1.bf16.msra.mxu0 %v7787_v37  ;;  %v7865_v37 = vld [vmem:[%s11288_s1 + $0x298] ss:$40 sps:$4 sm:$0xff]  }
 0x130   :  { %4747 = vmatpush1.bf16.msra.mxu1 %v7784_v35  ;;  %4805 = vmatprep.subr.bf16.mxu0 %v7795_v40  ;;  %v7862_v35 = vld [vmem:[%s11288_s1 + $0x790] ss:$40 sps:$4 sm:$0xff]   ;;  %v7873_v40 = vld [vmem:[%s11288_s1 + $0x2ec] ss:$40 sps:$4 sm:$0xff]  }
 0x131   :  { %4748 = vmatprep.subr.bf16.mxu1 %v7792_v39  ;;  %v7870_v39 = vld [vmem:[%s11288_s1 + $0x7e4] ss:$40 sps:$4 sm:$0xff]  }
 0x133   :  { %4806 = vmatpush1.bf16.msra.mxu0 %v7793_v42  ;;  %v7871_v42 = vld [vmem:[%s11288_s1 + $0x2e8] ss:$40 sps:$4 sm:$0xff]  }
 0x134   :  { %4749 = vmatpush1.bf16.msra.mxu1 %v7790_v41  ;;  %4807 = vmatprep.subr.bf16.mxu0 %v7801_v45  ;;  %v7868_v41 = vld [vmem:[%s11288_s1 + $0x7e0] ss:$40 sps:$4 sm:$0xff]   ;;  %v7879_v45 = vld [vmem:[%s11288_s1 + $0x33c] ss:$40 sps:$4 sm:$0xff]  }
 0x135   :  { %4750 = vmatprep.subr.bf16.mxu1 %v7798_v44  ;;  %v7876_v44 = vld [vmem:[%s11288_s1 + $0x834] ss:$40 sps:$4 sm:$0xff]  }
 0x137   :  { %4808 = vmatpush1.bf16.msra.mxu0 %v7799_v47  ;;  %v7877_v47 = vld [vmem:[%s11288_s1 + $0x338] ss:$40 sps:$4 sm:$0xff]  }
 0x138   :  { %4751 = vmatpush1.bf16.msra.mxu1 %v7796_v46  ;;  %4809 = vmatprep.subr.bf16.mxu0 %v7807_v49  ;;  %v7874_v46 = vld [vmem:[%s11288_s1 + $0x830] ss:$40 sps:$4 sm:$0xff]   ;;  %v7885_v49 = vld [vmem:[%s11288_s1 + $0x38c] ss:$40 sps:$4 sm:$0xff]  }
 0x139   :  { %4752 = vmatprep.subr.bf16.mxu1 %v7804_v48  ;;  %v7882_v48 = vld [vmem:[%s11288_s1 + $0x884] ss:$40 sps:$4 sm:$0xff]  }
 0x13b   :  { %4810 = vmatpush1.bf16.msra.mxu0 %v7805_v51  ;;  %v7883_v51 = vld [vmem:[%s11288_s1 + $0x388] ss:$40 sps:$4 sm:$0xff]  }
 0x13c   :  { %4753 = vmatpush1.bf16.msra.mxu1 %v7802_v50  ;;  %4811 = vmatprep.subr.bf16.mxu0 %v7813_v54  ;;  %v7880_v50 = vld [vmem:[%s11288_s1 + $0x880] ss:$40 sps:$4 sm:$0xff]   ;;  %v7891_v54 = vld [vmem:[%s11288_s1 + $0x3dc] ss:$40 sps:$4 sm:$0xff]  }
 0x13d   :  { %4754 = vmatprep.subr.bf16.mxu1 %v7810_v53  ;;  %v7888_v53 = vld [vmem:[%s11288_s1 + $0x8d4] ss:$40 sps:$4 sm:$0xff]  }
 0x13f   :  { %4812 = vmatpush1.bf16.msra.mxu0 %v7811_v56  ;;  %v7889_v56 = vld [vmem:[%s11288_s1 + $0x3d8] ss:$40 sps:$4 sm:$0xff]  }
 0x140   :  { %4755 = vmatpush1.bf16.msra.mxu1 %v7808_v55  ;;  %4822 = vmatprep.subr.bf16.mxu0 %v7816_v57  ;;  %v7886_v55 = vld [vmem:[%s11288_s1 + $0x8d0] ss:$40 sps:$4 sm:$0xff]   ;;  %v7894_v57 = vld [vmem:[%s11288_s1 + $0x924] ss:$40 sps:$4 sm:$0xff]  }
 0x141   :  { %4986 = vmatprep.subr.bf16.mxu1 %v7819_v58  ;;  %v7897_v58 = vld [vmem:[%s11288_s1 + $0x42c] ss:$40 sps:$4 sm:$0xff]  }
 0x142   :  { %4814 = vmatmul.mubr.bf16.vlgmr.msra.gmra.mrb[4].mxu0 %v8843_v10 }
 0x143   :  { %4773 = vmatmul.mubr.bf16.vlgmr.msra.gmra.mrb[4].mxu1 %v8737_v38  ;;  %4823 = vmatpush1.bf16.msra.mxu0 %v7814_v59  ;;  %v7892_v59 = vld [vmem:[%s11288_s1 + $0x920] ss:$40 sps:$4 sm:$0xff]  }
 0x144   :  { %4987 = vmatpush1.bf16.msra.mxu1 %v7817_v60  ;;  %4824 = vmatprep.subr.bf16.mxu0 %v7822_v61  ;;  %v7895_v60 = vld [vmem:[%s11288_s1 + $0x428] ss:$40 sps:$4 sm:$0xff]   ;;  %v7900_v61 = vld [vmem:[%s11288_s1 + $0x974] ss:$40 sps:$4 sm:$0xff]  }
 0x145   :  { %4988 = vmatprep.subr.bf16.mxu1 %v7825_v62  ;;  %4854 = vmatprep.mubr.bf16.mxu0 %v8921_v36  ;;  %v7903_v62 = vld [vmem:[%s11288_s1 + $0x47c] ss:$40 sps:$4 sm:$0xff]  }
 0x146   :  { %5018 = vmatprep.mubr.bf16.mxu1 %v8779_v52 }
 0x147   :  { %4825 = vmatpush1.bf16.msra.mxu0 %v7820_v63  ;;  %v7898_v63 = vld [vmem:[%s11288_s1 + $0x970] ss:$40 sps:$4 sm:$0xff]  }
 0x148   :  { %4989 = vmatpush1.bf16.msra.mxu1 %v7823_v0  ;;  %4826 = vmatprep.subr.bf16.mxu0 %v7828_v3  ;;  %v7901_v0 = vld [vmem:[%s11288_s1 + $0x478] ss:$40 sps:$4 sm:$0xff]   ;;  %v7906_v3 = vld [vmem:[%s11288_s1 + $0x9c4] ss:$40 sps:$4 sm:$0xff]  }
 0x149   :  { %4990 = vmatprep.subr.bf16.mxu1 %v7831_v4  ;;  %v7909_v4 = vld [vmem:[%s11288_s1 + $0x4cc] ss:$40 sps:$4 sm:$0xff]  }
 0x14b   :  { %4827 = vmatpush1.bf16.msra.mxu0 %v7826_v6  ;;  %v7904_v6 = vld [vmem:[%s11288_s1 + $0x9c0] ss:$40 sps:$4 sm:$0xff]  }
 0x14c   :  { %4991 = vmatpush1.bf16.msra.mxu1 %v7829_v7  ;;  %4828 = vmatprep.subr.bf16.mxu0 %v7834_v8  ;;  %v7907_v7 = vld [vmem:[%s11288_s1 + $0x4c8] ss:$40 sps:$4 sm:$0xff]   ;;  %v7912_v8 = vld [vmem:[%s11288_s1 + $0xa14] ss:$40 sps:$4 sm:$0xff]  }
 0x14d   :  { %4992 = vmatprep.subr.bf16.mxu1 %v7837_v9  ;;  %v7915_v9 = vld [vmem:[%s11288_s1 + $0x51c] ss:$40 sps:$4 sm:$0xff]  }
 0x14f   :  { %4829 = vmatpush1.bf16.msra.mxu0 %v7832_v11  ;;  %v7910_v11 = vld [vmem:[%s11288_s1 + $0xa10] ss:$40 sps:$4 sm:$0xff]  }
 0x150   :  { %4993 = vmatpush1.bf16.msra.mxu1 %v7835_v12  ;;  %4830 = vmatprep.subr.bf16.mxu0 %v7840_v13  ;;  %v7913_v12 = vld [vmem:[%s11288_s1 + $0x518] ss:$40 sps:$4 sm:$0xff]   ;;  %v7918_v13 = vld [vmem:[%s11288_s1 + $0xa64] ss:$40 sps:$4 sm:$0xff]  }
 0x151   :  { %4994 = vmatprep.subr.bf16.mxu1 %v7843_v14  ;;  %v7921_v14 = vld [vmem:[%s11288_s1 + $0x56c] ss:$40 sps:$4 sm:$0xff]  }
 0x153   :  { %4831 = vmatpush1.bf16.msra.mxu0 %v7838_v15  ;;  %v7916_v15 = vld [vmem:[%s11288_s1 + $0xa60] ss:$40 sps:$4 sm:$0xff]  }
 0x154   :  { %4995 = vmatpush1.bf16.msra.mxu1 %v7841_v16  ;;  %4832 = vmatprep.subr.bf16.mxu0 %v7846_v17  ;;  %v7919_v16 = vld [vmem:[%s11288_s1 + $0x568] ss:$40 sps:$4 sm:$0xff]   ;;  %v7924_v17 = vld [vmem:[%s11288_s1 + $0xab4] ss:$40 sps:$4 sm:$0xff]  }
 0x155   :  { %4996 = vmatprep.subr.bf16.mxu1 %v7849_v19  ;;  %v7927_v19 = vld [vmem:[%s11288_s1 + $0x5bc] ss:$40 sps:$4 sm:$0xff]  }
 0x157   :  { %4833 = vmatpush1.bf16.msra.mxu0 %v7844_v20  ;;  %v7922_v20 = vld [vmem:[%s11288_s1 + $0xab0] ss:$40 sps:$4 sm:$0xff]  }
 0x158   :  { %4997 = vmatpush1.bf16.msra.mxu1 %v7847_v21  ;;  %4834 = vmatprep.subr.bf16.mxu0 %v7852_v22  ;;  %v7925_v21 = vld [vmem:[%s11288_s1 + $0x5b8] ss:$40 sps:$4 sm:$0xff]   ;;  %v7930_v22 = vld [vmem:[%s11288_s1 + $0xb04] ss:$40 sps:$4 sm:$0xff]  }
 0x159   :  { %4998 = vmatprep.subr.bf16.mxu1 %v7855_v24  ;;  %v7933_v24 = vld [vmem:[%s11288_s1 + $0x60c] ss:$40 sps:$4 sm:$0xff]  }
 0x15b   :  { %4835 = vmatpush1.bf16.msra.mxu0 %v7850_v25  ;;  %v7928_v25 = vld [vmem:[%s11288_s1 + $0xb00] ss:$40 sps:$4 sm:$0xff]  }
 0x15c   :  { %4999 = vmatpush1.bf16.msra.mxu1 %v7853_v26  ;;  %4836 = vmatprep.subr.bf16.mxu0 %v7858_v27  ;;  %v7931_v26 = vld [vmem:[%s11288_s1 + $0x608] ss:$40 sps:$4 sm:$0xff]   ;;  %v7936_v27 = vld [vmem:[%s11288_s1 + $0xb54] ss:$40 sps:$4 sm:$0xff]  }
 0x15d   :  { %5000 = vmatprep.subr.bf16.mxu1 %v7861_v28  ;;  %v7939_v28 = vld [vmem:[%s11288_s1 + $0x65c] ss:$40 sps:$4 sm:$0xff]  }
 0x15f   :  { %4837 = vmatpush1.bf16.msra.mxu0 %v7856_v30  ;;  %v7934_v30 = vld [vmem:[%s11288_s1 + $0xb50] ss:$40 sps:$4 sm:$0xff]  }
 0x160   :  { %5001 = vmatpush1.bf16.msra.mxu1 %v7859_v31  ;;  %4838 = vmatprep.subr.bf16.mxu0 %v7864_v32  ;;  %v7937_v31 = vld [vmem:[%s11288_s1 + $0x658] ss:$40 sps:$4 sm:$0xff]   ;;  %v7942_v32 = vld [vmem:[%s11288_s1 + $0xba4] ss:$40 sps:$4 sm:$0xff]  }
 0x161   :  { %5002 = vmatprep.subr.bf16.mxu1 %v7867_v33  ;;  %v7945_v33 = vld [vmem:[%s11288_s1 + $0x6ac] ss:$40 sps:$4 sm:$0xff]  }
 0x163   :  { %4839 = vmatpush1.bf16.msra.mxu0 %v7862_v35  ;;  %v7940_v35 = vld [vmem:[%s11288_s1 + $0xba0] ss:$40 sps:$4 sm:$0xff]  }
 0x164   :  { %5003 = vmatpush1.bf16.msra.mxu1 %v7865_v37  ;;  %4840 = vmatprep.subr.bf16.mxu0 %v7870_v39  ;;  %v7943_v37 = vld [vmem:[%s11288_s1 + $0x6a8] ss:$40 sps:$4 sm:$0xff]   ;;  %v7948_v39 = vld [vmem:[%s11288_s1 + $0xbf4] ss:$40 sps:$4 sm:$0xff]  }
 0x165   :  { %5004 = vmatprep.subr.bf16.mxu1 %v7873_v40  ;;  %v7951_v40 = vld [vmem:[%s11288_s1 + $0x6fc] ss:$40 sps:$4 sm:$0xff]  }
 0x167   :  { %4841 = vmatpush1.bf16.msra.mxu0 %v7868_v41  ;;  %v7946_v41 = vld [vmem:[%s11288_s1 + $0xbf0] ss:$40 sps:$4 sm:$0xff]  }
 0x168   :  { %5005 = vmatpush1.bf16.msra.mxu1 %v7871_v42  ;;  %4842 = vmatprep.subr.bf16.mxu0 %v7876_v44  ;;  %v7949_v42 = vld [vmem:[%s11288_s1 + $0x6f8] ss:$40 sps:$4 sm:$0xff]   ;;  %v7954_v44 = vld [vmem:[%s11288_s1 + $0xc44] ss:$40 sps:$4 sm:$0xff]  }
 0x169   :  { %5006 = vmatprep.subr.bf16.mxu1 %v7879_v45  ;;  %v7957_v45 = vld [vmem:[%s11288_s1 + $0x74c] ss:$40 sps:$4 sm:$0xff]  }
 0x16b   :  { %4843 = vmatpush1.bf16.msra.mxu0 %v7874_v46  ;;  %v7952_v46 = vld [vmem:[%s11288_s1 + $0xc40] ss:$40 sps:$4 sm:$0xff]  }
 0x16c   :  { %5007 = vmatpush1.bf16.msra.mxu1 %v7877_v47  ;;  %4844 = vmatprep.subr.bf16.mxu0 %v7882_v48  ;;  %v7955_v47 = vld [vmem:[%s11288_s1 + $0x748] ss:$40 sps:$4 sm:$0xff]   ;;  %v7960_v48 = vld [vmem:[%s11288_s1 + $0xc94] ss:$40 sps:$4 sm:$0xff]  }
 0x16d   :  { %5008 = vmatprep.subr.bf16.mxu1 %v7885_v49  ;;  %v7963_v49 = vld [vmem:[%s11288_s1 + $0x79c] ss:$40 sps:$4 sm:$0xff]  }
 0x16f   :  { %4845 = vmatpush1.bf16.msra.mxu0 %v7880_v50  ;;  %v7958_v50 = vld [vmem:[%s11288_s1 + $0xc90] ss:$40 sps:$4 sm:$0xff]  }
 0x170   :  { %5009 = vmatpush1.bf16.msra.mxu1 %v7883_v51  ;;  %4846 = vmatprep.subr.bf16.mxu0 %v7888_v53  ;;  %v7961_v51 = vld [vmem:[%s11288_s1 + $0x798] ss:$40 sps:$4 sm:$0xff]   ;;  %v7966_v53 = vld [vmem:[%s11288_s1 + $0xce4] ss:$40 sps:$4 sm:$0xff]  }
 0x171   :  { %5010 = vmatprep.subr.bf16.mxu1 %v7891_v54  ;;  %v7969_v54 = vld [vmem:[%s11288_s1 + $0x7ec] ss:$40 sps:$4 sm:$0xff]  }
 0x173   :  { %4847 = vmatpush1.bf16.msra.mxu0 %v7886_v55  ;;  %v7964_v55 = vld [vmem:[%s11288_s1 + $0xce0] ss:$40 sps:$4 sm:$0xff]  }
 0x174   :  { %5011 = vmatpush1.bf16.msra.mxu1 %v7889_v56  ;;  %4848 = vmatprep.subr.bf16.mxu0 %v7894_v57  ;;  %v7967_v56 = vld [vmem:[%s11288_s1 + $0x7e8] ss:$40 sps:$4 sm:$0xff]   ;;  %v7972_v57 = vld [vmem:[%s11288_s1 + $0xd34] ss:$40 sps:$4 sm:$0xff]  }
 0x175   :  { %5012 = vmatprep.subr.bf16.mxu1 %v7897_v58  ;;  %v7975_v58 = vld [vmem:[%s11288_s1 + $0x83c] ss:$40 sps:$4 sm:$0xff]  }
 0x177   :  { %4849 = vmatpush1.bf16.msra.mxu0 %v7892_v59  ;;  %v7970_v59 = vld [vmem:[%s11288_s1 + $0xd30] ss:$40 sps:$4 sm:$0xff]  }
 0x178   :  { %5013 = vmatpush1.bf16.msra.mxu1 %v7895_v60  ;;  %4850 = vmatprep.subr.bf16.mxu0 %v7900_v61  ;;  %v7973_v60 = vld [vmem:[%s11288_s1 + $0x838] ss:$40 sps:$4 sm:$0xff]   ;;  %v7978_v61 = vld [vmem:[%s11288_s1 + $0xd84] ss:$40 sps:$4 sm:$0xff]  }
 0x179   :  { %5014 = vmatprep.subr.bf16.mxu1 %v7903_v62  ;;  %v7981_v62 = vld [vmem:[%s11288_s1 + $0x88c] ss:$40 sps:$4 sm:$0xff]  }
 0x17b   :  { %4851 = vmatpush1.bf16.msra.mxu0 %v7898_v63  ;;  %v7976_v63 = vld [vmem:[%s11288_s1 + $0xd80] ss:$40 sps:$4 sm:$0xff]  }
 0x17c   :  { %5015 = vmatpush1.bf16.msra.mxu1 %v7901_v0  ;;  %4852 = vmatprep.subr.bf16.mxu0 %v7906_v3  ;;  %v7979_v0 = vld [vmem:[%s11288_s1 + $0x888] ss:$40 sps:$4 sm:$0xff]   ;;  %v7984_v3 = vld [vmem:[%s11288_s1 + $0xdd4] ss:$40 sps:$4 sm:$0xff]  }
 0x17d   :  { %5016 = vmatprep.subr.bf16.mxu1 %v7909_v4  ;;  %v7987_v4 = vld [vmem:[%s11288_s1 + $0x8dc] ss:$40 sps:$4 sm:$0xff]  }
 0x17f   :  { %4853 = vmatpush1.bf16.msra.mxu0 %v7904_v6  ;;  %v7982_v6 = vld [vmem:[%s11288_s1 + $0xdd0] ss:$40 sps:$4 sm:$0xff]  }
 0x180   :  { %5017 = vmatpush1.bf16.msra.mxu1 %v7907_v7  ;;  %4863 = vmatprep.subr.bf16.mxu0 %v7912_v8  ;;  %v7985_v7 = vld [vmem:[%s11288_s1 + $0x8d8] ss:$40 sps:$4 sm:$0xff]   ;;  %v7990_v8 = vld [vmem:[%s11288_s1 + $0xe24] ss:$40 sps:$4 sm:$0xff]  }
 0x181   :  { %5027 = vmatprep.subr.bf16.mxu1 %v7915_v9  ;;  %v7993_v9 = vld [vmem:[%s11288_s1 + $0x92c] ss:$40 sps:$4 sm:$0xff]  }
 0x182   :  { %4855 = vmatmul.mubr.bf16.vlgmr.msra.gmra.mrb[4].mxu0 %v9049_v18 }
 0x183   :  { %5019 = vmatmul.mubr.bf16.vlgmr.msra.gmra.mrb[8].mxu1 %v8843_v10  ;;  %4864 = vmatpush1.bf16.msra.mxu0 %v7910_v11  ;;  %v7988_v11 = vld [vmem:[%s11288_s1 + $0xe20] ss:$40 sps:$4 sm:$0xff]  }
 0x184   :  { %5028 = vmatpush1.bf16.msra.mxu1 %v7913_v12  ;;  %4865 = vmatprep.subr.bf16.mxu0 %v7918_v13  ;;  %v7991_v12 = vld [vmem:[%s11288_s1 + $0x928] ss:$40 sps:$4 sm:$0xff]   ;;  %v7996_v13 = vld [vmem:[%s11288_s1 + $0xe74] ss:$40 sps:$4 sm:$0xff]  }
 0x185   :  { %5029 = vmatprep.subr.bf16.mxu1 %v7921_v14  ;;  %4895 = vmatprep.mubr.bf16.mxu0 %v9063_v23  ;;  %v7999_v14 = vld [vmem:[%s11288_s1 + $0x97c] ss:$40 sps:$4 sm:$0xff]  }
 0x186   :  { %5059 = vmatprep.mubr.bf16.mxu1 %v8921_v36 }
 0x187   :  { %4866 = vmatpush1.bf16.msra.mxu0 %v7916_v15  ;;  %v7994_v15 = vld [vmem:[%s11288_s1 + $0xe70] ss:$40 sps:$4 sm:$0xff]  }
 0x188   :  { %5030 = vmatpush1.bf16.msra.mxu1 %v7919_v16  ;;  %4867 = vmatprep.subr.bf16.mxu0 %v7924_v17  ;;  %v7997_v16 = vld [vmem:[%s11288_s1 + $0x978] ss:$40 sps:$4 sm:$0xff]   ;;  %v8002_v17 = vld [vmem:[%s11288_s1 + $0xec4] ss:$40 sps:$4 sm:$0xff]  }
 0x189   :  { %5031 = vmatprep.subr.bf16.mxu1 %v7927_v19  ;;  %v8005_v19 = vld [vmem:[%s11288_s1 + $0x9cc] ss:$40 sps:$4 sm:$0xff]  }
 0x18b   :  { %4868 = vmatpush1.bf16.msra.mxu0 %v7922_v20  ;;  %v8000_v20 = vld [vmem:[%s11288_s1 + $0xec0] ss:$40 sps:$4 sm:$0xff]  }
 0x18c   :  { %5032 = vmatpush1.bf16.msra.mxu1 %v7925_v21  ;;  %4869 = vmatprep.subr.bf16.mxu0 %v7930_v22  ;;  %v8003_v21 = vld [vmem:[%s11288_s1 + $0x9c8] ss:$40 sps:$4 sm:$0xff]   ;;  %v8008_v22 = vld [vmem:[%s11288_s1 + $0xf14] ss:$40 sps:$4 sm:$0xff]  }
 0x18d   :  { %5033 = vmatprep.subr.bf16.mxu1 %v7933_v24  ;;  %v8011_v24 = vld [vmem:[%s11288_s1 + $0xa1c] ss:$40 sps:$4 sm:$0xff]  }
 0x18f   :  { %4870 = vmatpush1.bf16.msra.mxu0 %v7928_v25  ;;  %v8006_v25 = vld [vmem:[%s11288_s1 + $0xf10] ss:$40 sps:$4 sm:$0xff]  }
 0x190   :  { %5034 = vmatpush1.bf16.msra.mxu1 %v7931_v26  ;;  %4871 = vmatprep.subr.bf16.mxu0 %v7936_v27  ;;  %v8009_v26 = vld [vmem:[%s11288_s1 + $0xa18] ss:$40 sps:$4 sm:$0xff]   ;;  %v8014_v27 = vld [vmem:[%s11288_s1 + $0xf64] ss:$40 sps:$4 sm:$0xff]  }
 0x191   :  { %5035 = vmatprep.subr.bf16.mxu1 %v7939_v28  ;;  %v8017_v28 = vld [vmem:[%s11288_s1 + $0xa6c] ss:$40 sps:$4 sm:$0xff]  }
 0x193   :  { %4872 = vmatpush1.bf16.msra.mxu0 %v7934_v30  ;;  %v8012_v30 = vld [vmem:[%s11288_s1 + $0xf60] ss:$40 sps:$4 sm:$0xff]  }
 0x194   :  { %5036 = vmatpush1.bf16.msra.mxu1 %v7937_v31  ;;  %4873 = vmatprep.subr.bf16.mxu0 %v7942_v32  ;;  %v8015_v31 = vld [vmem:[%s11288_s1 + $0xa68] ss:$40 sps:$4 sm:$0xff]   ;;  %v8020_v32 = vld [vmem:[%s11288_s1 + $0xfb4] ss:$40 sps:$4 sm:$0xff]  }
 0x195   :  { %5037 = vmatprep.subr.bf16.mxu1 %v7945_v33  ;;  %v8023_v33 = vld [vmem:[%s11288_s1 + $0xabc] ss:$40 sps:$4 sm:$0xff]  }
 0x197   :  { %4874 = vmatpush1.bf16.msra.mxu0 %v7940_v35  ;;  %v8018_v35 = vld [vmem:[%s11288_s1 + $0xfb0] ss:$40 sps:$4 sm:$0xff]  }
 0x198   :  { %5038 = vmatpush1.bf16.msra.mxu1 %v7943_v37  ;;  %4875 = vmatprep.subr.bf16.mxu0 %v7948_v39  ;;  %v8021_v37 = vld [vmem:[%s11288_s1 + $0xab8] ss:$40 sps:$4 sm:$0xff]   ;;  %v8026_v39 = vld [vmem:[%s11288_s1 + $0x1004] ss:$40 sps:$4 sm:$0xff]  }
 0x199   :  { %5039 = vmatprep.subr.bf16.mxu1 %v7951_v40  ;;  %v8029_v40 = vld [vmem:[%s11288_s1 + $0xb0c] ss:$40 sps:$4 sm:$0xff]  }
 0x19b   :  { %4876 = vmatpush1.bf16.msra.mxu0 %v7946_v41  ;;  %v8024_v41 = vld [vmem:[%s11288_s1 + $0x1000] ss:$40 sps:$4 sm:$0xff]  }
 0x19c   :  { %5040 = vmatpush1.bf16.msra.mxu1 %v7949_v42  ;;  %4877 = vmatprep.subr.bf16.mxu0 %v7954_v44  ;;  %v8027_v42 = vld [vmem:[%s11288_s1 + $0xb08] ss:$40 sps:$4 sm:$0xff]   ;;  %v8032_v44 = vld [vmem:[%s11288_s1 + $0x1054] ss:$40 sps:$4 sm:$0xff]  }
 0x19d   :  { %5041 = vmatprep.subr.bf16.mxu1 %v7957_v45  ;;  %v8035_v45 = vld [vmem:[%s11288_s1 + $0xb5c] ss:$40 sps:$4 sm:$0xff]  }
 0x19f   :  { %4878 = vmatpush1.bf16.msra.mxu0 %v7952_v46  ;;  %v8030_v46 = vld [vmem:[%s11288_s1 + $0x1050] ss:$40 sps:$4 sm:$0xff]  }
 0x1a0   :  { %5042 = vmatpush1.bf16.msra.mxu1 %v7955_v47  ;;  %4879 = vmatprep.subr.bf16.mxu0 %v7960_v48  ;;  %v8033_v47 = vld [vmem:[%s11288_s1 + $0xb58] ss:$40 sps:$4 sm:$0xff]   ;;  %v8038_v48 = vld [vmem:[%s11288_s1 + $0x10a4] ss:$40 sps:$4 sm:$0xff]  }
 0x1a1   :  { %5043 = vmatprep.subr.bf16.mxu1 %v7963_v49  ;;  %v8041_v49 = vld [vmem:[%s11288_s1 + $0xbac] ss:$40 sps:$4 sm:$0xff]  }
 0x1a3   :  { %4880 = vmatpush1.bf16.msra.mxu0 %v7958_v50  ;;  %v8036_v50 = vld [vmem:[%s11288_s1 + $0x10a0] ss:$40 sps:$4 sm:$0xff]  }
 0x1a4   :  { %5044 = vmatpush1.bf16.msra.mxu1 %v7961_v51  ;;  %4881 = vmatprep.subr.bf16.mxu0 %v7966_v53  ;;  %v8039_v51 = vld [vmem:[%s11288_s1 + $0xba8] ss:$40 sps:$4 sm:$0xff]   ;;  %v8044_v53 = vld [vmem:[%s11288_s1 + $0x10f4] ss:$40 sps:$4 sm:$0xff]  }
 0x1a5   :  { %5045 = vmatprep.subr.bf16.mxu1 %v7969_v54  ;;  %v8047_v54 = vld [vmem:[%s11288_s1 + $0xbfc] ss:$40 sps:$4 sm:$0xff]  }
 0x1a7   :  { %4882 = vmatpush1.bf16.msra.mxu0 %v7964_v55 }
 0x1a8   :  { %5046 = vmatpush1.bf16.msra.mxu1 %v7967_v56  ;;  %4883 = vmatprep.subr.bf16.mxu0 %v7972_v57 }
 0x1a9   :  { %5047 = vmatprep.subr.bf16.mxu1 %v7975_v58 }
 0x1ab   :  { %4884 = vmatpush1.bf16.msra.mxu0 %v7970_v59 }
 0x1ac   :  { %5048 = vmatpush1.bf16.msra.mxu1 %v7973_v60  ;;  %4885 = vmatprep.subr.bf16.mxu0 %v7978_v61  ;;  %v8042_v60 = vld [vmem:[%s11288_s1 + $0x10f0] ss:$40 sps:$4 sm:$0xff]  }
 0x1ad   :  { %5049 = vmatprep.subr.bf16.mxu1 %v7981_v62  ;;  %v8045_v61 = vld [vmem:[%s11288_s1 + $0xbf8] ss:$40 sps:$4 sm:$0xff]  }
 0x1af   :  { %4886 = vmatpush1.bf16.msra.mxu0 %v7976_v63  ;;  %v8048_v63 = vld [vmem:[%s11288_s1 + $0x1140] ss:$40 sps:$4 sm:$0xff]  }
 0x1b0   :  { %5050 = vmatpush1.bf16.msra.mxu1 %v7979_v0  ;;  %4887 = vmatprep.subr.bf16.mxu0 %v7984_v3  ;;  %v8051_v0 = vld [vmem:[%s11288_s1 + $0xc48] ss:$40 sps:$4 sm:$0xff]   ;;  %v8056_v3 = vld [vmem:[%s11288_s1 + $0x1194] ss:$40 sps:$4 sm:$0xff]  }
 0x1b1   :  { %5051 = vmatprep.subr.bf16.mxu1 %v7987_v4  ;;  %v8059_v4 = vld [vmem:[%s11288_s1 + $0xc9c] ss:$40 sps:$4 sm:$0xff]  }
 0x1b3   :  { %4888 = vmatpush1.bf16.msra.mxu0 %v7982_v6  ;;  %v8054_v6 = vld [vmem:[%s11288_s1 + $0x1190] ss:$40 sps:$4 sm:$0xff]  }
 0x1b4   :  { %5052 = vmatpush1.bf16.msra.mxu1 %v7985_v7  ;;  %4889 = vmatprep.subr.bf16.mxu0 %v7990_v8  ;;  %v8057_v7 = vld [vmem:[%s11288_s1 + $0xc98] ss:$40 sps:$4 sm:$0xff]   ;;  %v8062_v8 = vld [vmem:[%s11288_s1 + $0x11e4] ss:$40 sps:$4 sm:$0xff]  }
 0x1b5   :  { %5053 = vmatprep.subr.bf16.mxu1 %v7993_v9  ;;  %v8065_v9 = vld [vmem:[%s11288_s1 + $0xcec] ss:$40 sps:$4 sm:$0xff]  }
 0x1b7   :  { %4890 = vmatpush1.bf16.msra.mxu0 %v7988_v11  ;;  %v8060_v11 = vld [vmem:[%s11288_s1 + $0x11e0] ss:$40 sps:$4 sm:$0xff]  }
 0x1b8   :  { %5054 = vmatpush1.bf16.msra.mxu1 %v7991_v12  ;;  %4891 = vmatprep.subr.bf16.mxu0 %v7996_v13  ;;  %v8063_v12 = vld [vmem:[%s11288_s1 + $0xce8] ss:$40 sps:$4 sm:$0xff]   ;;  %v8068_v13 = vld [vmem:[%s11288_s1 + $0x1234] ss:$40 sps:$4 sm:$0xff]  }
 0x1b9   :  { %5055 = vmatprep.subr.bf16.mxu1 %v7999_v14  ;;  %v8071_v14 = vld [vmem:[%s11288_s1 + $0xd3c] ss:$40 sps:$4 sm:$0xff]  }
 0x1bb   :  { %4892 = vmatpush1.bf16.msra.mxu0 %v7994_v15  ;;  %v8066_v15 = vld [vmem:[%s11288_s1 + $0x1230] ss:$40 sps:$4 sm:$0xff]  }
 0x1bc   :  { %5056 = vmatpush1.bf16.msra.mxu1 %v7997_v16  ;;  %4893 = vmatprep.subr.bf16.mxu0 %v8002_v17  ;;  %v8069_v16 = vld [vmem:[%s11288_s1 + $0xd38] ss:$40 sps:$4 sm:$0xff]   ;;  %v8074_v17 = vld [vmem:[%s11288_s1 + $0x1284] ss:$40 sps:$4 sm:$0xff]  }
 0x1bd   :  { %5057 = vmatprep.subr.bf16.mxu1 %v8005_v19  ;;  %v8077_v19 = vld [vmem:[%s11288_s1 + $0xd8c] ss:$40 sps:$4 sm:$0xff]  }
 0x1bf   :  { %4894 = vmatpush1.bf16.msra.mxu0 %v8000_v20  ;;  %v8072_v20 = vld [vmem:[%s11288_s1 + $0x1280] ss:$40 sps:$4 sm:$0xff]  }
 0x1c0   :  { %5058 = vmatpush1.bf16.msra.mxu1 %v8003_v21  ;;  %4904 = vmatprep.subr.bf16.mxu0 %v8008_v22  ;;  %v8075_v21 = vld [vmem:[%s11288_s1 + $0xd88] ss:$40 sps:$4 sm:$0xff]   ;;  %v8080_v22 = vld [vmem:[%s11288_s1 + $0x12d4] ss:$40 sps:$4 sm:$0xff]  }
 0x1c1   :  { %5068 = vmatprep.subr.bf16.mxu1 %v8011_v24  ;;  %v8083_v24 = vld [vmem:[%s11288_s1 + $0xddc] ss:$40 sps:$4 sm:$0xff]  }
 0x1c2   :  { %4896 = vmatmul.mubr.bf16.vlgmr.msra.gmra.mrb[4].mxu0 %v9255_v29 }
 0x1c3   :  { %5060 = vmatmul.mubr.bf16.vlgmr.msra.gmra.mrb[8].mxu1 %v9049_v18  ;;  %4905 = vmatpush1.bf16.msra.mxu0 %v8006_v25  ;;  %v8078_v25 = vld [vmem:[%s11288_s1 + $0x12d0] ss:$40 sps:$4 sm:$0xff]  }
 0x1c4   :  { %5069 = vmatpush1.bf16.msra.mxu1 %v8009_v26  ;;  %4906 = vmatprep.subr.bf16.mxu0 %v8014_v27  ;;  %v8081_v26 = vld [vmem:[%s11288_s1 + $0xdd8] ss:$40 sps:$4 sm:$0xff]   ;;  %v8086_v27 = vld [vmem:[%s11288_s1 + $0x1324] ss:$40 sps:$4 sm:$0xff]  }
 0x1c5   :  { %5070 = vmatprep.subr.bf16.mxu1 %v8017_v28  ;;  %4936 = vmatprep.mubr.bf16.mxu0 %v9269_v34  ;;  %v8089_v28 = vld [vmem:[%s11288_s1 + $0xe2c] ss:$40 sps:$4 sm:$0xff]  }
 0x1c6   :  { %5100 = vmatprep.mubr.bf16.mxu1 %v9063_v23 }
 0x1c7   :  { %4907 = vmatpush1.bf16.msra.mxu0 %v8012_v30  ;;  %v8084_v30 = vld [vmem:[%s11288_s1 + $0x1320] ss:$40 sps:$4 sm:$0xff]  }
 0x1c8   :  { %5071 = vmatpush1.bf16.msra.mxu1 %v8015_v31  ;;  %4908 = vmatprep.subr.bf16.mxu0 %v8020_v32  ;;  %v8087_v31 = vld [vmem:[%s11288_s1 + $0xe28] ss:$40 sps:$4 sm:$0xff]   ;;  %v8092_v32 = vld [vmem:[%s11288_s1 + $0x1374] ss:$40 sps:$4 sm:$0xff]  }
 0x1c9   :  { %5072 = vmatprep.subr.bf16.mxu1 %v8023_v33  ;;  %v8095_v33 = vld [vmem:[%s11288_s1 + $0xe7c] ss:$40 sps:$4 sm:$0xff]  }
 0x1cb   :  { %4909 = vmatpush1.bf16.msra.mxu0 %v8018_v35  ;;  %v8090_v35 = vld [vmem:[%s11288_s1 + $0x1370] ss:$40 sps:$4 sm:$0xff]  }
 0x1cc   :  { %5073 = vmatpush1.bf16.msra.mxu1 %v8021_v37  ;;  %4910 = vmatprep.subr.bf16.mxu0 %v8026_v39  ;;  %v8093_v37 = vld [vmem:[%s11288_s1 + $0xe78] ss:$40 sps:$4 sm:$0xff]   ;;  %v8098_v39 = vld [vmem:[%s11288_s1 + $0x13c4] ss:$40 sps:$4 sm:$0xff]  }
 0x1cd   :  { %5074 = vmatprep.subr.bf16.mxu1 %v8029_v40  ;;  %v8101_v40 = vld [vmem:[%s11288_s1 + $0xecc] ss:$40 sps:$4 sm:$0xff]  }
 0x1cf   :  { %4911 = vmatpush1.bf16.msra.mxu0 %v8024_v41  ;;  %v8096_v41 = vld [vmem:[%s11288_s1 + $0x13c0] ss:$40 sps:$4 sm:$0xff]  }
 0x1d0   :  { %5075 = vmatpush1.bf16.msra.mxu1 %v8027_v42  ;;  %4912 = vmatprep.subr.bf16.mxu0 %v8032_v44  ;;  %v8099_v42 = vld [vmem:[%s11288_s1 + $0xec8] ss:$40 sps:$4 sm:$0xff]   ;;  %v8104_v44 = vld [vmem:[%s11288_s1 + $0x1414] ss:$40 sps:$4 sm:$0xff]  }
 0x1d1   :  { %5076 = vmatprep.subr.bf16.mxu1 %v8035_v45  ;;  %v8107_v45 = vld [vmem:[%s11288_s1 + $0xf1c] ss:$40 sps:$4 sm:$0xff]  }
 0x1d3   :  { %4913 = vmatpush1.bf16.msra.mxu0 %v8030_v46  ;;  %v8102_v46 = vld [vmem:[%s11288_s1 + $0x1410] ss:$40 sps:$4 sm:$0xff]  }
 0x1d4   :  { %5077 = vmatpush1.bf16.msra.mxu1 %v8033_v47  ;;  %4914 = vmatprep.subr.bf16.mxu0 %v8038_v48  ;;  %v8105_v47 = vld [vmem:[%s11288_s1 + $0xf18] ss:$40 sps:$4 sm:$0xff]   ;;  %v8110_v48 = vld [vmem:[%s11288_s1 + $0x1464] ss:$40 sps:$4 sm:$0xff]  }
 0x1d5   :  { %5078 = vmatprep.subr.bf16.mxu1 %v8041_v49  ;;  %v4528_v55 = vpop.f32.mrb[0].mxu0  ;;  %v8113_v49 = vld [vmem:[%s11288_s1 + $0xf6c] ss:$40 sps:$4 sm:$0xff]  }
 0x1d6   :  { %v10129_v56 = vadd.f32 %v9522_v2, %v4528_v55  ;;  %v4530_v57 = vpop.f32.mrb[1].mxu0  ;;  %v8050_v2 = vld [vmem:[%s11288_s1 + $0x1144] ss:$40 sps:$4 sm:$0xff]   ;;  %v8114_v55 = vld [vmem:[%s11288_s1 + $0x14b0] ss:$40 sps:$4 sm:$0xff]  }
 0x1d7   :  { %v10132_v58 = vadd.f32 %v9530_v5, %v4530_v57  ;;  %v4532_v59 = vpop.f32.mrb[2].mxu0  ;;  %4915 = vmatpush1.bf16.msra.mxu0 %v8036_v50  ;;  %v8053_v5 = vld [vmem:[%s11288_s1 + $0xc4c] ss:$40 sps:$4 sm:$0xff]   ;;  %v8108_v50 = vld [vmem:[%s11288_s1 + $0x1460] ss:$40 sps:$4 sm:$0xff]  }
 0x1d8   :  { %5079 = vmatpush1.bf16.msra.mxu1 %v8039_v51  ;;  %v4533_v62 = vpop.f32.mrb[3].mxu0  ;;  %4916 = vmatprep.subr.bf16.mxu0 %v8044_v53  ;;  %v8111_v51 = vld [vmem:[%s11288_s1 + $0xf68] ss:$40 sps:$4 sm:$0xff]   ;;  %v8116_v53 = vld [vmem:[%s11288_s1 + $0x14b4] ss:$40 sps:$4 sm:$0xff]  }
 0x1d9   :  { %5080 = vmatprep.subr.bf16.mxu1 %v8047_v54  ;;  %v8119_v54 = vld [vmem:[%s11288_s1 + $0xfbc] ss:$40 sps:$4 sm:$0xff]   ;;  %v8117_v57 = vld [vmem:[%s11288_s1 + $0xfb8] ss:$40 sps:$4 sm:$0xff]   ;;  %v8123_v62 = vld [vmem:[%s11288_s1 + $0x1008] ss:$40 sps:$4 sm:$0xff]  }
 0x1da   :  { %v8122_v59 = vld [vmem:[%s11288_s1 + $0x1504] ss:$40 sps:$4 sm:$0xff]  }
 0x1db   :  { %4917 = vmatpush1.bf16.msra.mxu0 %v8042_v60  ;;  %v8125_v60 = vld [vmem:[%s11288_s1 + $0x100c] ss:$40 sps:$4 sm:$0xff]  }
 0x1dc   :  { %5081 = vmatpush1.bf16.msra.mxu1 %v8045_v61  ;;  %4918 = vmatprep.subr.bf16.mxu0 %v8050_v2  ;;  %v8120_v61 = vld [vmem:[%s11288_s1 + $0x1500] ss:$40 sps:$4 sm:$0xff]   ;;  %v8128_v2 = vld [vmem:[%s11288_s1 + $0x1554] ss:$40 sps:$4 sm:$0xff]  }
 0x1dd   :  { %5082 = vmatprep.subr.bf16.mxu1 %v8053_v5  ;;  %v8131_v5 = vld [vmem:[%s11288_s1 + $0x105c] ss:$40 sps:$4 sm:$0xff]  }
 0x1df   :  { %4919 = vmatpush1.bf16.msra.mxu0 %v8048_v63  ;;  %v8126_v63 = vld [vmem:[%s11288_s1 + $0x1550] ss:$40 sps:$4 sm:$0xff]  }
 0x1e0   :  { %5083 = vmatpush1.bf16.msra.mxu1 %v8051_v0  ;;  %4920 = vmatprep.subr.bf16.mxu0 %v8056_v3  ;;  %v8129_v0 = vld [vmem:[%s11288_s1 + $0x1058] ss:$40 sps:$4 sm:$0xff]   ;;  %v8134_v3 = vld [vmem:[%s11288_s1 + $0x15a4] ss:$40 sps:$4 sm:$0xff]  }
 0x1e1   :  { %5084 = vmatprep.subr.bf16.mxu1 %v8059_v4  ;;  %v8137_v4 = vld [vmem:[%s11288_s1 + $0x10ac] ss:$40 sps:$4 sm:$0xff]  }
 0x1e3   :  { %4921 = vmatpush1.bf16.msra.mxu0 %v8054_v6  ;;  %v8132_v6 = vld [vmem:[%s11288_s1 + $0x15a0] ss:$40 sps:$4 sm:$0xff]  }
 0x1e4   :  { %5085 = vmatpush1.bf16.msra.mxu1 %v8057_v7  ;;  %4922 = vmatprep.subr.bf16.mxu0 %v8062_v8  ;;  %v8135_v7 = vld [vmem:[%s11288_s1 + $0x10a8] ss:$40 sps:$4 sm:$0xff]   ;;  %v8140_v8 = vld [vmem:[%s11288_s1 + $0x15f4] ss:$40 sps:$4 sm:$0xff]  }
 0x1e5   :  { %5086 = vmatprep.subr.bf16.mxu1 %v8065_v9  ;;  %v8143_v9 = vld [vmem:[%s11288_s1 + $0x10fc] ss:$40 sps:$4 sm:$0xff]  }
 0x1e7   :  { %4923 = vmatpush1.bf16.msra.mxu0 %v8060_v11 }
 0x1e8   :  { %5087 = vmatpush1.bf16.msra.mxu1 %v8063_v12  ;;  %4924 = vmatprep.subr.bf16.mxu0 %v8068_v13 }
 0x1e9   :  { %5088 = vmatprep.subr.bf16.mxu1 %v8071_v14  ;;  %v8138_v14 = vld [vmem:[%s11288_s1 + $0x15f0] ss:$40 sps:$4 sm:$0xff]  }
 0x1eb   :  { %4925 = vmatpush1.bf16.msra.mxu0 %v8066_v15  ;;  %v8141_v15 = vld [vmem:[%s11288_s1 + $0x10f8] ss:$40 sps:$4 sm:$0xff]  }
 0x1ec   :  { %5089 = vmatpush1.bf16.msra.mxu1 %v8069_v16  ;;  %4926 = vmatprep.subr.bf16.mxu0 %v8074_v17  ;;  %v8146_v17 = vld [vmem:[%s11288_s1 + $0x1644] ss:$40 sps:$4 sm:$0xff]  }
 0x1ed   :  { %5090 = vmatprep.subr.bf16.mxu1 %v8077_v19  ;;  %v8149_v19 = vld [vmem:[%s11288_s1 + $0x114c] ss:$40 sps:$4 sm:$0xff]  }
 0x1ef   :  { %4927 = vmatpush1.bf16.msra.mxu0 %v8072_v20  ;;  %v8144_v20 = vld [vmem:[%s11288_s1 + $0x1640] ss:$40 sps:$4 sm:$0xff]  }
 0x1f0   :  { %5091 = vmatpush1.bf16.msra.mxu1 %v8075_v21  ;;  %4928 = vmatprep.subr.bf16.mxu0 %v8080_v22  ;;  %v8147_v21 = vld [vmem:[%s11288_s1 + $0x1148] ss:$40 sps:$4 sm:$0xff]   ;;  %v8152_v22 = vld [vmem:[%s11288_s1 + $0x119c] ss:$40 sps:$4 sm:$0xff]  }
 0x1f1   :  { %5092 = vmatprep.subr.bf16.mxu1 %v8083_v24  ;;  %v8155_v24 = vld [vmem:[%s11288_s1 + $0x24] ss:$40 sps:$4 sm:$0xff]  }
 0x1f3   :  { %4929 = vmatpush1.bf16.msra.mxu0 %v8078_v25  ;;  %v8150_v25 = vld [vmem:[%s11288_s1 + $0x1198] ss:$40 sps:$4 sm:$0xff]  }
 0x1f4   :  { %5093 = vmatpush1.bf16.msra.mxu1 %v8081_v26  ;;  %4930 = vmatprep.subr.bf16.mxu0 %v8086_v27  ;;  %v8153_v26 = vld [vmem:[%s11288_s1 + $0x20] ss:$40 sps:$4 sm:$0xff]   ;;  %v8158_v27 = vld [vmem:[%s11288_s1 + $0x11ec] ss:$40 sps:$4 sm:$0xff]  }
 0x1f5   :  { %5094 = vmatprep.subr.bf16.mxu1 %v8089_v28  ;;  %v8161_v28 = vld [vmem:[%s11288_s1 + $0x74] ss:$40 sps:$4 sm:$0xff]  }
 0x1f7   :  { %4931 = vmatpush1.bf16.msra.mxu0 %v8084_v30  ;;  %v8156_v30 = vld [vmem:[%s11288_s1 + $0x11e8] ss:$40 sps:$4 sm:$0xff]  }
 0x1f8   :  { %5095 = vmatpush1.bf16.msra.mxu1 %v8087_v31  ;;  %4932 = vmatprep.subr.bf16.mxu0 %v8092_v32  ;;  %v8159_v31 = vld [vmem:[%s11288_s1 + $0x70] ss:$40 sps:$4 sm:$0xff]   ;;  %v8164_v32 = vld [vmem:[%s11288_s1 + $0x123c] ss:$40 sps:$4 sm:$0xff]  }
 0x1f9   :  { %5096 = vmatprep.subr.bf16.mxu1 %v8095_v33  ;;  %v8167_v33 = vld [vmem:[%s11288_s1 + $0xc4] ss:$40 sps:$4 sm:$0xff]  }
 0x1fb   :  { %4933 = vmatpush1.bf16.msra.mxu0 %v8090_v35  ;;  %v8162_v35 = vld [vmem:[%s11288_s1 + $0x1238] ss:$40 sps:$4 sm:$0xff]  }
 0x1fc   :  { %5097 = vmatpush1.bf16.msra.mxu1 %v8093_v37  ;;  %4934 = vmatprep.subr.bf16.mxu0 %v8098_v39  ;;  %v8165_v37 = vld [vmem:[%s11288_s1 + $0xc0] ss:$40 sps:$4 sm:$0xff]   ;;  %v8170_v39 = vld [vmem:[%s11288_s1 + $0x128c] ss:$40 sps:$4 sm:$0xff]  }
 0x1fd   :  { %5098 = vmatprep.subr.bf16.mxu1 %v8101_v40  ;;  %v8168_v40 = vld [vmem:[%s11288_s1 + $0x1288] ss:$40 sps:$4 sm:$0xff]  }
 0x1ff   :  { %4935 = vmatpush1.bf16.msra.mxu0 %v8096_v41  ;;  %v8171_v41 = vld [vmem:[%s11288_s1 + $0x110] ss:$40 sps:$4 sm:$0xff]  }
 0x200   :  { %5099 = vmatpush1.bf16.msra.mxu1 %v8099_v42  ;;  %4945 = vmatprep.subr.bf16.mxu0 %v8104_v44  ;;  %v8176_v42 = vld [vmem:[%s11288_s1 + $0x12dc] ss:$40 sps:$4 sm:$0xff]  }
 0x201   :  { %5109 = vmatprep.subr.bf16.mxu1 %v8107_v45  ;;  %v8179_v44 = vld [vmem:[%s11288_s1 + $0x164] ss:$40 sps:$4 sm:$0xff]   ;;  %v8174_v45 = vld [vmem:[%s11288_s1 + $0x12d8] ss:$40 sps:$4 sm:$0xff]  }
 0x202   :  { %4937 = vmatmul.mubr.bf16.vlgmr.msra.gmra.mrb[4].mxu0 %v9458_v43 }
 0x203   :  { %5101 = vmatmul.mubr.bf16.vlgmr.msra.gmra.mrb[8].mxu1 %v9255_v29  ;;  %4946 = vmatpush1.bf16.msra.mxu0 %v8102_v46  ;;  %v8177_v46 = vld [vmem:[%s11288_s1 + $0x160] ss:$40 sps:$4 sm:$0xff]  }
 0x204   :  { %5110 = vmatpush1.bf16.msra.mxu1 %v8105_v47  ;;  %4947 = vmatprep.subr.bf16.mxu0 %v8110_v48  ;;  %v8182_v47 = vld [vmem:[%s11288_s1 + $0x132c] ss:$40 sps:$4 sm:$0xff]  }
 0x205   :  { %5111 = vmatprep.subr.bf16.mxu1 %v8113_v49  ;;  %4977 = vmatprep.mubr.bf16.mxu0 %v8574_v1  ;;  %v8185_v48 = vld [vmem:[%s11288_s1 + $0x1b4] ss:$40 sps:$4 sm:$0xff]   ;;  %v8180_v49 = vld [vmem:[%s11288_s1 + $0x1328] ss:$40 sps:$4 sm:$0xff]  }
 0x206   :  { %5141 = vmatprep.mubr.bf16.mxu1 %v9269_v34 }
 0x207   :  { %4948 = vmatpush1.bf16.msra.mxu0 %v8108_v50  ;;  %v8183_v50 = vld [vmem:[%s11288_s1 + $0x1b0] ss:$40 sps:$4 sm:$0xff]  }
 0x208   :  { %5112 = vmatpush1.bf16.msra.mxu1 %v8111_v51  ;;  %4949 = vmatprep.subr.bf16.mxu0 %v8116_v53  ;;  %v8188_v51 = vld [vmem:[%s11288_s1 + $0x137c] ss:$40 sps:$4 sm:$0xff]  }
 0x209   :  { %5113 = vmatprep.subr.bf16.mxu1 %v8119_v54  ;;  %v8191_v53 = vld [vmem:[%s11288_s1 + $0x204] ss:$40 sps:$4 sm:$0xff]   ;;  %v8186_v54 = vld [vmem:[%s11288_s1 + $0x1378] ss:$40 sps:$4 sm:$0xff]  }
 0x20b   :  { %4950 = vmatpush1.bf16.msra.mxu0 %v8114_v55  ;;  %v8189_v55 = vld [vmem:[%s11288_s1 + $0x200] ss:$40 sps:$4 sm:$0xff]  }
 0x20c   :  { %5114 = vmatpush1.bf16.msra.mxu1 %v8117_v57  ;;  %4951 = vmatprep.subr.bf16.mxu0 %v8122_v59  ;;  %v8194_v57 = vld [vmem:[%s11288_s1 + $0x13cc] ss:$40 sps:$4 sm:$0xff]  }
 0x20d   :  { %5115 = vmatprep.subr.bf16.mxu1 %v8125_v60  ;;  %v8197_v59 = vld [vmem:[%s11288_s1 + $0x254] ss:$40 sps:$4 sm:$0xff]   ;;  %v8192_v60 = vld [vmem:[%s11288_s1 + $0x13c8] ss:$40 sps:$4 sm:$0xff]  }
 0x20f   :  { %4952 = vmatpush1.bf16.msra.mxu0 %v8120_v61  ;;  %v8195_v61 = vld [vmem:[%s11288_s1 + $0x250] ss:$40 sps:$4 sm:$0xff]  }
 0x210   :  { %5116 = vmatpush1.bf16.msra.mxu1 %v8123_v62  ;;  %4953 = vmatprep.subr.bf16.mxu0 %v8128_v2  ;;  %v8200_v62 = vld [vmem:[%s11288_s1 + $0x141c] ss:$40 sps:$4 sm:$0xff]  }
 0x211   :  { %5117 = vmatprep.subr.bf16.mxu1 %v8131_v5  ;;  %v8203_v2 = vld [vmem:[%s11288_s1 + $0x2a4] ss:$40 sps:$4 sm:$0xff]   ;;  %v8198_v5 = vld [vmem:[%s11288_s1 + $0x1418] ss:$40 sps:$4 sm:$0xff]  }
 0x213   :  { %4954 = vmatpush1.bf16.msra.mxu0 %v8126_v63  ;;  %v8201_v63 = vld [vmem:[%s11288_s1 + $0x2a0] ss:$40 sps:$4 sm:$0xff]  }
 0x214   :  { %5118 = vmatpush1.bf16.msra.mxu1 %v8129_v0  ;;  %4955 = vmatprep.subr.bf16.mxu0 %v8134_v3  ;;  %v8206_v0 = vld [vmem:[%s11288_s1 + $0x146c] ss:$40 sps:$4 sm:$0xff]  }
 0x215   :  { %5119 = vmatprep.subr.bf16.mxu1 %v8137_v4  ;;  %v8209_v3 = vld [vmem:[%s11288_s1 + $0x2f4] ss:$40 sps:$4 sm:$0xff]   ;;  %v8204_v4 = vld [vmem:[%s11288_s1 + $0x1468] ss:$40 sps:$4 sm:$0xff]  }
 0x216   :  { %v10330_v11 = vpop.f32.mrb[4].mxu1 }
 0x217   :  { %v10332_v12 = vpop.f32.mrb[5].mxu1  ;;  %4956 = vmatpush1.bf16.msra.mxu0 %v8132_v6  ;;  %v8207_v6 = vld [vmem:[%s11288_s1 + $0x2f0] ss:$40 sps:$4 sm:$0xff]  }
 0x218   :  { %v4778_v13 = vpop.f32.mrb[6].mxu1  ;;  %5120 = vmatpush1.bf16.msra.mxu1 %v8135_v7  ;;  %4957 = vmatprep.subr.bf16.mxu0 %v8140_v8  ;;  %v8212_v7 = vld [vmem:[%s11288_s1 + $0x14bc] ss:$40 sps:$4 sm:$0xff]  }
 0x219   :  { %v4779_v16 = vpop.f32.mrb[7].mxu1  ;;  %5121 = vmatprep.subr.bf16.mxu1 %v8143_v9  ;;  %v8215_v8 = vld [vmem:[%s11288_s1 + $0x344] ss:$40 sps:$4 sm:$0xff]   ;;  %v8210_v9 = vld [vmem:[%s11288_s1 + $0x14b8] ss:$40 sps:$4 sm:$0xff]  }
 0x21a   :  { %v8213_v13 = vld [vmem:[%s11288_s1 + $0x340] ss:$40 sps:$4 sm:$0xff]  }
 0x21b   :  { %4958 = vmatpush1.bf16.msra.mxu0 %v8138_v14  ;;  %v8218_v14 = vld [vmem:[%s11288_s1 + $0x150c] ss:$40 sps:$4 sm:$0xff]   ;;  %v8216_v16 = vld [vmem:[%s11288_s1 + $0x1508] ss:$40 sps:$4 sm:$0xff]  }
 0x21c   :  { %5122 = vmatpush1.bf16.msra.mxu1 %v8141_v15  ;;  %4959 = vmatprep.subr.bf16.mxu0 %v8146_v17  ;;  %v8221_v15 = vld [vmem:[%s11288_s1 + $0x394] ss:$40 sps:$4 sm:$0xff]   ;;  %v8219_v17 = vld [vmem:[%s11288_s1 + $0x390] ss:$40 sps:$4 sm:$0xff]  }
 0x21d   :  { %5123 = vmatprep.subr.bf16.mxu1 %v8149_v19  ;;  %v8224_v19 = vld [vmem:[%s11288_s1 + $0x155c] ss:$40 sps:$4 sm:$0xff]  }
 0x21f   :  { %4960 = vmatpush1.bf16.msra.mxu0 %v8144_v20  ;;  %v8227_v20 = vld [vmem:[%s11288_s1 + $0x3e4] ss:$40 sps:$4 sm:$0xff]  }
 0x220   :  { %5124 = vmatpush1.bf16.msra.mxu1 %v8147_v21  ;;  %5191 = vmatprep.subr.bf16.mxu0 %v8155_v24  ;;  %v8222_v21 = vld [vmem:[%s11288_s1 + $0x1558] ss:$40 sps:$4 sm:$0xff]   ;;  %v8230_v24 = vld [vmem:[%s11288_s1 + $0x15ac] ss:$40 sps:$4 sm:$0xff]  }
 0x221   :  { %5125 = vmatprep.subr.bf16.mxu1 %v8152_v22  ;;  %v8225_v22 = vld [vmem:[%s11288_s1 + $0x3e0] ss:$40 sps:$4 sm:$0xff]  }
 0x222   :  { %4978 = vmatmul.mubr.bf16.vlgmr.msra.gmra.mrb[4].mxu0 %v8737_v38 }
 0x223   :  { %5192 = vmatpush1.bf16.msra.mxu0 %v8153_v26  ;;  %5223 = vmatprep.mubr.bf16.mxu0 %v8779_v52  ;;  %v8173_v52 = vld [vmem:[%s11288_s1 + $0x114] ss:$40 sps:$4 sm:$0xff]   ;;  %v8228_v26 = vld [vmem:[%s11288_s1 + $0x15a8] ss:$40 sps:$4 sm:$0xff]  }
 0x224   :  { %5126 = vmatpush1.bf16.msra.mxu1 %v8150_v25  ;;  %5193 = vmatprep.subr.bf16.mxu0 %v8161_v28  ;;  %v8233_v25 = vld [vmem:[%s11288_s1 + $0x434] ss:$40 sps:$4 sm:$0xff]  }
 0x225   :  { %5127 = vmatprep.subr.bf16.mxu1 %v8158_v27  ;;  %v8231_v27 = vld [vmem:[%s11288_s1 + $0x430] ss:$40 sps:$4 sm:$0xff]   ;;  %v8236_v28 = vld [vmem:[%s11288_s1 + $0x15fc] ss:$40 sps:$4 sm:$0xff]  }
 0x227   :  { %5194 = vmatpush1.bf16.msra.mxu0 %v8159_v31  ;;  %v8234_v31 = vld [vmem:[%s11288_s1 + $0x15f8] ss:$40 sps:$4 sm:$0xff]  }
 0x228   :  { %5128 = vmatpush1.bf16.msra.mxu1 %v8156_v30  ;;  %5195 = vmatprep.subr.bf16.mxu0 %v8167_v33  ;;  %v8239_v30 = vld [vmem:[%s11288_s1 + $0x484] ss:$40 sps:$4 sm:$0xff]  }
 0x229   :  { %5129 = vmatprep.subr.bf16.mxu1 %v8164_v32  ;;  %v8237_v32 = vld [vmem:[%s11288_s1 + $0x480] ss:$40 sps:$4 sm:$0xff]   ;;  %v8242_v33 = vld [vmem:[%s11288_s1 + $0x164c] ss:$40 sps:$4 sm:$0xff]  }
 0x22b   :  { %5196 = vmatpush1.bf16.msra.mxu0 %v8165_v37  ;;  %v8240_v37 = vld [vmem:[%s11288_s1 + $0x1648] ss:$40 sps:$4 sm:$0xff]  }
 0x22c   :  { %5130 = vmatpush1.bf16.msra.mxu1 %v8162_v35  ;;  %5197 = vmatprep.subr.bf16.mxu0 %v8173_v52  ;;  %v8245_v35 = vld [vmem:[%s11288_s1 + $0x4d4] ss:$40 sps:$4 sm:$0xff]   ;;  %v8248_v52 = vld [vmem:[%s11288_s1 + $0x524] ss:$40 sps:$4 sm:$0xff]  }
 0x22d   :  { %5131 = vmatprep.subr.bf16.mxu1 %v8170_v39  ;;  %v8243_v39 = vld [vmem:[%s11288_s1 + $0x4d0] ss:$40 sps:$4 sm:$0xff]  }
 0x22f   :  { %5198 = vmatpush1.bf16.msra.mxu0 %v8171_v41  ;;  %v8251_v41 = vld [vmem:[%s11288_s1 + $0x574] ss:$40 sps:$4 sm:$0xff]  }
 0x230   :  { %5132 = vmatpush1.bf16.msra.mxu1 %v8168_v40  ;;  %5199 = vmatprep.subr.bf16.mxu0 %v8179_v44  ;;  %v8246_v40 = vld [vmem:[%s11288_s1 + $0x520] ss:$40 sps:$4 sm:$0xff]   ;;  %v8254_v44 = vld [vmem:[%s11288_s1 + $0x5c4] ss:$40 sps:$4 sm:$0xff]  }
 0x231   :  { %5133 = vmatprep.subr.bf16.mxu1 %v8176_v42  ;;  %v8249_v42 = vld [vmem:[%s11288_s1 + $0x570] ss:$40 sps:$4 sm:$0xff]  }
 0x233   :  { %5200 = vmatpush1.bf16.msra.mxu0 %v8177_v46  ;;  %v8260_v46 = vld [vmem:[%s11288_s1 + $0x664] ss:$40 sps:$4 sm:$0xff]  }
 0x234   :  { %5134 = vmatpush1.bf16.msra.mxu1 %v8174_v45  ;;  %5201 = vmatprep.subr.bf16.mxu0 %v8185_v48  ;;  %v8252_v45 = vld [vmem:[%s11288_s1 + $0x5c0] ss:$40 sps:$4 sm:$0xff]   ;;  %v8263_v48 = vld [vmem:[%s11288_s1 + $0x6b4] ss:$40 sps:$4 sm:$0xff]  }
 0x235   :  { %5135 = vmatprep.subr.bf16.mxu1 %v8182_v47  ;;  %v8258_v47 = vld [vmem:[%s11288_s1 + $0x660] ss:$40 sps:$4 sm:$0xff]  }
 0x237   :  { %5202 = vmatpush1.bf16.msra.mxu0 %v8183_v50  ;;  %v8266_v50 = vld [vmem:[%s11288_s1 + $0x704] ss:$40 sps:$4 sm:$0xff]  }
 0x238   :  { %5136 = vmatpush1.bf16.msra.mxu1 %v8180_v49  ;;  %5203 = vmatprep.subr.bf16.mxu0 %v8191_v53  ;;  %v8261_v49 = vld [vmem:[%s11288_s1 + $0x6b0] ss:$40 sps:$4 sm:$0xff]   ;;  %v8269_v53 = vld [vmem:[%s11288_s1 + $0x754] ss:$40 sps:$4 sm:$0xff]  }
 0x239   :  { %5137 = vmatprep.subr.bf16.mxu1 %v8188_v51  ;;  %v8264_v51 = vld [vmem:[%s11288_s1 + $0x700] ss:$40 sps:$4 sm:$0xff]  }
 0x23b   :  { %5204 = vmatpush1.bf16.msra.mxu0 %v8189_v55  ;;  %v8272_v55 = vld [vmem:[%s11288_s1 + $0x7a4] ss:$40 sps:$4 sm:$0xff]  }
 0x23c   :  { %5138 = vmatpush1.bf16.msra.mxu1 %v8186_v54  ;;  %5205 = vmatprep.subr.bf16.mxu0 %v8197_v59  ;;  %v8267_v54 = vld [vmem:[%s11288_s1 + $0x750] ss:$40 sps:$4 sm:$0xff]   ;;  %v8368_v59 = vld [vmem:[%s11290_s3 + $0x4] ss:$8 sps:$4 sm:$0xff]  }
 0x23d   :  { %5139 = vmatprep.subr.bf16.mxu1 %v8194_v57  ;;  %v8366_v57 = vld [vmem:[%s11290_s3] ss:$8 sps:$4 sm:$0xff]  }
 0x23f   :  { %5206 = vmatpush1.bf16.msra.mxu0 %v8195_v61  ;;  %v8275_v61 = vld [vmem:[%s11288_s1 + $0x7f4] ss:$40 sps:$4 sm:$0xff]  }
 0x240   :  { %5140 = vmatpush1.bf16.msra.mxu1 %v8192_v60  ;;  %5207 = vmatprep.subr.bf16.mxu0 %v8203_v2  ;;  %v8270_v60 = vld [vmem:[%s11288_s1 + $0x7a0] ss:$40 sps:$4 sm:$0xff]   ;;  %v8372_v2 = vld [vmem:[%s11290_s3 + $0x10] ss:$8 sps:$4 sm:$0xff]  }
 0x241   :  { %5150 = vmatprep.subr.bf16.mxu1 %v8200_v62  ;;  %v8374_v62 = vld [vmem:[%s11290_s3 + $0x14] ss:$8 sps:$4 sm:$0xff]  }
 0x243   :  { %5142 = vmatmul.mubr.bf16.vlgmr.msra.gmra.mrb[8].mxu1 %v9458_v43  ;;  %5208 = vmatpush1.bf16.msra.mxu0 %v8201_v63  ;;  %v8278_v63 = vld [vmem:[%s11288_s1 + $0x844] ss:$40 sps:$4 sm:$0xff]  }
 0x244   :  { %5151 = vmatpush1.bf16.msra.mxu1 %v8198_v5  ;;  %5209 = vmatprep.subr.bf16.mxu0 %v8209_v3  ;;  %v8273_v5 = vld [vmem:[%s11288_s1 + $0x7f0] ss:$40 sps:$4 sm:$0xff]   ;;  %v8378_v3 = vld [vmem:[%s11290_s3 + $0x20] ss:$8 sps:$4 sm:$0xff]  }
 0x245   :  { %5152 = vmatprep.subr.bf16.mxu1 %v8206_v0  ;;  %5182 = vmatprep.mubr.bf16.mxu1 %v8574_v1  ;;  %v8380_v0 = vld [vmem:[%s11290_s3 + $0x24] ss:$8 sps:$4 sm:$0xff]  }
 0x247   :  { %5210 = vmatpush1.bf16.msra.mxu0 %v8207_v6  ;;  %v8281_v6 = vld [vmem:[%s11288_s1 + $0x894] ss:$40 sps:$4 sm:$0xff]  }
 0x248   :  { %5153 = vmatpush1.bf16.msra.mxu1 %v8204_v4  ;;  %5211 = vmatprep.subr.bf16.mxu0 %v8215_v8  ;;  %v8276_v4 = vld [vmem:[%s11288_s1 + $0x840] ss:$40 sps:$4 sm:$0xff]   ;;  %v8384_v8 = vld [vmem:[%s11290_s3 + $0x30] ss:$8 sps:$4 sm:$0xff]  }
 0x249   :  { %5154 = vmatprep.subr.bf16.mxu1 %v8212_v7  ;;  %v8386_v7 = vld [vmem:[%s11290_s3 + $0x34] ss:$8 sps:$4 sm:$0xff]  }
 0x24b   :  { %5212 = vmatpush1.bf16.msra.mxu0 %v8213_v13  ;;  %v8284_v13 = vld [vmem:[%s11288_s1 + $0x8e4] ss:$40 sps:$4 sm:$0xff]  }
 0x24c   :  { %5155 = vmatpush1.bf16.msra.mxu1 %v8210_v9  ;;  %5213 = vmatprep.subr.bf16.mxu0 %v8221_v15  ;;  %v8279_v9 = vld [vmem:[%s11288_s1 + $0x890] ss:$40 sps:$4 sm:$0xff]   ;;  %v8390_v15 = vld [vmem:[%s11290_s3 + $0x40] ss:$8 sps:$4 sm:$0xff]  }
 0x24d   :  { %5156 = vmatprep.subr.bf16.mxu1 %v8218_v14  ;;  %v8392_v14 = vld [vmem:[%s11290_s3 + $0x44] ss:$8 sps:$4 sm:$0xff]  }
 0x24f   :  { %5214 = vmatpush1.bf16.msra.mxu0 %v8219_v17  ;;  %v8287_v17 = vld [vmem:[%s11288_s1 + $0x934] ss:$40 sps:$4 sm:$0xff]  }
 0x250   :  { %5157 = vmatpush1.bf16.msra.mxu1 %v8216_v16  ;;  %5215 = vmatprep.subr.bf16.mxu0 %v8227_v20  ;;  %v8282_v16 = vld [vmem:[%s11288_s1 + $0x8e0] ss:$40 sps:$4 sm:$0xff]   ;;  %v8396_v20 = vld [vmem:[%s11290_s3 + $0x50] ss:$8 sps:$4 sm:$0xff]  }
 0x251   :  { %5158 = vmatprep.subr.bf16.mxu1 %v8224_v19  ;;  %v8398_v19 = vld [vmem:[%s11290_s3 + $0x54] ss:$8 sps:$4 sm:$0xff]  }
 0x253   :  { %5216 = vmatpush1.bf16.msra.mxu0 %v8225_v22  ;;  %v8290_v22 = vld [vmem:[%s11288_s1 + $0x984] ss:$40 sps:$4 sm:$0xff]  }
 0x254   :  { %5159 = vmatpush1.bf16.msra.mxu1 %v8222_v21  ;;  %5217 = vmatprep.subr.bf16.mxu0 %v8233_v25  ;;  %v8285_v21 = vld [vmem:[%s11288_s1 + $0x930] ss:$40 sps:$4 sm:$0xff]   ;;  %v8402_v25 = vld [vmem:[%s11290_s3 + $0x60] ss:$8 sps:$4 sm:$0xff]  }
 0x255   :  { %5160 = vmatprep.subr.bf16.mxu1 %v8230_v24  ;;  %v8404_v24 = vld [vmem:[%s11290_s3 + $0x64] ss:$8 sps:$4 sm:$0xff]  }
 0x257   :  { %5218 = vmatpush1.bf16.msra.mxu0 %v8231_v27  ;;  %v8293_v27 = vld [vmem:[%s11288_s1 + $0x9d4] ss:$40 sps:$4 sm:$0xff]  }
 0x258   :  { %5161 = vmatpush1.bf16.msra.mxu1 %v8228_v26  ;;  %5219 = vmatprep.subr.bf16.mxu0 %v8239_v30  ;;  %v8288_v26 = vld [vmem:[%s11288_s1 + $0x980] ss:$40 sps:$4 sm:$0xff]   ;;  %v8408_v30 = vld [vmem:[%s11290_s3 + $0x70] ss:$8 sps:$4 sm:$0xff]  }
 0x259   :  { %5162 = vmatprep.subr.bf16.mxu1 %v8236_v28  ;;  %v8410_v28 = vld [vmem:[%s11290_s3 + $0x74] ss:$8 sps:$4 sm:$0xff]  }
 0x25b   :  { %5220 = vmatpush1.bf16.msra.mxu0 %v8237_v32  ;;  %v8296_v32 = vld [vmem:[%s11288_s1 + $0xa24] ss:$40 sps:$4 sm:$0xff]  }
 0x25c   :  { %5163 = vmatpush1.bf16.msra.mxu1 %v8234_v31  ;;  %5221 = vmatprep.subr.bf16.mxu0 %v8245_v35  ;;  %v8291_v31 = vld [vmem:[%s11288_s1 + $0x9d0] ss:$40 sps:$4 sm:$0xff]   ;;  %v8414_v35 = vld [vmem:[%s11290_s3 + $0x80] ss:$8 sps:$4 sm:$0xff]  }
 0x25d   :  { %5164 = vmatprep.subr.bf16.mxu1 %v8242_v33  ;;  %v8416_v33 = vld [vmem:[%s11290_s3 + $0x84] ss:$8 sps:$4 sm:$0xff]  }
 0x25f   :  { %5222 = vmatpush1.bf16.msra.mxu0 %v8243_v39  ;;  %v8299_v39 = vld [vmem:[%s11288_s1 + $0xa74] ss:$40 sps:$4 sm:$0xff]  }
 0x260   :  { %5165 = vmatpush1.bf16.msra.mxu1 %v8240_v37  ;;  %5232 = vmatprep.subr.bf16.mxu0 %v8248_v52  ;;  %v8294_v37 = vld [vmem:[%s11288_s1 + $0xa20] ss:$40 sps:$4 sm:$0xff]   ;;  %v8422_v52 = vld [vmem:[%s11290_s3 + $0x94] ss:$8 sps:$4 sm:$0xff]  }
 0x261   :  { %5923 = vmatprep.subr.bf16.mxu1 %v8368_v59  ;;  %v8452_v59 = vld [vmem:[%s11290_s3 + $0xe4] ss:$8 sps:$4 sm:$0xff]  }
 0x262   :  { %5224 = vmatmul.mubr.bf16.vlgmr.msra.gmra.mrb[8].mxu0 %v8843_v10  ;;  %v8257_v10 = vld [vmem:[%s11288_s1 + $0x614] ss:$40 sps:$4 sm:$0xff]  }
 0x263   :  { %5183 = vmatmul.mubr.bf16.vlgmr.msra.gmra.mrb[8].mxu1 %v8737_v38  ;;  %5233 = vmatpush1.bf16.msra.mxu0 %v8246_v40  ;;  %v8420_v40 = vld [vmem:[%s11290_s3 + $0x90] ss:$8 sps:$4 sm:$0xff]  }
 0x264   :  { %5264 = vmatprep.mubr.bf16.mxu0 %v8921_v36  ;;  %5234 = vmatprep.subr.bf16.mxu0 %v8251_v41  ;;  %v8255_v36 = vld [vmem:[%s11288_s1 + $0x610] ss:$40 sps:$4 sm:$0xff]  }
 0x265   :  { %5924 = vmatpush1.bf16.msra.mxu1 %v8366_v57  ;;  %v8297_v41 = vld [vmem:[%s11288_s1 + $0xa70] ss:$40 sps:$4 sm:$0xff]   ;;  %v8314_v57 = vld [vmem:[%s11288_s1 + $0xc04] ss:$40 sps:$4 sm:$0xff]  }
 0x266   :  { %5925 = vmatprep.subr.bf16.mxu1 %v8374_v62  ;;  %v8317_v62 = vld [vmem:[%s11288_s1 + $0xc54] ss:$40 sps:$4 sm:$0xff]  }
 0x267   :  { %5235 = vmatpush1.bf16.msra.mxu0 %v8249_v42  ;;  %v8302_v42 = vld [vmem:[%s11288_s1 + $0xac4] ss:$40 sps:$4 sm:$0xff]  }
 0x268   :  { %5236 = vmatprep.subr.bf16.mxu0 %v8254_v44  ;;  %v8426_v44 = vld [vmem:[%s11290_s3 + $0xa0] ss:$8 sps:$4 sm:$0xff]  }
 0x269   :  { %5926 = vmatpush1.bf16.msra.mxu1 %v8372_v2  ;;  %v8458_v2 = vld [vmem:[%s11290_s3 + $0xf4] ss:$8 sps:$4 sm:$0xff]  }
 0x26a   :  { %5927 = vmatprep.subr.bf16.mxu1 %v8380_v0  ;;  %v8320_v0 = vld [vmem:[%s11288_s1 + $0xca4] ss:$40 sps:$4 sm:$0xff]  }
 0x26b   :  { %5237 = vmatpush1.bf16.msra.mxu0 %v8252_v45  ;;  %v8300_v45 = vld [vmem:[%s11288_s1 + $0xac0] ss:$40 sps:$4 sm:$0xff]  }
 0x26c   :  { %5238 = vmatprep.subr.bf16.mxu0 %v8257_v10  ;;  %v8434_v10 = vld [vmem:[%s11290_s3 + $0xb4] ss:$8 sps:$4 sm:$0xff]  }
 0x26d   :  { %5928 = vmatpush1.bf16.msra.mxu1 %v8378_v3  ;;  %v8318_v3 = vld [vmem:[%s11288_s1 + $0xca0] ss:$40 sps:$4 sm:$0xff]  }
 0x26e   :  { %5929 = vmatprep.subr.bf16.mxu1 %v8386_v7  ;;  %v8321_v7 = vld [vmem:[%s11288_s1 + $0xcf0] ss:$40 sps:$4 sm:$0xff]  }
 0x26f   :  { %5239 = vmatpush1.bf16.msra.mxu0 %v8255_v36  ;;  %v8432_v36 = vld [vmem:[%s11290_s3 + $0xb0] ss:$8 sps:$4 sm:$0xff]  }
 0x270   :  { %5240 = vmatprep.subr.bf16.mxu0 %v8260_v46  ;;  %v8303_v46 = vld [vmem:[%s11288_s1 + $0xb10] ss:$40 sps:$4 sm:$0xff]  }
 0x271   :  { %5930 = vmatpush1.bf16.msra.mxu1 %v8384_v8  ;;  %v8326_v8 = vld [vmem:[%s11288_s1 + $0xd44] ss:$40 sps:$4 sm:$0xff]  }
 0x272   :  { %5931 = vmatprep.subr.bf16.mxu1 %v8392_v14  ;;  %v8327_v14 = vld [vmem:[%s11288_s1 + $0xd90] ss:$40 sps:$4 sm:$0xff]  }
 0x273   :  { %5241 = vmatpush1.bf16.msra.mxu0 %v8258_v47  ;;  %v8308_v47 = vld [vmem:[%s11288_s1 + $0xb64] ss:$40 sps:$4 sm:$0xff]  }
 0x274   :  { %5242 = vmatprep.subr.bf16.mxu0 %v8263_v48  ;;  %v8440_v48 = vld [vmem:[%s11290_s3 + $0xc4] ss:$8 sps:$4 sm:$0xff]  }
 0x275   :  { %5932 = vmatpush1.bf16.msra.mxu1 %v8390_v15  ;;  %v8332_v15 = vld [vmem:[%s11288_s1 + $0xde4] ss:$40 sps:$4 sm:$0xff]  }
 0x276   :  { %5933 = vmatprep.subr.bf16.mxu1 %v8398_v19  ;;  %v8333_v19 = vld [vmem:[%s11288_s1 + $0xe30] ss:$40 sps:$4 sm:$0xff]  }
 0x277   :  { %5243 = vmatpush1.bf16.msra.mxu0 %v8261_v49  ;;  %v8438_v49 = vld [vmem:[%s11290_s3 + $0xc0] ss:$8 sps:$4 sm:$0xff]  }
 0x278   :  { %5244 = vmatprep.subr.bf16.mxu0 %v8266_v50  ;;  %v8306_v50 = vld [vmem:[%s11288_s1 + $0xb60] ss:$40 sps:$4 sm:$0xff]  }
 0x279   :  { %5934 = vmatpush1.bf16.msra.mxu1 %v8396_v20  ;;  %v8338_v20 = vld [vmem:[%s11288_s1 + $0xe84] ss:$40 sps:$4 sm:$0xff]  }
 0x27a   :  { %5935 = vmatprep.subr.bf16.mxu1 %v8404_v24  ;;  %v8339_v24 = vld [vmem:[%s11288_s1 + $0xed0] ss:$40 sps:$4 sm:$0xff]  }
 0x27b   :  { %5245 = vmatpush1.bf16.msra.mxu0 %v8264_v51  ;;  %v8311_v51 = vld [vmem:[%s11288_s1 + $0xbb4] ss:$40 sps:$4 sm:$0xff]  }
 0x27c   :  { %5246 = vmatprep.subr.bf16.mxu0 %v8269_v53  ;;  %v8446_v53 = vld [vmem:[%s11290_s3 + $0xd4] ss:$8 sps:$4 sm:$0xff]  }
 0x27d   :  { %5936 = vmatpush1.bf16.msra.mxu1 %v8402_v25  ;;  %v8344_v25 = vld [vmem:[%s11288_s1 + $0xf24] ss:$40 sps:$4 sm:$0xff]  }
 0x27e   :  { %5937 = vmatprep.subr.bf16.mxu1 %v8410_v28  ;;  %v8345_v28 = vld [vmem:[%s11288_s1 + $0xf70] ss:$40 sps:$4 sm:$0xff]  }
 0x27f   :  { %5247 = vmatpush1.bf16.msra.mxu0 %v8267_v54  ;;  %v8444_v54 = vld [vmem:[%s11290_s3 + $0xd0] ss:$8 sps:$4 sm:$0xff]  }
 0x280   :  { %5248 = vmatprep.subr.bf16.mxu0 %v8272_v55  ;;  %v8309_v55 = vld [vmem:[%s11288_s1 + $0xbb0] ss:$40 sps:$4 sm:$0xff]  }
 0x281   :  { %5938 = vmatpush1.bf16.msra.mxu1 %v8408_v30  ;;  %v8350_v30 = vld [vmem:[%s11288_s1 + $0xfc4] ss:$40 sps:$4 sm:$0xff]  }
 0x282   :  { %5939 = vmatprep.subr.bf16.mxu1 %v8416_v33  ;;  %v8354_v33 = vld [vmem:[%s11288_s1 + $0x1060] ss:$40 sps:$4 sm:$0xff]  }
 0x283   :  { %5249 = vmatpush1.bf16.msra.mxu0 %v8270_v60  ;;  %v8450_v60 = vld [vmem:[%s11290_s3 + $0xe0] ss:$8 sps:$4 sm:$0xff]  }
 0x284   :  { %5250 = vmatprep.subr.bf16.mxu0 %v8275_v61  ;;  %v8312_v61 = vld [vmem:[%s11288_s1 + $0xc00] ss:$40 sps:$4 sm:$0xff]  }
 0x285   :  { %5940 = vmatpush1.bf16.msra.mxu1 %v8414_v35  ;;  %v8359_v35 = vld [vmem:[%s11288_s1 + $0x10b4] ss:$40 sps:$4 sm:$0xff]  }
 0x286   :  { %5941 = vmatprep.subr.bf16.mxu1 %v8422_v52 }
 0x287   :  { %5251 = vmatpush1.bf16.msra.mxu0 %v8273_v5  ;;  %v8456_v5 = vld [vmem:[%s11290_s3 + $0xf0] ss:$8 sps:$4 sm:$0xff]  }
 0x288   :  { %5252 = vmatprep.subr.bf16.mxu0 %v8278_v63  ;;  %v8315_v63 = vld [vmem:[%s11288_s1 + $0xc50] ss:$40 sps:$4 sm:$0xff]  }
 0x289   :  { %5942 = vmatpush1.bf16.msra.mxu1 %v8420_v40 }
 0x28b   :  { %5253 = vmatpush1.bf16.msra.mxu0 %v8276_v4  ;;  %v8323_v4 = vld [vmem:[%s11288_s1 + $0xcf4] ss:$40 sps:$4 sm:$0xff]  }
 0x28c   :  { %5254 = vmatprep.subr.bf16.mxu0 %v8281_v6  ;;  %v8464_v6 = vld [vmem:[%s11290_s3 + $0x104] ss:$8 sps:$4 sm:$0xff]  }
 0x28f   :  { %5255 = vmatpush1.bf16.msra.mxu0 %v8279_v9  ;;  %v8324_v9 = vld [vmem:[%s11288_s1 + $0xd40] ss:$40 sps:$4 sm:$0xff]  }
 0x290   :  { %5256 = vmatprep.subr.bf16.mxu0 %v8284_v13  ;;  %v8329_v13 = vld [vmem:[%s11288_s1 + $0xd94] ss:$40 sps:$4 sm:$0xff]  }
 0x293   :  { %5257 = vmatpush1.bf16.msra.mxu0 %v8282_v16  ;;  %v8330_v16 = vld [vmem:[%s11288_s1 + $0xde0] ss:$40 sps:$4 sm:$0xff]  }
 0x294   :  { %5258 = vmatprep.subr.bf16.mxu0 %v8287_v17  ;;  %v8335_v17 = vld [vmem:[%s11288_s1 + $0xe34] ss:$40 sps:$4 sm:$0xff]  }
 0x297   :  { %5259 = vmatpush1.bf16.msra.mxu0 %v8285_v21  ;;  %v8336_v21 = vld [vmem:[%s11288_s1 + $0xe80] ss:$40 sps:$4 sm:$0xff]  }
 0x298   :  { %5260 = vmatprep.subr.bf16.mxu0 %v8290_v22  ;;  %v8341_v22 = vld [vmem:[%s11288_s1 + $0xed4] ss:$40 sps:$4 sm:$0xff]  }
 0x29b   :  { %5261 = vmatpush1.bf16.msra.mxu0 %v8288_v26  ;;  %v8342_v26 = vld [vmem:[%s11288_s1 + $0xf20] ss:$40 sps:$4 sm:$0xff]  }
 0x29c   :  { %5262 = vmatprep.subr.bf16.mxu0 %v8293_v27  ;;  %v8347_v27 = vld [vmem:[%s11288_s1 + $0xf74] ss:$40 sps:$4 sm:$0xff]  }
 0x29f   :  { %5263 = vmatpush1.bf16.msra.mxu0 %v8291_v31  ;;  %v8348_v31 = vld [vmem:[%s11288_s1 + $0xfc0] ss:$40 sps:$4 sm:$0xff]  }
 0x2a0   :  { %5273 = vmatprep.subr.bf16.mxu0 %v8296_v32  ;;  %v8356_v32 = vld [vmem:[%s11288_s1 + $0x1064] ss:$40 sps:$4 sm:$0xff]  }
 0x2a2   :  { %5265 = vmatmul.mubr.bf16.vlgmr.msra.gmra.mrb[8].mxu0 %v9049_v18  ;;  %v8428_v18 = vld [vmem:[%s11290_s3 + $0xa4] ss:$8 sps:$4 sm:$0xff]  }
 0x2a3   :  { %5274 = vmatpush1.bf16.msra.mxu0 %v8294_v37  ;;  %5305 = vmatprep.mubr.bf16.mxu0 %v9063_v23  ;;  %v8305_v23 = vld [vmem:[%s11288_s1 + $0xb14] ss:$40 sps:$4 sm:$0xff]   ;;  %v8357_v37 = vld [vmem:[%s11288_s1 + $0x10b0] ss:$40 sps:$4 sm:$0xff]  }
 0x2a4   :  { %5275 = vmatprep.subr.bf16.mxu0 %v8299_v39  ;;  %5943 = vmatprep.subr.bf16.mxu1 %v8428_v18  ;;  %v8362_v39 = vld [vmem:[%s11288_s1 + $0x1104] ss:$40 sps:$4 sm:$0xff]   ;;  %v8360_v18 = vld [vmem:[%s11288_s1 + $0x1100] ss:$40 sps:$4 sm:$0xff]  }
 0x2a5   :  { %5944 = vmatpush1.bf16.msra.mxu1 %v8426_v44 }
 0x2a6   :  { %5945 = vmatprep.subr.bf16.mxu1 %v8434_v10  ;;  %v8371_v10 = vld [vmem:[%s11288_s1 + $0x11a4] ss:$40 sps:$4 sm:$0xff]  }
 0x2a7   :  { %5276 = vmatpush1.bf16.msra.mxu0 %v8297_v41 }
 0x2a8   :  { %5277 = vmatprep.subr.bf16.mxu0 %v8302_v42 }
 0x2a9   :  { %5946 = vmatpush1.bf16.msra.mxu1 %v8432_v36  ;;  %v8369_v36 = vld [vmem:[%s11288_s1 + $0x11a0] ss:$40 sps:$4 sm:$0xff]  }
 0x2aa   :  { %5947 = vmatprep.subr.bf16.mxu1 %v8440_v48  ;;  %v8383_v48 = vld [vmem:[%s11288_s1 + $0x1244] ss:$40 sps:$4 sm:$0xff]  }
 0x2ab   :  { %5278 = vmatpush1.bf16.msra.mxu0 %v8300_v45  ;;  %v8365_v45 = vld [vmem:[%s11288_s1 + $0x1154] ss:$40 sps:$4 sm:$0xff]  }
 0x2ac   :  { %5279 = vmatprep.subr.bf16.mxu0 %v8305_v23  ;;  %v8363_v23 = vld [vmem:[%s11288_s1 + $0x1150] ss:$40 sps:$4 sm:$0xff]  }
 0x2ad   :  { %5948 = vmatpush1.bf16.msra.mxu1 %v8438_v49  ;;  %v8381_v49 = vld [vmem:[%s11288_s1 + $0x1240] ss:$40 sps:$4 sm:$0xff]  }
 0x2ae   :  { %5949 = vmatprep.subr.bf16.mxu1 %v8446_v53  ;;  %v8395_v53 = vld [vmem:[%s11288_s1 + $0x12e4] ss:$40 sps:$4 sm:$0xff]  }
 0x2af   :  { %5280 = vmatpush1.bf16.msra.mxu0 %v8303_v46  ;;  %v8377_v46 = vld [vmem:[%s11288_s1 + $0x11f4] ss:$40 sps:$4 sm:$0xff]  }
 0x2b0   :  { %5281 = vmatprep.subr.bf16.mxu0 %v8308_v47  ;;  %v8375_v47 = vld [vmem:[%s11288_s1 + $0x11f0] ss:$40 sps:$4 sm:$0xff]  }
 0x2b1   :  { %5950 = vmatpush1.bf16.msra.mxu1 %v8444_v54  ;;  %v8393_v54 = vld [vmem:[%s11288_s1 + $0x12e0] ss:$40 sps:$4 sm:$0xff]  }
 0x2b2   :  { %5951 = vmatprep.subr.bf16.mxu1 %v8452_v59  ;;  %v8407_v59 = vld [vmem:[%s11288_s1 + $0x1384] ss:$40 sps:$4 sm:$0xff]  }
 0x2b3   :  { %5282 = vmatpush1.bf16.msra.mxu0 %v8306_v50  ;;  %v8389_v50 = vld [vmem:[%s11288_s1 + $0x1294] ss:$40 sps:$4 sm:$0xff]  }
 0x2b4   :  { %5283 = vmatprep.subr.bf16.mxu0 %v8311_v51  ;;  %v8387_v51 = vld [vmem:[%s11288_s1 + $0x1290] ss:$40 sps:$4 sm:$0xff]  }
 0x2b5   :  { %5952 = vmatpush1.bf16.msra.mxu1 %v8450_v60  ;;  %v8405_v60 = vld [vmem:[%s11288_s1 + $0x1380] ss:$40 sps:$4 sm:$0xff]  }
 0x2b6   :  { %5953 = vmatprep.subr.bf16.mxu1 %v8458_v2  ;;  %v8419_v2 = vld [vmem:[%s11288_s1 + $0x1424] ss:$40 sps:$4 sm:$0xff]  }
 0x2b7   :  { %5284 = vmatpush1.bf16.msra.mxu0 %v8309_v55  ;;  %v8401_v55 = vld [vmem:[%s11288_s1 + $0x1334] ss:$40 sps:$4 sm:$0xff]  }
 0x2b8   :  { %5285 = vmatprep.subr.bf16.mxu0 %v8314_v57  ;;  %v8399_v57 = vld [vmem:[%s11288_s1 + $0x1330] ss:$40 sps:$4 sm:$0xff]  }
 0x2b9   :  { %5954 = vmatpush1.bf16.msra.mxu1 %v8456_v5  ;;  %v8417_v5 = vld [vmem:[%s11288_s1 + $0x1420] ss:$40 sps:$4 sm:$0xff]  }
 0x2ba   :  { %5964 = vmatprep.subr.bf16.mxu1 %v8464_v6  ;;  %v8429_v6 = vld [vmem:[%s11288_s1 + $0x14c0] ss:$40 sps:$4 sm:$0xff]  }
 0x2bb   :  { %5286 = vmatpush1.bf16.msra.mxu0 %v8312_v61  ;;  %v8413_v61 = vld [vmem:[%s11288_s1 + $0x13d4] ss:$40 sps:$4 sm:$0xff]  }
 0x2bc   :  { %5287 = vmatprep.subr.bf16.mxu0 %v8317_v62  ;;  %v8411_v62 = vld [vmem:[%s11288_s1 + $0x13d0] ss:$40 sps:$4 sm:$0xff]  }
 0x2bf   :  { %5288 = vmatpush1.bf16.msra.mxu0 %v8315_v63  ;;  %v8425_v63 = vld [vmem:[%s11288_s1 + $0x1474] ss:$40 sps:$4 sm:$0xff]  }
 0x2c0   :  { %5289 = vmatprep.subr.bf16.mxu0 %v8320_v0  ;;  %v8423_v0 = vld [vmem:[%s11288_s1 + $0x1470] ss:$40 sps:$4 sm:$0xff]  }
 0x2c3   :  { %5290 = vmatpush1.bf16.msra.mxu0 %v8318_v3  ;;  %v8431_v3 = vld [vmem:[%s11288_s1 + $0x14c4] ss:$40 sps:$4 sm:$0xff]  }
 0x2c4   :  { %5291 = vmatprep.subr.bf16.mxu0 %v8323_v4  ;;  %v5403_v4 = vlaneseq }
 0x2c7   :  { %5292 = vmatpush1.bf16.msra.mxu0 %v8321_v7  ;;  %v10971_v7 = vshrl.u32 %v5403_v4, 7  ;;  %v8507_v4 = vld [vmem:[%s11290_s3 + $0x1f0] ss:$8 sps:$4 sm:$0xff]  }
 0x2c8   :  { %5293 = vmatprep.subr.bf16.mxu0 %v8326_v8  ;;  %v8435_v8 = vld [vmem:[%s11288_s1 + $0x1510] ss:$40 sps:$4 sm:$0xff]  }
 0x2cb   :  { %5294 = vmatpush1.bf16.msra.mxu0 %v8324_v9  ;;  %v8443_v9 = vld [vmem:[%s11288_s1 + $0x1564] ss:$40 sps:$4 sm:$0xff]  }
 0x2cc   :  { %5295 = vmatprep.subr.bf16.mxu0 %v8329_v13  ;;  %v5405_v13 = vsub.s32 0, %v10971_v7 }
 0x2cf   :  { %5296 = vmatpush1.bf16.msra.mxu0 %v8327_v14  ;;  %v10983_v14 = vld [vmem:[%s11291_s2] sm:$0x1f] }
 0x2d0   :  { %5297 = vmatprep.subr.bf16.mxu0 %v8332_v15  ;;  %v8441_v15 = vld [vmem:[%s11288_s1 + $0x1560] ss:$40 sps:$4 sm:$0xff]  }
 0x2d3   :  { %5298 = vmatpush1.bf16.msra.mxu0 %v8330_v16  ;;  %v5409_v16 = vsub.s32 1, %v10971_v7 }
 0x2d4   :  { %5299 = vmatprep.subr.bf16.mxu0 %v8335_v17  ;;  %v8449_v17 = vld [vmem:[%s11288_s1 + $0x15b4] ss:$40 sps:$4 sm:$0xff]  }
 0x2d7   :  { %5300 = vmatpush1.bf16.msra.mxu0 %v8333_v19  ;;  %v5406_v19 = vrot.slane %v10983_v14, %v5405_v13 }
 0x2d8   :  { %5301 = vmatprep.subr.bf16.mxu0 %v8338_v20  ;;  %v8447_v20 = vld [vmem:[%s11288_s1 + $0x15b0] ss:$40 sps:$4 sm:$0xff]  }
 0x2db   :  { %5302 = vmatpush1.bf16.msra.mxu0 %v8336_v21  ;;  %v5410_v21 = vrot.slane %v10983_v14, %v5409_v16 }
 0x2dc   :  { %5303 = vmatprep.subr.bf16.mxu0 %v8341_v22  ;;  %v8455_v22 = vld [vmem:[%s11288_s1 + $0x1604] ss:$40 sps:$4 sm:$0xff]  }
 0x2df   :  { %5304 = vmatpush1.bf16.msra.mxu0 %v8339_v24 }
 0x2e0   :  { %5314 = vmatprep.subr.bf16.mxu0 %v8344_v25 }
 0x2e2   :  { %5306 = vmatmul.mubr.bf16.vlgmr.msra.gmra.mrb[8].mxu0 %v9255_v29  ;;  %v8353_v29 = vld [vmem:[%s11288_s1 + $0x1014] ss:$40 sps:$4 sm:$0xff]  }
 0x2e3   :  { %5315 = vmatpush1.bf16.msra.mxu0 %v8342_v26  ;;  %5346 = vmatprep.mubr.bf16.mxu0 %v9269_v34  ;;  %v8351_v34 = vld [vmem:[%s11288_s1 + $0x1010] ss:$40 sps:$4 sm:$0xff]  }
 0x2e4   :  { %5316 = vmatprep.subr.bf16.mxu0 %v8347_v27 }
 0x2e7   :  { %5317 = vmatpush1.bf16.msra.mxu0 %v8345_v28 }
 0x2e8   :  { %5318 = vmatprep.subr.bf16.mxu0 %v8350_v30 }
 0x2eb   :  { %5319 = vmatpush1.bf16.msra.mxu0 %v8348_v31  ;;  %v8453_v31 = vld [vmem:[%s11288_s1 + $0x1600] ss:$40 sps:$4 sm:$0xff]  }
 0x2ec   :  { %5320 = vmatprep.subr.bf16.mxu0 %v8353_v29 }
 0x2ef   :  { %5321 = vmatpush1.bf16.msra.mxu0 %v8351_v34 }
 0x2f0   :  { %5322 = vmatprep.subr.bf16.mxu0 %v8356_v32 }
 0x2f3   :  { %5323 = vmatpush1.bf16.msra.mxu0 %v8354_v33  ;;  %v8459_v33 = vld [vmem:[%s11288_s1 + $0x1650] ss:$40 sps:$4 sm:$0xff]  }
 0x2f4   :  { %5324 = vmatprep.subr.bf16.mxu0 %v8359_v35 }
 0x2f5   :  { %v10885_v52 = vpop.f32.mrb[4].mxu0 }
 0x2f6   :  { %v10887_v40 = vpop.f32.mrb[5].mxu0 }
 0x2f7   :  { %v5396_v41 = vmax.f32 %v10129_v56, %v10887_v40  ;;  %v4983_v42 = vpop.f32.mrb[6].mxu0  ;;  %5325 = vmatpush1.bf16.msra.mxu0 %v8357_v37  ;;  %v8461_v56 = vld [vmem:[%s11288_s1 + $0x1654] ss:$40 sps:$4 sm:$0xff]   ;;  %v8462_v37 = vld [vmem:[%s11290_s3 + $0x100] ss:$8 sps:$4 sm:$0xff]  }
 0x2f8   :  { %v4984_v44 = vpop.f32.mrb[7].mxu0  ;;  %5326 = vmatprep.subr.bf16.mxu0 %v8362_v39  ;;  %v8467_v40 = vld [vmem:[%s11290_s3 + $0x114] ss:$8 sps:$4 sm:$0xff]   ;;  %v8470_v42 = vld [vmem:[%s11290_s3 + $0x124] ss:$8 sps:$4 sm:$0xff]  }
 0x2f9   :  { %v5428_v24 = vadd.f32 %v5406_v19, %v5396_v41  ;;  %v8465_v41 = vld [vmem:[%s11290_s3 + $0x110] ss:$8 sps:$4 sm:$0xff]   ;;  %v8473_v44 = vld [vmem:[%s11290_s3 + $0x134] ss:$8 sps:$4 sm:$0xff]  }
 0x2fb   :  { %5327 = vmatpush1.bf16.msra.mxu0 %v8360_v18  ;;  %v5433_v32 = vmax.f32 %v5428_v24, 0.0  ;;  %v8468_v18 = vld [vmem:[%s11290_s3 + $0x120] ss:$8 sps:$4 sm:$0xff]  }
 0x2fc   :  { %5328 = vmatprep.subr.bf16.mxu0 %v8365_v45  ;;  %v8471_v45 = vld [vmem:[%s11290_s3 + $0x130] ss:$8 sps:$4 sm:$0xff]  }
 0x2fd   :  { %v5438_v39 = vpack.c.bf16 %v5433_v32, %v5433_v32  ;;  %v8519_v32 = vld [vmem:[%s11290_s3 + $0x230] ss:$8 sps:$4 sm:$0xff]  }
 0x2ff   :  { %5329 = vmatpush1.bf16.msra.mxu0 %v8363_v23  ;;  %v8474_v23 = vld [vmem:[%s11290_s3 + $0x140] ss:$8 sps:$4 sm:$0xff]  }
 0x300   :  { %5330 = vmatprep.subr.bf16.mxu0 %v8371_v10  ;;  %v8479_v10 = vld [vmem:[%s11290_s3 + $0x154] ss:$8 sps:$4 sm:$0xff]  }
 0x303   :  { %5331 = vmatpush1.bf16.msra.mxu0 %v8369_v36  ;;  %v8477_v36 = vld [vmem:[%s11290_s3 + $0x150] ss:$8 sps:$4 sm:$0xff]  }
 0x304   :  { %5332 = vmatprep.subr.bf16.mxu0 %v8377_v46  ;;  %v8482_v46 = vld [vmem:[%s11290_s3 + $0x164] ss:$8 sps:$4 sm:$0xff]  }
 0x307   :  { %5333 = vmatpush1.bf16.msra.mxu0 %v8375_v47  ;;  %v8480_v47 = vld [vmem:[%s11290_s3 + $0x160] ss:$8 sps:$4 sm:$0xff]  }
 0x308   :  { %5334 = vmatprep.subr.bf16.mxu0 %v8383_v48  ;;  %v8485_v48 = vld [vmem:[%s11290_s3 + $0x174] ss:$8 sps:$4 sm:$0xff]  }
 0x30b   :  { %5335 = vmatpush1.bf16.msra.mxu0 %v8381_v49  ;;  %v8483_v49 = vld [vmem:[%s11290_s3 + $0x170] ss:$8 sps:$4 sm:$0xff]  }
 0x30c   :  { %5336 = vmatprep.subr.bf16.mxu0 %v8389_v50  ;;  %v8488_v50 = vld [vmem:[%s11290_s3 + $0x184] ss:$8 sps:$4 sm:$0xff]  }
 0x30f   :  { %5337 = vmatpush1.bf16.msra.mxu0 %v8387_v51  ;;  %v8486_v51 = vld [vmem:[%s11290_s3 + $0x180] ss:$8 sps:$4 sm:$0xff]  }
 0x310   :  { %5338 = vmatprep.subr.bf16.mxu0 %v8395_v53  ;;  %v8491_v53 = vld [vmem:[%s11290_s3 + $0x194] ss:$8 sps:$4 sm:$0xff]  }
 0x313   :  { %5339 = vmatpush1.bf16.msra.mxu0 %v8393_v54  ;;  %v8489_v54 = vld [vmem:[%s11290_s3 + $0x190] ss:$8 sps:$4 sm:$0xff]  }
 0x314   :  { %5340 = vmatprep.subr.bf16.mxu0 %v8401_v55  ;;  %v8494_v55 = vld [vmem:[%s11290_s3 + $0x1a4] ss:$8 sps:$4 sm:$0xff]  }
 0x317   :  { %5341 = vmatpush1.bf16.msra.mxu0 %v8399_v57  ;;  %v8492_v57 = vld [vmem:[%s11290_s3 + $0x1a0] ss:$8 sps:$4 sm:$0xff]  }
 0x318   :  { %5342 = vmatprep.subr.bf16.mxu0 %v8407_v59  ;;  %v8497_v59 = vld [vmem:[%s11290_s3 + $0x1b4] ss:$8 sps:$4 sm:$0xff]  }
 0x31b   :  { %5343 = vmatpush1.bf16.msra.mxu0 %v8405_v60  ;;  %v8495_v60 = vld [vmem:[%s11290_s3 + $0x1b0] ss:$8 sps:$4 sm:$0xff]  }
 0x31c   :  { %5344 = vmatprep.subr.bf16.mxu0 %v8413_v61  ;;  %v8500_v61 = vld [vmem:[%s11290_s3 + $0x1c4] ss:$8 sps:$4 sm:$0xff]  }
 0x31f   :  { %5345 = vmatpush1.bf16.msra.mxu0 %v8411_v62  ;;  %v8498_v62 = vld [vmem:[%s11290_s3 + $0x1c0] ss:$8 sps:$4 sm:$0xff]  }
 0x320   :  { %5355 = vmatprep.subr.bf16.mxu0 %v8419_v2  ;;  %v8503_v2 = vld [vmem:[%s11290_s3 + $0x1d4] ss:$8 sps:$4 sm:$0xff]  }
 0x322   :  { %5347 = vmatmul.mubr.bf16.vlgmr.msra.gmra.mrb[8].mxu0 %v9458_v43  ;;  %v8437_v43 = vld [vmem:[%s11288_s1 + $0x1514] ss:$40 sps:$4 sm:$0xff]  }
 0x323   :  { %5356 = vmatpush1.bf16.msra.mxu0 %v8417_v5  ;;  %5387 = vmatprep.mubr.bf16.mxu0 %v8574_v1  ;;  %v8501_v5 = vld [vmem:[%s11290_s3 + $0x1d0] ss:$8 sps:$4 sm:$0xff]  }
 0x324   :  { %5357 = vmatprep.subr.bf16.mxu0 %v8425_v63  ;;  %v8506_v63 = vld [vmem:[%s11290_s3 + $0x1e4] ss:$8 sps:$4 sm:$0xff]  }
 0x327   :  { %5358 = vmatpush1.bf16.msra.mxu0 %v8423_v0  ;;  %v8504_v0 = vld [vmem:[%s11290_s3 + $0x1e0] ss:$8 sps:$4 sm:$0xff]  }
 0x328   :  { %5359 = vmatprep.subr.bf16.mxu0 %v8431_v3  ;;  %v8509_v3 = vld [vmem:[%s11290_s3 + $0x1f4] ss:$8 sps:$4 sm:$0xff]  }
 0x32b   :  { %5360 = vmatpush1.bf16.msra.mxu0 %v8429_v6  ;;  %v8512_v6 = vld [vmem:[%s11290_s3 + $0x204] ss:$8 sps:$4 sm:$0xff]  }
 0x32c   :  { %5361 = vmatprep.subr.bf16.mxu0 %v8437_v43  ;;  %v5413_v43 = vsub.s32 2, %v10971_v7 }
 0x32f   :  { %5362 = vmatpush1.bf16.msra.mxu0 %v8435_v8  ;;  %v5417_v8 = vsub.s32 3, %v10971_v7 }
 0x330   :  { %5363 = vmatprep.subr.bf16.mxu0 %v8443_v9  ;;  %v5414_v9 = vrot.slane %v10983_v14, %v5413_v43  ;;  %v8559_v43 = vld [vmem:[%s11293_s7] sm:$0xff]  }
 0x333   :  { %5364 = vmatpush1.bf16.msra.mxu0 %v8441_v15  ;;  %v5418_v15 = vrot.slane %v10983_v14, %v5417_v8 }
 0x334   :  { %5365 = vmatprep.subr.bf16.mxu0 %v8449_v17 }
 0x336   :  { %v5184_v25 = vpop.f32.mrb[8].mxu1 }
 0x337   :  { %v5397_v26 = vmax.f32 %v10132_v58, %v5184_v25  ;;  %v11008_v27 = vpop.f32.mrb[9].mxu1  ;;  %5366 = vmatpush1.bf16.msra.mxu0 %v8447_v20 }
 0x338   :  { %v5398_v28 = vmax.f32 %v10330_v11, %v11008_v27  ;;  %v5188_v30 = vpop.f32.mrb[10].mxu1  ;;  %5367 = vmatprep.subr.bf16.mxu0 %v8455_v22  ;;  %v8515_v11 = vld [vmem:[%s11290_s3 + $0x214] ss:$8 sps:$4 sm:$0xff]   ;;  %v8516_v27 = vld [vmem:[%s11290_s3 + $0x220] ss:$8 sps:$4 sm:$0xff]  }
 0x339   :  { %v5429_v29 = vadd.f32 %v5410_v21, %v5397_v26  ;;  %v5189_v34 = vpop.f32.mrb[11].mxu1 }
 0x33a   :  { %v5430_v17 = vadd.f32 %v5414_v9, %v5398_v28  ;;  %v8510_v34 = vld [vmem:[%s11290_s3 + $0x200] ss:$8 sps:$4 sm:$0xff]   ;;  %v8521_v28 = vld [vmem:[%s11290_s3 + $0x234] ss:$8 sps:$4 sm:$0xff]  }
 0x33b   :  { %v5434_v58 = vmax.f32 %v5429_v29, 0.0  ;;  %5368 = vmatpush1.bf16.msra.mxu0 %v8453_v31  ;;  %v8560_v9 = vld [vmem:[%s11293_s7 + $0x48] sm:$0xff]  }
 0x33c   :  { %5369 = vmatprep.subr.bf16.mxu0 %v8461_v56  ;;  %v5435_v30 = vmax.f32 %v5430_v17, 0.0  ;;  %v8562_v17 = vld [vmem:[%s11293_s7 + $0x50] sm:$0xff]  }
 0x33d   :  { %v5439_v35 = vpack.c.bf16 %v5434_v58, %v5434_v58  ;;  %v8524_v58 = vld [vmem:[%s11290_s3 + $0x244] ss:$8 sps:$4 sm:$0xff]  }
 0x33e   :  { %v5440_v56 = vpack.c.bf16 %v5435_v30, %v5435_v30  ;;  %v8570_v30 = vld [vmem:[%s11293_s7 + $0x70] sm:$0xff]  }
 0x33f   :  { %5955 = vmatprep.mubr.bf16.mxu1 %v5439_v35  ;;  %5370 = vmatpush1.bf16.msra.mxu0 %v8459_v33  ;;  %v8522_v33 = vld [vmem:[%s11290_s3 + $0x240] ss:$8 sps:$4 sm:$0xff]   ;;  %v5421_v35 = vsub.s32 4, %v10971_v7 }
 0x340   :  { %5956 = vmatmul.mubr.bf16.vlgmr.msra.gmra.mrb[12].mxu1 %v5438_v39  ;;  %v8525_v39 = vld [vmem:[%s11290_s3 + $0x250] ss:$8 sps:$4 sm:$0xff]  }
 0x341   :  { %5965 = vmatpush1.bf16.msra.mxu1 %v8462_v37  ;;  %v8527_v37 = vld [vmem:[%s11290_s3 + $0x254] ss:$8 sps:$4 sm:$0xff]  }
 0x342   :  { %5966 = vmatprep.subr.bf16.mxu1 %v8467_v40  ;;  %5388 = vmatmul.mubr.bf16.vlgmr.msra.gmra.mrb[8].mxu0 %v8737_v38  ;;  %v8476_v38 = vld [vmem:[%s11290_s3 + $0x144] ss:$8 sps:$4 sm:$0xff]   ;;  %v5422_v40 = vrot.slane %v10983_v14, %v5421_v35  ;;  %v8531_v14 = vld [vmem:[%s11290_s3 + $0x270] ss:$8 sps:$4 sm:$0xff]  }
 0x345   :  { %5967 = vmatpush1.bf16.msra.mxu1 %v8465_v41  ;;  %v8530_v41 = vld [vmem:[%s11290_s3 + $0x264] ss:$8 sps:$4 sm:$0xff]  }
 0x346   :  { %5968 = vmatprep.subr.bf16.mxu1 %v8470_v42  ;;  %v8528_v42 = vld [vmem:[%s11290_s3 + $0x260] ss:$8 sps:$4 sm:$0xff]  }
 0x349   :  { %5969 = vmatpush1.bf16.msra.mxu1 %v8468_v18 }
 0x34a   :  { %5970 = vmatprep.subr.bf16.mxu1 %v8473_v44  ;;  %v8533_v44 = vld [vmem:[%s11290_s3 + $0x274] ss:$8 sps:$4 sm:$0xff]  }
 0x34d   :  { %5971 = vmatpush1.bf16.msra.mxu1 %v8471_v45 }
 0x34e   :  { %5972 = vmatprep.subr.bf16.mxu1 %v8476_v38  ;;  %v8536_v38 = vld [vmem:[%s11292_s5 + $0x4] ss:$8 sps:$4 sm:$0xff]  }
 0x351   :  { %5973 = vmatpush1.bf16.msra.mxu1 %v8474_v23  ;;  %v8534_v23 = vld [vmem:[%s11292_s5] ss:$8 sps:$4 sm:$0xff]  }
 0x352   :  { %5974 = vmatprep.subr.bf16.mxu1 %v8479_v10 }
 0x355   :  { %5975 = vmatpush1.bf16.msra.mxu1 %v8477_v36  ;;  %v8539_v36 = vld [vmem:[%s11292_s5 + $0x14] ss:$8 sps:$4 sm:$0xff]  }
 0x356   :  { %5976 = vmatprep.subr.bf16.mxu1 %v8482_v46  ;;  %v8537_v46 = vld [vmem:[%s11292_s5 + $0x10] ss:$8 sps:$4 sm:$0xff]  }
 0x359   :  { %5977 = vmatpush1.bf16.msra.mxu1 %v8480_v47  ;;  %v8542_v47 = vld [vmem:[%s11292_s5 + $0x24] ss:$8 sps:$4 sm:$0xff]  }
 0x35a   :  { %5978 = vmatprep.subr.bf16.mxu1 %v8485_v48  ;;  %v8540_v48 = vld [vmem:[%s11292_s5 + $0x20] ss:$8 sps:$4 sm:$0xff]  }
 0x35d   :  { %5979 = vmatpush1.bf16.msra.mxu1 %v8483_v49  ;;  %v8545_v49 = vld [vmem:[%s11292_s5 + $0x34] ss:$8 sps:$4 sm:$0xff]  }
 0x35e   :  { %5980 = vmatprep.subr.bf16.mxu1 %v8488_v50  ;;  %v8548_v50 = vld [vmem:[%s11292_s5 + $0x44] ss:$8 sps:$4 sm:$0xff]  }
 0x361   :  { %5981 = vmatpush1.bf16.msra.mxu1 %v8486_v51  ;;  %v8546_v51 = vld [vmem:[%s11292_s5 + $0x40] ss:$8 sps:$4 sm:$0xff]  }
 0x362   :  { %5982 = vmatprep.subr.bf16.mxu1 %v8491_v53  ;;  %v8551_v53 = vld [vmem:[%s11292_s5 + $0x54] ss:$8 sps:$4 sm:$0xff]  }
 0x365   :  { %5983 = vmatpush1.bf16.msra.mxu1 %v8489_v54  ;;  %v8549_v54 = vld [vmem:[%s11292_s5 + $0x50] ss:$8 sps:$4 sm:$0xff]  }
 0x366   :  { %5984 = vmatprep.subr.bf16.mxu1 %v8494_v55  ;;  %v8554_v55 = vld [vmem:[%s11292_s5 + $0x64] ss:$8 sps:$4 sm:$0xff]  }
 0x369   :  { %5985 = vmatpush1.bf16.msra.mxu1 %v8492_v57  ;;  %v8552_v57 = vld [vmem:[%s11292_s5 + $0x60] ss:$8 sps:$4 sm:$0xff]  }
 0x36a   :  { %5986 = vmatprep.subr.bf16.mxu1 %v8497_v59  ;;  %v8557_v59 = vld [vmem:[%s11292_s5 + $0x74] ss:$8 sps:$4 sm:$0xff]  }
 0x36d   :  { %5987 = vmatpush1.bf16.msra.mxu1 %v8495_v60  ;;  %v8555_v60 = vld [vmem:[%s11292_s5 + $0x70] ss:$8 sps:$4 sm:$0xff]  }
 0x36e   :  { %5988 = vmatprep.subr.bf16.mxu1 %v8500_v61  ;;  %v8558_v61 = vld [vmem:[%s11293_s7 + $0x40] sm:$0xff]  }
 0x371   :  { %5989 = vmatpush1.bf16.msra.mxu1 %v8498_v62 }
 0x372   :  { %5990 = vmatprep.subr.bf16.mxu1 %v8503_v2 }
 0x375   :  { %5991 = vmatpush1.bf16.msra.mxu1 %v8501_v5  ;;  %v7191_v5 = vld [vmem:[%s11294_s4] ss:$0 sm:$0xff] }
 0x376   :  { %5992 = vmatprep.subr.bf16.mxu1 %v8506_v63 }
 0x379   :  { %5993 = vmatpush1.bf16.msra.mxu1 %v8504_v0 }
 0x37a   :  { %5994 = vmatprep.subr.bf16.mxu1 %v8509_v3 }
 0x37d   :  { %5995 = vmatpush1.bf16.msra.mxu1 %v8507_v4 }
 0x37e   :  { %6005 = vmatprep.subr.bf16.mxu1 %v8512_v6 }
 0x415   :  { %v5389_v19 = vpop.f32.mrb[8].mxu0 }
 0x416   :  { %v5399_v20 = vmax.f32 %v10332_v12, %v5389_v19  ;;  %v5391_v21 = vpop.f32.mrb[9].mxu0  ;;  %v8513_v12 = vld [vmem:[%s11290_s3 + $0x210] ss:$8 sps:$4 sm:$0xff]  }
 0x417   :  { %v5400_v22 = vmax.f32 %v10885_v52, %v5391_v21  ;;  %v5393_v24 = vpop.f32.mrb[10].mxu0  ;;  %v8518_v52 = vld [vmem:[%s11290_s3 + $0x224] ss:$8 sps:$4 sm:$0xff]   ;;  %v8563_v19 = vld [vmem:[%s11293_s7 + $0x10] sm:$0xff]   ;;  %v8565_v21 = vld [vmem:[%s11293_s7 + $0x18] sm:$0xff]  }
 0x418   :  { %v5431_v25 = vadd.f32 %v5418_v15, %v5399_v20  ;;  %v5394_v26 = vpop.f32.mrb[11].mxu0  ;;  %v8561_v15 = vld [vmem:[%s11293_s7 + $0x8] sm:$0xff]   ;;  %v8564_v20 = vld [vmem:[%s11293_s7 + $0x58] sm:$0xff]   ;;  %v8567_v24 = vld [vmem:[%s11293_s7 + $0x20] sm:$0xff]  }
 0x419   :  { %v5432_v18 = vadd.f32 %v5422_v40, %v5400_v22  ;;  %v8566_v22 = vld [vmem:[%s11293_s7 + $0x60] sm:$0xff]   ;;  %v8569_v26 = vld [vmem:[%s11293_s7 + $0x28] sm:$0xff]  }
 0x41a   :  { %v5436_v31 = vmax.f32 %v5431_v25, 0.0  ;;  %v8568_v25 = vld [vmem:[%s11293_s7 + $0x68] sm:$0xff]  }
 0x41b   :  { %v5437_v45 = vmax.f32 %v5432_v18, 0.0 }
 0x41c   :  { %v5441_v29 = vpack.c.bf16 %v5436_v31, %v5436_v31  ;;  %v8571_v31 = vld [vmem:[%s11293_s7 + $0x30] sm:$0xff]  }
 0x41d   :  { %v5442_v10 = vpack.c.bf16 %v5437_v45, %v5437_v45 }
 0x41e   :  { %5996 = vmatprep.mubr.bf16.mxu1 %v5441_v29  ;;  %v8572_v29 = vld [vmem:[%s11293_s7 + $0x78] sm:$0xff]  }
 0x41f   :  { %5997 = vmatmul.mubr.bf16.vlgmr.msra.gmra.mrb[12].mxu1 %v5440_v56  ;;  %v6073_v56 = vld [vmem:[%s11295_s6] sm:$0x3] }
 0x420   :  { %6006 = vmatpush1.bf16.msra.mxu1 %v8510_v34  ;;  %6037 = vmatprep.mubr.bf16.mxu1 %v8574_v1  ;;  %v8573_v34 = vld [vmem:[%s11293_s7 + $0x38] sm:$0xff]  }
 0x421   :  { %6007 = vmatprep.subr.bf16.mxu1 %v8515_v11  ;;  %v6078_v11 = vrot.slane %v6073_v56, %v5405_v13  ;;  %v7208_v13 = vld [vmem:[%s11296_s8] ss:$0 sm:$0xff] }
 0x424   :  { %6008 = vmatpush1.bf16.msra.mxu1 %v8513_v12  ;;  %v6082_v12 = vrot.slane %v6073_v56, %v5409_v16 }
 0x425   :  { %6009 = vmatprep.subr.bf16.mxu1 %v8518_v52 }
 0x428   :  { %6010 = vmatpush1.bf16.msra.mxu1 %v8516_v27 }
 0x429   :  { %6011 = vmatprep.subr.bf16.mxu1 %v8521_v28 }
 0x42c   :  { %6012 = vmatpush1.bf16.msra.mxu1 %v8519_v32 }
 0x42d   :  { %6013 = vmatprep.subr.bf16.mxu1 %v8524_v58 }
 0x430   :  { %6014 = vmatpush1.bf16.msra.mxu1 %v8522_v33 }
 0x431   :  { %6015 = vmatprep.subr.bf16.mxu1 %v8527_v37 }
 0x434   :  { %6016 = vmatpush1.bf16.msra.mxu1 %v8525_v39 }
 0x435   :  { %6017 = vmatprep.subr.bf16.mxu1 %v8530_v41 }
 0x438   :  { %6018 = vmatpush1.bf16.msra.mxu1 %v8528_v42 }
 0x439   :  { %6019 = vmatprep.subr.bf16.mxu1 %v8533_v44 }
 0x43c   :  { %6020 = vmatpush1.bf16.msra.mxu1 %v8531_v14 }
 0x43d   :  { %6165 = vmatprep.subr.bf16.mxu1 %v8536_v38 }
 0x43f   :  { %6038 = vmatmul.mubr.bf16.vlgmr.msra.gmra.mrb[12].mxu1 %v5442_v10 }
 0x440   :  { %6166 = vmatpush1.bf16.msra.mxu1 %v8534_v23  ;;  %6197 = vmatprep.mubr.bf16.mxu1 %v8574_v1  ;;  %v8543_v1 = vld [vmem:[%s11292_s5 + $0x30] ss:$8 sps:$4 sm:$0xff]  }
 0x441   :  { %6167 = vmatprep.subr.bf16.mxu1 %v8539_v36 }
 0x444   :  { %6168 = vmatpush1.bf16.msra.mxu1 %v8537_v46 }
 0x445   :  { %6169 = vmatprep.subr.bf16.mxu1 %v8542_v47 }
 0x448   :  { %6170 = vmatpush1.bf16.msra.mxu1 %v8540_v48 }
 0x449   :  { %6171 = vmatprep.subr.bf16.mxu1 %v8545_v49 }
 0x44c   :  { %6172 = vmatpush1.bf16.msra.mxu1 %v8543_v1 }
 0x44d   :  { %6173 = vmatprep.subr.bf16.mxu1 %v8548_v50 }
 0x450   :  { %6174 = vmatpush1.bf16.msra.mxu1 %v8546_v51 }
 0x451   :  { %6175 = vmatprep.subr.bf16.mxu1 %v8551_v53 }
 0x454   :  { %6176 = vmatpush1.bf16.msra.mxu1 %v8549_v54 }
 0x455   :  { %6177 = vmatprep.subr.bf16.mxu1 %v8554_v55 }
 0x458   :  { %6178 = vmatpush1.bf16.msra.mxu1 %v8552_v57 }
 0x459   :  { %6179 = vmatprep.subr.bf16.mxu1 %v8557_v59 }
 0x45c   :  { %6180 = vmatpush1.bf16.msra.mxu1 %v8555_v60 }
 0x45d   :  { %7225 = vmatprep.subr.bf16.mxu1 %v8558_v61 }
 0x512   :  { %v6039_v62 = vpop.f32.mrb[12].mxu1 }
 0x513   :  { %v6041_v2 = vpop.f32.mrb[13].mxu1 }
 0x514   :  { %v6046_v63 = vmax.f32 %v6039_v62, %v6041_v2  ;;  %v6043_v0 = vpop.f32.mrb[14].mxu1 }
 0x515   :  { %v6044_v3 = vpop.f32.mrb[15].mxu1 }
 0x516   :  { %v6054_v4 = vadd.f32 %v7191_v5, %v6046_v63 }
 0x518   :  { %v6055_v6 = vmax.f32 %v6054_v4, 0.0 }
 0x51a   :  { %v6056_v8 = vpack.c.bf16 %v6055_v6, %v6055_v6 }
 0x51c   :  { %6198 = vmatmul.mubr.bf16.vlgmr.msra.gmra.mrb[16].mxu1 %v6056_v8 }
 0x51d   :  { %7226 = vmatpush3.bf16.msra.mxu1 %v8559_v43 }
 0x51e   :  { %7227 = vmatprep.subr.bf16.mxu1 %v8560_v9 }
 0x521   :  { %7228 = vmatpush3.bf16.msra.mxu1 %v8561_v15 }
 0x522   :  { %7229 = vmatprep.subr.bf16.mxu1 %v8562_v17 }
 0x525   :  { %7230 = vmatpush3.bf16.msra.mxu1 %v8563_v19 }
 0x526   :  { %7231 = vmatprep.subr.bf16.mxu1 %v8564_v20 }
 0x529   :  { %7232 = vmatpush3.bf16.msra.mxu1 %v8565_v21 }
 0x52a   :  { %7233 = vmatprep.subr.bf16.mxu1 %v8566_v22 }
 0x52d   :  { %7234 = vmatpush3.bf16.msra.mxu1 %v8567_v24 }
 0x52e   :  { %7235 = vmatprep.subr.bf16.mxu1 %v8568_v25 }
 0x531   :  { %7236 = vmatpush3.bf16.msra.mxu1 %v8569_v26 }
 0x532   :  { %7237 = vmatprep.subr.bf16.mxu1 %v8570_v30 }
 0x535   :  { %7238 = vmatpush3.bf16.msra.mxu1 %v8571_v31 }
 0x536   :  { %7239 = vmatprep.subr.bf16.mxu1 %v8572_v29 }
 0x539   :  { %7240 = vmatpush3.bf16.msra.mxu1 %v8573_v34 }
 0x5ef   :  { %v6199_v52 = vpop.f32.mrb[16].mxu1 }
 0x5f0   :  { %v6200_v27 = vadd.f32 %v6199_v52, %v6078_v11  ;;  %v6201_v28 = vpop.f32.mrb[17].mxu1 }
 0x5f1   :  { %v6202_v32 = vadd.f32 %v6201_v28, %v6082_v12  ;;  %v6203_v58 = vpop.f32.mrb[18].mxu1 }
 0x5f2   :  { %v6206_v33 = vmax.f32 %v6200_v27, 0.0  ;;  %v6204_v35 = vpop.f32.mrb[19].mxu1 }
 0x5f3   :  { %v6207_v37 = vmax.f32 %v6202_v32, 0.0 }
 0x5f4   :  { %v6208_v40 = vpack.c.bf16 %v6206_v33, %v6206_v33 }
 0x5f5   :  { %v6209_v39 = vpack.c.bf16 %v6207_v37, %v6207_v37 }
 0x5f7   :  { %6377 = vmatprep.mubr.bf16.mxu1 %v6209_v39 }
 0x5f8   :  { %6378 = vmatmul.mubr.bf16.vlgmr.msra.gmra.mrb[20].mxu1 %v6208_v40 }
 0x6cb   :  { %v7241_v41 = vpop.f32.mrb[20].mxu1 }
 0x6cc   :  { %v7242_v42 = vpop.f32.mrb[21].mxu1 }
 0x6cd   :  { %v7243_v7 = vadd.f32 %v7242_v42, %v7241_v41  ;;  %v7244_v16 = vpop.f32.mrb[22].mxu1 }
 0x6ce   :  { %v7245_v18 = vpop.f32.mrb[23].mxu1 }
 0x6cf   :  { %v6380_v44 = vadd.f32 %v7243_v7, %v7208_v13 }
 0x6d1   :  { %6386 = vst.msk [vmem:[%s11297_s9] sm:$0xff] %vm6385_vm0, %v6380_v44 }

</bundles_post_ra>
